<compile_context>
chip_gen: v6e
topology: v6e:2x2x1
jax: 0.10.0
libtpu: 0.0.40
codegen_flags: <defaults>
</compile_context>

<pallas_src>
import functools

import jax
import jax.numpy as jnp
from jax.experimental import pallas as pl
from jax.experimental.pallas import tpu as pltpu

FEAT = 2048      # resnet50 feature width feeding the replaced fc head
HIDDEN = 256     # Linear(2048 -> 256)
OUT_PAD = 128    # lane-dense padded width of the tiny head output
CP_MXU = 8       # channel dim zero-padded to 8 for the MXU contraction path


def _tpu_config():
    """Pick compute path / VMEM budget from the TPU generation."""
    try:
        kind = jax.devices()[0].device_kind.lower()
    except Exception:  # pragma: no cover - defensive
        kind = ""
    is_v7 = "v7" in kind
    is_v6 = "v6" in kind
    if is_v6 or is_v7:
        # bf16 VALU + MXU available: bf16 inputs, MXU contraction, f32 accum.
        compute_dtype, use_mxu = jnp.bfloat16, True
    else:
        # v5e (no bf16 VPU) and unknown chips: f32 VPU broadcast-FMA path.
        compute_dtype, use_mxu = jnp.float32, False
    vmem_limit = (48 if is_v7 else 64) * 1024 * 1024   # v7x has 64 MiB VMEM
    tile_cap = 1024 if (is_v7 and compute_dtype == jnp.float32) else 2048
    return compute_dtype, use_mxu, vmem_limit, tile_cap


def backbone_pool_kernel(x_ref, ws_ref, o_ref, *, use_mxu):
    """One (batch b, spatial tile p) grid step of the surrogate backbone.

      x_ref : [TP, CP]    spatial tile of one image (CP=3 f32 path, 8 MXU path)
      ws_ref: [CP, FEAT]  surrogate 1x1-conv weight, pre-scaled by 1/P
      o_ref : [1, FEAT]   f32; resident accumulator across p -> pooled vector
    """
    p = pl.program_id(1)

    @pl.when(p == 0)
    def _():
        o_ref[...] = jnp.zeros_like(o_ref)

    x = x_ref[...]                       # [TP, CP]
    ws = ws_ref[...]                     # [CP, FEAT]

    if use_mxu:
        # v6e/v7x: K=8 zero-padded contraction on the MXU (bf16 in, f32 acc);
        # the VPU only does ReLU + the row reduction, which overlaps MXU issue.
        feat = jnp.dot(x, ws, preferred_element_type=jnp.float32)   # [TP, FEAT]
    else:
        # v5e / fallback: C broadcast-FMAs on the VPU (K=3 is too small for
        # the 128-wide MXU to be worthwhile there), all in f32.
        feat = x[:, 0:1] * ws[0:1, :]
        for c in range(1, x.shape[1]):
            feat = feat + x[:, c:c + 1] * ws[c:c + 1, :]
    feat = jnp.maximum(feat, 0.0)                                    # ReLU

    # Partial global-average-pool (1/P already folded into ws): accumulate the
    # spatial sum in f32 directly into the resident output block.
    o_ref[...] += jnp.sum(feat.astype(jnp.float32), axis=0, keepdims=True)


def head_kernel(pooled_ref, w1_ref, b1_ref, w2_ref, b2_ref, o_ref):
    """Replaced fc head, batched over the whole batch (Dropout = identity).

      pooled_ref: [B, FEAT] f32     w1/b1: [FEAT,HIDDEN]/[1,HIDDEN]
      w2/b2     : [HIDDEN, OUT_PAD]/[1, OUT_PAD] (lane-dense padded)
      o_ref     : [B, OUT_PAD]
    """
    h = jnp.dot(pooled_ref[...], w1_ref[...],
                preferred_element_type=jnp.float32) + b1_ref[...]
    out = jnp.dot(h, w2_ref[...],
                  preferred_element_type=jnp.float32) + b2_ref[...]
    o_ref[...] = out.astype(o_ref.dtype)


def age_estimation_forward(x_nchw, params, *, tile_p=None):
    """Wrapper: NCHW image batch -> age prediction [B, output_nodes]."""
    ws, w1, b1, w2, b2 = params
    B, C, H, W = x_nchw.shape
    P = H * W
    out_nodes = w2.shape[1]

    compute_dtype, use_mxu, vmem_limit, tile_cap = _tpu_config()

    if tile_p is None:
        cands = (2048, 1024, 512, 256, 128, 64, 32, 16, 8)
        tile_p = next((t for t in cands
                       if t <= tile_cap and P % t == 0
                       and (t % 16 == 0 or compute_dtype == jnp.float32)), None)
    assert tile_p is not None and P % tile_p == 0 and tile_p % 8 == 0, (
        "no valid spatial tile for P=%d (pad H*W to a power-of-two multiple)" % P)

    # Layout glue: NCHW -> [B, P, C] so spatial rows land on sublanes, channels
    # on lanes.  Fold the 1/P global-average-pool scale into ws (valid since
    # relu(a*x) = a*relu(x) for a > 0).
    x_bpc = jnp.transpose(x_nchw, (0, 2, 3, 1)).reshape(B, P, C)
    ws_scaled = ws * (1.0 / float(P))

    if use_mxu:
        cp = CP_MXU
        x_in = jnp.zeros((B, P, cp), compute_dtype).at[:, :, :C].set(
            x_bpc.astype(compute_dtype))
        ws_in = jnp.zeros((cp, FEAT), compute_dtype).at[:C, :].set(
            ws_scaled.astype(compute_dtype))
    else:
        cp = C
        x_in = x_bpc.astype(compute_dtype)
        ws_in = ws_scaled.astype(compute_dtype)

    backbone = functools.partial(backbone_pool_kernel, use_mxu=use_mxu)

    # --- kernel 1: surrogate backbone + global average pool -> [B, 1, FEAT] ---
    # ws (<=32 KiB) is the only constant operand left in this kernel, so its
    # double-buffer cost is negligible (no pl.Buffered(1) needed).
    pooled3 = pl.pallas_call(
        backbone,
        out_shape=jax.ShapeDtypeStruct((B, 1, FEAT), jnp.float32),
        grid_spec=pltpu.PrefetchScalarGridSpec(
            num_scalar_prefetch=0,
            grid=(B, P // tile_p),
            in_specs=[
                pl.BlockSpec((None, tile_p, cp), lambda b, p: (b, p, 0)),
                pl.BlockSpec((cp, FEAT), lambda b, p: (0, 0)),
            ],
            out_specs=pl.BlockSpec((None, 1, FEAT), lambda b, p: (b, 0, 0)),
        ),
        compiler_params=pltpu.CompilerParams(
            dimension_semantics=("parallel", "arbitrary"),
            vmem_limit_bytes=vmem_limit,
        ),
    )(x_in, ws_in)
    pooled = pooled3.reshape(B, FEAT)

    # --- kernel 2: the replaced fc head, batched over B (M=B MXU matmul) -----
    # Lane-dense padding of the tiny output (out_nodes=1 -> 128 lanes).
    w2_p = jnp.zeros((HIDDEN, OUT_PAD), jnp.float32).at[:, :out_nodes].set(
        w2.astype(jnp.float32))
    b2_p = jnp.zeros((1, OUT_PAD), jnp.float32).at[:, :out_nodes].set(
        b2.astype(jnp.float32))

    out_padded = pl.pallas_call(
        head_kernel,
        out_shape=jax.ShapeDtypeStruct((B, OUT_PAD), jnp.float32),
        grid_spec=pltpu.PrefetchScalarGridSpec(
            num_scalar_prefetch=0,
            grid=(1,),
            in_specs=[
                pl.BlockSpec((B, FEAT), lambda i: (0, 0)),
                pl.BlockSpec((FEAT, HIDDEN), lambda i: (0, 0)),
                pl.BlockSpec((1, HIDDEN), lambda i: (0, 0)),
                pl.BlockSpec((HIDDEN, OUT_PAD), lambda i: (0, 0)),
                pl.BlockSpec((1, OUT_PAD), lambda i: (0, 0)),
            ],
            out_specs=pl.BlockSpec((B, OUT_PAD), lambda i: (0, 0)),
        ),
        compiler_params=pltpu.CompilerParams(
            dimension_semantics=("arbitrary",)),
    )(pooled, w1.astype(jnp.float32), b1.astype(jnp.float32), w2_p, b2_p)

    return out_padded[:, :out_nodes]


def reference_forward(x_nchw, params, compute_dtype=jnp.float32):
    """Pure-JAX reference with identical math (same input quantization)."""
    ws, w1, b1, w2, b2 = params
    B, C, H, W = x_nchw.shape
    P = H * W
    hi = jax.lax.Precision.HIGHEST
    x_eff = jnp.transpose(x_nchw, (0, 2, 3, 1)).reshape(B, P, C)
    x_eff = x_eff.astype(compute_dtype).astype(jnp.float32)
    ws_eff = (ws * (1.0 / float(P))).astype(compute_dtype).astype(jnp.float32)
    feat = jnp.maximum(
        jnp.einsum('bpc,cf->bpf', x_eff, ws_eff, precision=hi), 0.0)
    pooled = jnp.sum(feat, axis=1)                       # 1/P folded into ws
    h = jnp.dot(pooled, w1, precision=hi) + b1
    return jnp.dot(h, w2, precision=hi) + b2


if __name__ == "__main__":
    B, C, H, W = 2, 3, 16, 16     # small NCHW image batch (resnet takes 3 ch)
    OUT_NODES = 1                 # age regression output_nodes

    key = jax.random.PRNGKey(0)
    kx, k0, k1, k2, k3 = jax.random.split(key, 5)

    x = jax.random.normal(kx, (B, C, H, W), dtype=jnp.float32)

    # Deterministic parameter init (synthetic, no checkpoint load).
    ws = jax.random.normal(k0, (C, FEAT), dtype=jnp.float32) * 0.1
    bound1 = 1.0 / float(FEAT) ** 0.5                       # PyTorch Linear default
    w1 = jax.random.uniform(k1, (FEAT, HIDDEN), jnp.float32, -bound1, bound1)
    b1 = jax.random.uniform(k2, (1, HIDDEN), jnp.float32, -bound1, bound1)
    bound2 = (6.0 / (HIDDEN + OUT_NODES)) ** 0.5            # xavier_uniform_
    w2 = jax.random.uniform(k3, (HIDDEN, OUT_NODES), jnp.float32, -bound2, bound2)
    b2 = jnp.zeros((1, OUT_NODES), jnp.float32)             # zeros_ on final bias

    params = (ws, w1, b1, w2, b2)

    # tile_p=64 -> 4 spatial tiles per image: exercises the zero / accumulate
    # pipeline even at this small demo resolution (production picks up to 2048).
    out = age_estimation_forward(x, params, tile_p=64)
    out = jax.block_until_ready(out)

    cdtype, _, _, _ = _tpu_config()
    ref = reference_forward(x, params, compute_dtype=cdtype)
    assert out.shape == (B, OUT_NODES), out.shape
    assert jnp.allclose(out, ref, atol=3e-3, rtol=3e-3), (out, ref)

    print("KERNEL_OK")
</pallas_src>

<mosaic_0001>
module attributes {stable_mosaic.version = 11 : i64} {
  func.func @backbone_pool_kernel(%arg0: i32, %arg1: i32, %arg2: memref<1x64x3xf32, #tpu.memory_space<vmem>>, %arg3: memref<3x2048xf32, #tpu.memory_space<vmem>>, %arg4: memref<1x1x2048xf32, #tpu.memory_space<vmem>>) attributes {dimension_semantics = [#tpu.dimension_semantics<parallel>, #tpu.dimension_semantics<arbitrary>], iteration_bounds = array<i64: 2, 4>, scalar_prefetch = 0 : i64, scratch_operands = 0 : i64, tpu.core_type = #tpu.core_type<tc>, window_params = [{transform_indices = @transform_0, window_bounds = array<i64: 1, 64, 3>}, {pipeline_mode = #tpu.pipeline_mode<synchronous>, transform_indices = @transform_1, window_bounds = array<i64: 3, 2048>}, {transform_indices = @transform_2, window_bounds = array<i64: 1, 1, 2048>}]} {
    %c0_i32 = arith.constant 0 : i32
    %0 = arith.cmpi eq, %arg1, %c0_i32 : i32
    %1 = arith.extui %0 : i1 to i32
    %c0_i32_0 = arith.constant 0 : i32
    %2 = arith.cmpi ne, %1, %c0_i32_0 : i32
    scf.if %2 {
      %cst_12 = arith.constant 0.000000e+00 : f32
      %33 = vector.broadcast %cst_12 : f32 to vector<1x2048xf32>
      %c0_13 = arith.constant 0 : index
      %c0_14 = arith.constant 0 : index
      %c0_15 = arith.constant 0 : index
      %34 = vector.load %arg4[%c0_13, %c0_14, %c0_15] : memref<1x1x2048xf32, #tpu.memory_space<vmem>>, vector<1x1x2048xf32>
      %35 = vector.shape_cast %34 : vector<1x1x2048xf32> to vector<1x2048xf32>
      %36 = vector.shape_cast %33 : vector<1x2048xf32> to vector<1x1x2048xf32>
      tpu.vector_store %arg4[%c0_13, %c0_14, %c0_15], %36 {strides = array<i32>} : memref<1x1x2048xf32, #tpu.memory_space<vmem>>, vector<1x1x2048xf32>,
    } else {
    }
    %c0 = arith.constant 0 : index
    %c0_1 = arith.constant 0 : index
    %c0_2 = arith.constant 0 : index
    %3 = vector.load %arg2[%c0, %c0_1, %c0_2] : memref<1x64x3xf32, #tpu.memory_space<vmem>>, vector<1x64x3xf32>
    %4 = vector.shape_cast %3 : vector<1x64x3xf32> to vector<64x3xf32>
    %c0_3 = arith.constant 0 : index
    %c0_4 = arith.constant 0 : index
    %5 = vector.load %arg3[%c0_3, %c0_4] : memref<3x2048xf32, #tpu.memory_space<vmem>>, vector<3x2048xf32>
    %6 = vector.extract_strided_slice %4 {offsets = [0, 0], sizes = [64, 1], strides = [1, 1]} : vector<64x3xf32> to vector<64x1xf32>
    %7 = vector.extract_strided_slice %5 {offsets = [0, 0], sizes = [1, 2048], strides = [1, 1]} : vector<3x2048xf32> to vector<1x2048xf32>
    %8 = vector.broadcast %6 : vector<64x1xf32> to vector<64x2048xf32>
    %9 = vector.broadcast %7 : vector<1x2048xf32> to vector<64x2048xf32>
    %10 = arith.mulf %8, %9 : vector<64x2048xf32>
    %11 = vector.extract_strided_slice %4 {offsets = [0, 1], sizes = [64, 1], strides = [1, 1]} : vector<64x3xf32> to vector<64x1xf32>
    %12 = vector.extract_strided_slice %5 {offsets = [1, 0], sizes = [1, 2048], strides = [1, 1]} : vector<3x2048xf32> to vector<1x2048xf32>
    %13 = vector.broadcast %11 : vector<64x1xf32> to vector<64x2048xf32>
    %14 = vector.broadcast %12 : vector<1x2048xf32> to vector<64x2048xf32>
    %15 = arith.mulf %13, %14 : vector<64x2048xf32>
    %16 = arith.addf %10, %15 : vector<64x2048xf32>
    %17 = vector.extract_strided_slice %4 {offsets = [0, 2], sizes = [64, 1], strides = [1, 1]} : vector<64x3xf32> to vector<64x1xf32>
    %18 = vector.extract_strided_slice %5 {offsets = [2, 0], sizes = [1, 2048], strides = [1, 1]} : vector<3x2048xf32> to vector<1x2048xf32>
    %19 = vector.broadcast %17 : vector<64x1xf32> to vector<64x2048xf32>
    %20 = vector.broadcast %18 : vector<1x2048xf32> to vector<64x2048xf32>
    %21 = arith.mulf %19, %20 : vector<64x2048xf32>
    %22 = arith.addf %16, %21 : vector<64x2048xf32>
    %cst = arith.constant 0.000000e+00 : f32
    %23 = vector.broadcast %cst : f32 to vector<64x2048xf32>
    %24 = arith.maximumf %22, %23 : vector<64x2048xf32>
    %c0_5 = arith.constant 0 : index
    %c0_6 = arith.constant 0 : index
    %c0_7 = arith.constant 0 : index
    %25 = vector.load %arg4[%c0_5, %c0_6, %c0_7] : memref<1x1x2048xf32, #tpu.memory_space<vmem>>, vector<1x1x2048xf32>
    %26 = vector.shape_cast %25 : vector<1x1x2048xf32> to vector<1x2048xf32>
    %cst_8 = arith.constant dense<0.000000e+00> : vector<2048xf32>
    %27 = vector.multi_reduction <add>, %24, %cst_8 [0] : vector<64x2048xf32> to vector<2048xf32>
    %28 = vector.shape_cast %27 : vector<2048xf32> to vector<1x2048xf32>
    %29 = arith.addf %26, %28 : vector<1x2048xf32>
    %c0_9 = arith.constant 0 : index
    %c0_10 = arith.constant 0 : index
    %c0_11 = arith.constant 0 : index
    %30 = vector.load %arg4[%c0_9, %c0_10, %c0_11] : memref<1x1x2048xf32, #tpu.memory_space<vmem>>, vector<1x1x2048xf32>
    %31 = vector.shape_cast %30 : vector<1x1x2048xf32> to vector<1x2048xf32>
    %32 = vector.shape_cast %29 : vector<1x2048xf32> to vector<1x1x2048xf32>
    tpu.vector_store %arg4[%c0_9, %c0_10, %c0_11], %32 {strides = array<i32>} : memref<1x1x2048xf32, #tpu.memory_space<vmem>>, vector<1x1x2048xf32>,
    return
  }
  func.func @transform_0(%arg0: i32, %arg1: i32) -> (i32, i32, i32) {
    %c0_i32 = arith.constant 0 : i32
    %c0_i32_0 = arith.constant 0 : i32
    return %arg0, %arg1, %c0_i32 : i32, i32, i32
  }
  func.func @transform_1(%arg0: i32, %arg1: i32) -> (i32, i32) {
    %c0_i32 = arith.constant 0 : i32
    %c0_i32_0 = arith.constant 0 : i32
    %c0_i32_1 = arith.constant 0 : i32
    return %c0_i32, %c0_i32_0 : i32, i32
  }
  func.func @transform_2(%arg0: i32, %arg1: i32) -> (i32, i32, i32) {
    %c0_i32 = arith.constant 0 : i32
    %c0_i32_0 = arith.constant 0 : i32
    %c0_i32_1 = arith.constant 0 : i32
    return %arg0, %c0_i32, %c0_i32_0 : i32, i32, i32
  }
}

</mosaic_0001>

<bundles_post_ra>
// kernel: tpu_custom_call.1
= control target key start
LH: loop header
LB: loop body
LE: loop exit
PB: predicated region body
PF: predicated region fallthrough
CT: control target
= control target key end

     0   :  { %7 = vsyncpa [#allocation3], 0  ;;  %s5278_s0 = inlined_call_operand.vmem [shape: f32[2,256,3], index: 0, kind: input, shape index: {}]   ;;  %s5279_s1 = inlined_call_operand.vmem [shape: f32[3,2048], index: 1, kind: input, shape index: {}]   ;;  %s5280_s2 = inlined_call_operand.hbm [shape: f32[2,1,2048], index: 2, kind: output, shape index: {}]  }
   0x1   :  { %9 = vsyncpa [#allocation3 + $0x1], 0  ;;  %s2148_s9 = smov 0   ;;  %s2150_s10 = smov 0  }
   0x2   :  { %s2152_s11 = smov 0   ;;  %s2154_s12 = smov 0  }
   0x3   :  { %s2156_s13 = smov 0   ;;  %s2158_s14 = smov 0  }
   0x4   :  { %s2160_s15 = smov 0   ;;  %s2162_s16 = smov 0  }
   0x5 LB: > { %s1925_s17 = sadd.s32 4294967295, %s2125_s16   ;;  %s1926_s18 = sadd.s32 4294967294, %s2125_s16   ;;  %s2125_s16 = sphi %s2162_s16, %s15_s16   ;;  %s2121_s15 = sphi %s2160_s15, %s6618_s15   ;;  %s2117_s14 = sphi %s2158_s14, %s6617_s14   ;;  %s2113_s13 = sphi %s2156_s13, %s6616_s13   ;;  %s2109_s12 = sphi %s2154_s12, %s6615_s12   ;;  %s2105_s11 = sphi %s2152_s11, %s6614_s11   ;;  %s2101_s10 = sphi %s2150_s10, %s6613_s10   ;;  %s2097_s9 = sphi %s2148_s9, %s6612_s9  }
   0x6   : > { %s24_s19 = sadd.s32 1, %s2117_s14  ;;  %s27_s20 = sadd.s32 1, %s2121_s15 }
   0x7   : > { %p25_p0 = scmp.ge.s32.totalorder %s24_s19, 4  ;;  %p93_p1 = scmp.ne.s32.totalorder %s2105_s11, %s2101_s10 }
   0x8   : > { %p94_p2 = scmp.eq.s32.totalorder %s1925_s17, 7  ;;  %p99_p4 = scmp.ne.s32.totalorder %s2101_s10, %s2097_s9 }
   0x9   : > { %s6620_s19 = smov (%p25_p0, %s24_s19), 0  ;;  %s6622_s20 = smov (!%p25_p0, %s27_s20), %s2121_s15 }
   0xa   : > { %p2197_p3 = por %p94_p2, %p93_p1  ;;  %p29_p5 = scmp.ge.s32.totalorder %s6622_s20, 2 }
   0xb   : > { %p100_p6 = scmp.eq.s32.totalorder %s1926_s18, 7  ;;  %p1929_p7 = scmp.ge.s32.totalorder %s2125_s16, 1 }
   0xc   : > { %p134_p8 = scmp.lt.s32.totalorder %s2125_s16, 9  ;;  %s6624_s20 = smov (%p29_p5, %s6622_s20), 0 }
   0xd   : > { %p2207_p9 = por %p100_p6, %p99_p4  ;;  %s80_s23 = ssub.s32 %s2121_s15, %s6624_s20 }
   0xe   : > { %p135_p10 = pnand %p1929_p7, %p134_p8  ;;  %s83_s24 = sadd.s32 1, %s2105_s11 }
   0xf   : > { %p81_p11 = scmp.eq.s32.totalorder %s80_s23, 0 }
  0x10   : > { %138 = sbr.rel (%p135_p10) target bundleno = 596 (0x254), region = 28 }
  0x11   : > { %s2215_s25 = scalar_select %p81_p11, %s2105_s11, %s83_s24  }
  0x15   : > { %s157_s26 = sand.u32 1, %s2101_s10   ;;  %s1931_s27 = sshll.u32 %s2109_s12, 3 }
  0x16   : > { %s1930_s28 = sshll.u32 %s157_s26, 4  ;;  %p161_p12 = scmp.lt.s32.totalorder %s2113_s13, 1 }
  0x17   : > { %p163_p13 = scmp.lt.s32.totalorder %s1931_s27, 31  ;;  %s2228_s8 = scalar_lea.vmem [#allocation2], %s1930_s28 }
  0x18   : > { %s162_s29 = scalar_select %p161_p12, %s2113_s13, 1 }
  0x19   : > { %s6626_s27 = smov (!%p163_p13, %s1931_s27), 31  ;;  %p1934_p0 = scmp.ne.s32.totalorder %s2109_s12, 0 }
  0x1a   : > { %s1932_s30 = sshll.u32 %s162_s29, 5 }
  0x1b   : > { %s166_s3 = sadd.s32 %s1932_s30, %s6626_s27  ;;  %173 = sbr.rel (%p1934_p0) target bundleno = 34 (0x22), region = 32 }
  0x1c   : > { %s1933_s4 = sshll.u32 %s166_s3, 3 }
  0x1d   : > { %s2226_s7 = scalar_lea.vmem %s5278_s0, %s1933_s4 }
  0x20   : > { %v2127_v0 = vmov 0.0  }
  0x21   : > { %174 = vst [vmem:[%s2228_s8] sm:$0xff] %v2127_v0  ;;  %175 = vst [vmem:[%s2228_s8 + $0x8] sm:$0xff] %v2127_v0 }
  0x22 PF: > { %v176_v1 = vld [vmem:[%s2226_s7] sm:$0xff]  ;;  %v2128_v2 = vmov 2   ;;  %v2129_v3 = vmov 1   ;;  %v177_v4 = vld [vmem:[%s2226_s7 + $0x8] sm:$0xff]  ;;  %v179_v5 = vld [vmem:[%s2226_s7 + $0x18] sm:$0xff]  ;;  %v2130_v8 = vmov 0   ;;  %v240_v12 = vlaneseq }
  0x23   : > { %2018 = vset.pattern.permute.xlu0 %v2128_v2  ;;  %2017 = vset.pattern.permute.xlu1 %v2129_v3  ;;  %v178_v6 = vld [vmem:[%s2226_s7 + $0x10] sm:$0xff]  ;;  %v180_v7 = vld [vmem:[%s2226_s7 + $0x20] sm:$0xff]  ;;  %v181_v9 = vld [vmem:[%s2226_s7 + $0x28] sm:$0xff]  ;;  %s1940_s18 = sshll.u32 %s2113_s13, 8  ;;  %s1849_s23 = sshll.u32 %s2228_s8, 4  ;;  %s1850_s23 = int_to_ptr.vmem [resolvable:$true] %s1849_s23 }
  0x24   : > { %945 = vperm.xlu0 %2018, %v176_v1   ;;  %513 = vperm.xlu1 %2017, %v176_v1   ;;  %v182_v10 = vld [vmem:[%s2226_s7 + $0x30] sm:$0xff]  ;;  %v183_v11 = vld [vmem:[%s2226_s7 + $0x38] sm:$0xff]  ;;  %v2241_v13 = vshrl.u32 %v240_v12, 7  ;;  %v2252_v16 = vld [vmem:[%s5279_s1] sm:$0x77]  ;;  %s5228_s28 = scalar_lea.hbm %s5280_s2, %s1940_s18  ;;  %s1835_s29 = scalar_lea.sflag [#allocation3], %s157_s26 }
  0x25   : > { %v2257_v17 = vld [vmem:[%s5279_s1 + $0x8] sm:$0x77]  ;;  %v2270_v23 = vld [vmem:[%s5279_s1 + $0x10] sm:$0x77]  ;;  %v2275_v24 = vld [vmem:[%s5279_s1 + $0x18] sm:$0x77] }
  0x26   : > { %5403 = vst [vmem:[#allocation5_spill] sm:$0xff] %v2241_v13  ;;  %v2244_v14 = vsub.s32 1, %v2241_v13  ;;  %v2247_v15 = vsub.s32 5, %v2241_v13  ;;  %v242_v18 = vsub.s32 0, %v2241_v13  ;;  %v246_v19 = vsub.s32 4, %v2241_v13  ;;  %s2033_s30 = scalar_lea.vmem %s1850_s23, 256 }
  0x27   : > { %v2285_v29 = vld [vmem:[%s5279_s1 + $0x20] sm:$0x77]  ;;  %v2290_v30 = vld [vmem:[%s5279_s1 + $0x28] sm:$0x77]  ;;  %v2299_v35 = vld [vmem:[%s5279_s1 + $0x30] sm:$0x77]  ;;  %p2034_p1 = scmp.ne.s32.totalorder %s1850_s23, %s2033_s30 }
  0x28   : > { %2021 = vset.pattern.permute.xlu0 %v2129_v3  ;;  %517 = vperm.xlu1 %2017, %v177_v4   ;;  %v547_v20 = vrot.slane %v2252_v16, %v2244_v14  ;;  %v551_v21 = vrot.slane %v2252_v16, %v2247_v15  ;;  %v555_v22 = vrot.slane %v2257_v17, %v2244_v14  ;;  %v2304_v36 = vld [vmem:[%s5279_s1 + $0x38] sm:$0x77]  ;;  %v978_v12 = vsub.s32 2, %v2241_v13  ;;  %s2132_s13 = smov [#allocation2]  }
  0x29   : > { %525 = vperm.xlu0 %2021, %v179_v5   ;;  %v243_v25 = vrot.slane %v2252_v16, %v242_v18  ;;  %v247_v26 = vrot.slane %v2252_v16, %v246_v19  ;;  %v251_v27 = vrot.slane %v2257_v17, %v242_v18  ;;  %v559_v28 = vrot.slane %v2257_v17, %v2247_v15  ;;  %p2035_p2 = pnand %p2034_p1, %p2197_p3  ;;  %s2037_s3 = sshll.u32 %s2132_s13, 4  ;;  %s2038_s3 = int_to_ptr.vmem [resolvable:$false] %s2037_s3 }
  0x2a   : > { %v255_v31 = vrot.slane %v2257_v17, %v246_v19  ;;  %v259_v32 = vrot.slane %v2270_v23, %v242_v18  ;;  %v263_v33 = vrot.slane %v2270_v23, %v246_v19  ;;  %v267_v34 = vrot.slane %v2275_v24, %v242_v18  ;;  %s2039_s4 = scalar_lea.vmem %s2038_s3, 512  ;;  %p2040_p5 = scmp.lt.s32.totalorder %s1850_s23, %s2038_s3 }
  0x2b   : > { %v271_v37 = vrot.slane %v2275_v24, %v246_v19  ;;  %v275_v38 = vrot.slane %v2285_v29, %v242_v18  ;;  %v279_v39 = vrot.slane %v2285_v29, %v246_v19  ;;  %v283_v40 = vrot.slane %v2290_v30, %v242_v18  ;;  %p2036_p4 = pneg %p2035_p2  ;;  %p2041_p6 = scmp.lt.s32.totalorder %s2039_s4, %s2033_s30 }
  0x2c   : > { %521 = vperm.xlu1 %2017, %v178_v6   ;;  %v287_v41 = vrot.slane %v2290_v30, %v246_v19  ;;  %v291_v42 = vrot.slane %v2299_v35, %v242_v18  ;;  %v295_v43 = vrot.slane %v2299_v35, %v246_v19  ;;  %v299_v44 = vrot.slane %v2304_v36, %v242_v18 }
  0x2d   : > { %529 = vperm.xlu0 %2021, %v180_v7   ;;  %v303_v45 = vrot.slane %v2304_v36, %v246_v19  ;;  %v2315_v46 = vrot.slane %v243_v25, %v242_v18  ;;  %v2317_v47 = vrot.slane %v247_v26, %v242_v18  ;;  %v2319_v48 = vrot.slane %v251_v27, %v242_v18  ;;  %p2042_p7 = por %p2041_p6, %p2040_p5 }
  0x2e   : > { %v2321_v49 = vrot.slane %v255_v31, %v242_v18  ;;  %v2323_v50 = vrot.slane %v259_v32, %v242_v18  ;;  %v2325_v51 = vrot.slane %v263_v33, %v242_v18  ;;  %v2327_v52 = vrot.slane %v267_v34, %v242_v18 }
  0x2f   : > { %v2329_v53 = vrot.slane %v271_v37, %v242_v18  ;;  %v2331_v54 = vrot.slane %v275_v38, %v242_v18  ;;  %v2333_v55 = vrot.slane %v279_v39, %v242_v18  ;;  %v2335_v56 = vrot.slane %v283_v40, %v242_v18  ;;  %p2043_p8 = pnand %p2042_p7, %p2036_p4 }
  0x30   : > { %2019 = vset.pattern.permute.xlu1 %v2128_v2  ;;  %v2337_v57 = vrot.slane %v287_v41, %v242_v18  ;;  %v2339_v58 = vrot.slane %v291_v42, %v242_v18  ;;  %v2341_v59 = vrot.slane %v295_v43, %v242_v18  ;;  %v2343_v60 = vrot.slane %v299_v44, %v242_v18 }
  0x31   : > { %2024 = vset.pattern.permute.xlu0 %v2130_v8  ;;  %949 = vperm.xlu1 %2019, %v177_v4   ;;  %v2345_v61 = vrot.slane %v303_v45, %v242_v18  ;;  %v563_v62 = vrot.slane %v2270_v23, %v2244_v14  ;;  %v567_v63 = vrot.slane %v2270_v23, %v2247_v15  ;;  %v982_v26 = vsub.s32 6, %v2241_v13 }
  0x32   : > { %194 = vperm.xlu0 %2024, %v176_v1   ;;  %v571_v0 = vrot.slane %v2275_v24, %v2244_v14  ;;  %v575_v1 = vrot.slane %v2275_v24, %v2247_v15  ;;  %v2379_v18 = vrot.slane %v555_v22, %v2244_v14  ;;  %v2382_v19 = vrot.slane %v559_v28, %v2244_v14 }
  0x33   : > { %v2385_v25 = vrot.slane %v563_v62, %v2244_v14  ;;  %v979_v38 = vrot.slane %v2252_v16, %v978_v12  ;;  %v983_v39 = vrot.slane %v2252_v16, %v982_v26  ;;  %v987_v40 = vrot.slane %v2257_v17, %v978_v12 }
  0x34   : > { %v991_v41 = vrot.slane %v2257_v17, %v982_v26  ;;  %v995_v42 = vrot.slane %v2270_v23, %v978_v12  ;;  %v999_v43 = vrot.slane %v2270_v23, %v982_v26  ;;  %v1003_v44 = vrot.slane %v2275_v24, %v978_v12 }
  0x35   : > { %2020 = vset.pattern.permute.xlu1 %v2130_v8  ;;  %v1007_v45 = vrot.slane %v2275_v24, %v982_v26  ;;  %v1011_v62 = vrot.slane %v2285_v29, %v978_v12  ;;  %v1023_v16 = vrot.slane %v2290_v30, %v982_v26  ;;  %v1031_v17 = vrot.slane %v2299_v35, %v982_v26 }
  0x36   : > { %199 = vperm.xlu0 %2024, %v177_v4   ;;  %209 = vperm.xlu1 %2020, %v179_v5   ;;  %v587_v4 = vrot.slane %v2290_v30, %v2244_v14  ;;  %v1039_v23 = vrot.slane %v2304_v36, %v982_v26  ;;  %v2441_v24 = vrot.slane %v987_v40, %v978_v12 }
  0x37   : > { %v2468_v40 = vrot.slane %v1031_v17, %v978_v12 }
  0x38   : > { %v2404_v28 = vrot.slane %v587_v4, %v2244_v14  ;;  %5406 = vst [vmem:[#allocation8_spill] sm:$0xff] %v2441_v24  ;;  %v2443_v4 = vrot.slane %v991_v41, %v978_v12 }
  0x39   : > { %5418 = vst [vmem:[#allocation20_spill] sm:$0xff] %v2468_v40 }
  0x3a   : > { %204 = vperm.xlu0 %2024, %v178_v6   ;;  %2022 = vset.pattern.permute.xlu1 %v2128_v2  ;;  %5407 = vst [vmem:[#allocation9_spill] sm:$0xff] %v2443_v4 }
  0x3b   : > { %953 = vperm.xlu1 %2022, %v178_v6   ;;  %v595_v6 = vrot.slane %v2299_v35, %v2244_v14 }
  0x3d   : > { %v2410_v32 = vrot.slane %v595_v6, %v2244_v14  ;;  %v2449_v6 = vrot.slane %v999_v43, %v978_v12 }
  0x3e   : > { %219 = vperm.xlu0 %2024, %v181_v9  }
  0x3f   : > { %2023 = vset.pattern.permute.xlu1 %v2130_v8  ;;  %5410 = vst [vmem:[#allocation12_spill] sm:$0xff] %v2449_v6 }
  0x40   : > { %214 = vperm.xlu1 %2023, %v180_v7  }
  0x42   : > { %224 = vperm.xlu0 %2024, %v182_v10  }
  0x44   : > { %2025 = vset.pattern.permute.xlu1 %v2128_v2 }
  0x45   : > { %957 = vperm.xlu1 %2025, %v179_v5   ;;  %v591_v5 = vrot.slane %v2290_v30, %v2247_v15 }
  0x46   : > { %2029 = vset.pattern.permute.xlu0 %v2128_v2 }
  0x47   : > { %965 = vperm.xlu0 %2029, %v181_v9   ;;  %v2407_v31 = vrot.slane %v591_v5, %v2244_v14 }
  0x49   : > { %2026 = vset.pattern.permute.xlu1 %v2129_v3 }
  0x4a   : > { %533 = vperm.xlu1 %2026, %v181_v9   ;;  %v607_v9 = vrot.slane %v2304_v36, %v2247_v15 }
  0x4b   : > { %969 = vperm.xlu0 %2029, %v182_v10  }
  0x4c   : > { %v2419_v37 = vrot.slane %v607_v9, %v2244_v14 }
  0x4e   : > { %2027 = vset.pattern.permute.xlu1 %v2128_v2 }
  0x4f   : > { %961 = vperm.xlu1 %2027, %v180_v7   ;;  %v599_v7 = vrot.slane %v2299_v35, %v2247_v15 }
  0x51   : > { %v2413_v33 = vrot.slane %v599_v7, %v2244_v14  ;;  %v2453_v7 = vrot.slane %v1007_v45, %v978_v12 }
  0x53   : > { %2028 = vset.pattern.permute.xlu1 %v2129_v3  ;;  %5412 = vst [vmem:[#allocation14_spill] sm:$0xff] %v2453_v7 }
  0x54   : > { %537 = vperm.xlu1 %2028, %v182_v10   ;;  %v2372_v10 = vrot.slane %v547_v20, %v2244_v14  ;;  %v2392_v20 = vrot.slane %v571_v0, %v2244_v14  ;;  %v1027_v0 = vrot.slane %v2299_v35, %v978_v12  ;;  %v2451_v35 = vrot.slane %v1003_v44, %v978_v12 }
  0x56   : > { %5411 = vst [vmem:[#allocation13_spill] sm:$0xff] %v2451_v35 }
  0x58   : > { %2030 = vset.pattern.permute.xlu1 %v2130_v8  ;;  %v603_v8 = vrot.slane %v2304_v36, %v2244_v14 }
  0x59   : > { %229 = vperm.xlu1 %2030, %v183_v11  }
  0x5a   : > { %v2416_v34 = vrot.slane %v603_v8, %v2244_v14 }
  0x5d   : > { %2031 = vset.pattern.permute.xlu1 %v2129_v3  ;;  %v583_v3 = vrot.slane %v2285_v29, %v2247_v15  ;;  %v2389_v15 = vrot.slane %v567_v63, %v2244_v14  ;;  %v1019_v63 = vrot.slane %v2290_v30, %v978_v12 }
  0x5e   : > { %541 = vperm.xlu1 %2031, %v183_v11  }
  0x5f   : > { %v2401_v27 = vrot.slane %v583_v3, %v2244_v14  ;;  %v2439_v3 = vrot.slane %v983_v39, %v978_v12  ;;  %v2459_v9 = vrot.slane %v1019_v63, %v978_v12 }
  0x61   : > { %5405 = vst [vmem:[#allocation7_spill] sm:$0xff] %v2439_v3  ;;  %5415 = vst [vmem:[#allocation17_spill] sm:$0xff] %v2459_v9 }
  0x62   : > { %2032 = vset.pattern.permute.xlu1 %v2128_v2  ;;  %v579_v2 = vrot.slane %v2285_v29, %v2244_v14 }
  0x63   : > { %973 = vperm.xlu1 %2032, %v183_v11   ;;  %v2375_v11 = vrot.slane %v551_v21, %v2244_v14  ;;  %v2395_v21 = vrot.slane %v575_v1, %v2244_v14  ;;  %v1035_v1 = vrot.slane %v2304_v36, %v978_v12  ;;  %v2455_v36 = vrot.slane %v1011_v62, %v978_v12 }
  0x64   : > { %v2398_v22 = vrot.slane %v579_v2, %v2244_v14  ;;  %v1015_v14 = vrot.slane %v2285_v29, %v982_v26  ;;  %v2437_v2 = vrot.slane %v979_v38, %v978_v12  ;;  %v2445_v29 = vrot.slane %v995_v42, %v978_v12 }
  0x65   : > { %5413 = vst [vmem:[#allocation15_spill] sm:$0xff] %v2455_v36  ;;  %v2461_v26 = vrot.slane %v1023_v16, %v978_v12  ;;  %v2463_v38 = vrot.slane %v1027_v0, %v978_v12  ;;  %v2470_v41 = vrot.slane %v1035_v1, %v978_v12  ;;  %v2472_v42 = vrot.slane %v1039_v23, %v978_v12 }
  0x66   : > { %5404 = vst [vmem:[#allocation6_spill] sm:$0xff] %v2437_v2  ;;  %5408 = vst [vmem:[#allocation10_spill] sm:$0xff] %v2445_v29  ;;  %v2457_v8 = vrot.slane %v1015_v14, %v978_v12 }
  0x67   : > { %5416 = vst [vmem:[#allocation18_spill] sm:$0xff] %v2461_v26  ;;  %5417 = vst [vmem:[#allocation19_spill] sm:$0xff] %v2463_v38 }
  0x68   : > { %5414 = vst [vmem:[#allocation16_spill] sm:$0xff] %v2457_v8  ;;  %5419 = vst [vmem:[#allocation21_spill] sm:$0xff] %v2470_v41 }
  0x69   : > { %5420 = vst [vmem:[#allocation22_spill] sm:$0xff] %v2472_v42 }
  0x9f   : > { %v514_v5 = vpop.permute.xlu1 %513  ;;  %v2447_v30 = vpop.permute.xlu0 %945 }
  0xa0   : > { %5409 = vst [vmem:[#allocation11_spill] sm:$0xff] %v2447_v30  ;;  %v2466_v39 = vmul.f32 %v2372_v10, %v514_v5  ;;  %v2475_v43 = vmul.f32 %v2375_v11, %v514_v5  ;;  %v2478_v44 = vmul.f32 %v2379_v18, %v514_v5  ;;  %v2481_v45 = vmul.f32 %v2382_v19, %v514_v5 }
  0xa1   : > { %v2484_v62 = vmul.f32 %v2385_v25, %v514_v5  ;;  %v2487_v63 = vmul.f32 %v2389_v15, %v514_v5  ;;  %v2490_v16 = vmul.f32 %v2392_v20, %v514_v5  ;;  %v2493_v12 = vmul.f32 %v2395_v21, %v514_v5 }
  0xa2   : > { %v2496_v0 = vmul.f32 %v2398_v22, %v514_v5  ;;  %v2501_v1 = vmul.f32 %v2401_v27, %v514_v5  ;;  %v2504_v23 = vmul.f32 %v2404_v28, %v514_v5  ;;  %v2507_v13 = vmul.f32 %v2407_v31, %v514_v5 }
  0xa3   : > { %v518_v14 = vpop.permute.xlu1 %517  ;;  %v2510_v42 = vmul.f32 %v2410_v32, %v514_v5  ;;  %v2513_v41 = vmul.f32 %v2413_v33, %v514_v5  ;;  %v2516_v40 = vmul.f32 %v2416_v34, %v514_v5  ;;  %v2519_v38 = vmul.f32 %v2419_v37, %v514_v5 }
  0xa4   : > { %v2498_v17 = vpop.permute.xlu0 %525  ;;  %5421 = vst [vmem:[#allocation23_spill] sm:$0xff] %v2501_v1  ;;  %5422 = vst [vmem:[#allocation24_spill] sm:$0xff] %v2504_v23  ;;  %v2522_v26 = vmul.f32 %v2372_v10, %v518_v14  ;;  %v2525_v9 = vmul.f32 %v2375_v11, %v518_v14  ;;  %v2528_v8 = vmul.f32 %v2379_v18, %v518_v14 }
  0xa5   : > { %5423 = vst [vmem:[#allocation25_spill] sm:$0xff] %v2507_v13  ;;  %5424 = vst [vmem:[#allocation26_spill] sm:$0xff] %v2510_v42  ;;  %v2531_v36 = vmul.f32 %v2382_v19, %v518_v14  ;;  %v2534_v7 = vmul.f32 %v2385_v25, %v518_v14  ;;  %v2537_v6 = vmul.f32 %v2389_v15, %v518_v14 }
  0xa6   : > { %5425 = vst [vmem:[#allocation27_spill] sm:$0xff] %v2513_v41  ;;  %5426 = vst [vmem:[#allocation28_spill] sm:$0xff] %v2516_v40  ;;  %v2540_v5 = vmul.f32 %v2392_v20, %v518_v14  ;;  %v2543_v29 = vmul.f32 %v2395_v21, %v518_v14  ;;  %v2546_v4 = vmul.f32 %v2398_v22, %v518_v14 }
  0xa7   : > { %5427 = vst [vmem:[#allocation29_spill] sm:$0xff] %v2519_v38  ;;  %5428 = vst [vmem:[#allocation30_spill] sm:$0xff] %v2522_v26  ;;  %v522_v35 = vpop.permute.xlu1 %521  ;;  %v2551_v3 = vmul.f32 %v2401_v27, %v518_v14  ;;  %v2554_v2 = vmul.f32 %v2404_v28, %v518_v14  ;;  %v2557_v30 = vmul.f32 %v2407_v31, %v518_v14 }
  0xa8   : > { %5429 = vst [vmem:[#allocation31_spill] sm:$0xff] %v2525_v9  ;;  %5430 = vst [vmem:[#allocation32_spill] sm:$0xff] %v2528_v8  ;;  %v2548_v24 = vpop.permute.xlu0 %529 }
  0xa9   : > { %5431 = vst [vmem:[#allocation33_spill] sm:$0xff] %v2531_v36  ;;  %5432 = vst [vmem:[#allocation34_spill] sm:$0xff] %v2534_v7 }
  0xaa   : > { %5433 = vst [vmem:[#allocation35_spill] sm:$0xff] %v2537_v6  ;;  %5434 = vst [vmem:[#allocation36_spill] sm:$0xff] %v2540_v5  ;;  %v2560_v6 = vmul.f32 %v2410_v32, %v518_v14  ;;  %v2563_v5 = vmul.f32 %v2413_v33, %v518_v14 }
  0xab   : > { %5435 = vst [vmem:[#allocation37_spill] sm:$0xff] %v2543_v29  ;;  %5436 = vst [vmem:[#allocation38_spill] sm:$0xff] %v2546_v4  ;;  %v2566_v29 = vmul.f32 %v2416_v34, %v518_v14  ;;  %v2569_v4 = vmul.f32 %v2419_v37, %v518_v14  ;;  %v2590_v14 = vmul.f32 %v2392_v20, %v522_v35 }
  0xac   : > { %5437 = vst [vmem:[#allocation39_spill] sm:$0xff] %v2551_v3  ;;  %5438 = vst [vmem:[#allocation40_spill] sm:$0xff] %v2554_v2  ;;  %v2572_v3 = vmul.f32 %v2372_v10, %v522_v35  ;;  %v2575_v2 = vmul.f32 %v2375_v11, %v522_v35 }
  0xad   : > { %5439 = vst [vmem:[#allocation41_spill] sm:$0xff] %v2557_v30  ;;  %5440 = vst [vmem:[#allocation42_spill] sm:$0xff] %v2560_v6  ;;  %v2578_v30 = vmul.f32 %v2379_v18, %v522_v35  ;;  %v2581_v6 = vmul.f32 %v2382_v19, %v522_v35 }
  0xae   : > { %5441 = vst [vmem:[#allocation43_spill] sm:$0xff] %v2563_v5  ;;  %5442 = vst [vmem:[#allocation44_spill] sm:$0xff] %v2566_v29  ;;  %v2584_v5 = vmul.f32 %v2385_v25, %v522_v35  ;;  %v2587_v29 = vmul.f32 %v2389_v15, %v522_v35 }
  0xaf   : > { %5443 = vst [vmem:[#allocation45_spill] sm:$0xff] %v2569_v4  ;;  %5444 = vst [vmem:[#allocation46_spill] sm:$0xff] %v2572_v3  ;;  %v2593_v3 = vmul.f32 %v2395_v21, %v522_v35  ;;  %v2598_v4 = vpop.permute.xlu1 %949 }
  0xb0   : > { %5445 = vst [vmem:[#allocation47_spill] sm:$0xff] %v2575_v2  ;;  %5446 = vst [vmem:[#allocation48_spill] sm:$0xff] %v2578_v30  ;;  %v2596_v2 = vmul.f32 %v2398_v22, %v522_v35  ;;  %v2601_v30 = vmul.f32 %v2401_v27, %v522_v35 }
  0xb1   : > { %5447 = vst [vmem:[#allocation49_spill] sm:$0xff] %v2581_v6  ;;  %5448 = vst [vmem:[#allocation50_spill] sm:$0xff] %v2584_v5  ;;  %v2604_v6 = vmul.f32 %v2404_v28, %v522_v35  ;;  %v2607_v5 = vmul.f32 %v2407_v31, %v522_v35 }
  0xb2   : > { %5449 = vst [vmem:[#allocation51_spill] sm:$0xff] %v2587_v29  ;;  %5450 = vst [vmem:[#allocation52_spill] sm:$0xff] %v2590_v14  ;;  %v2610_v29 = vmul.f32 %v2410_v32, %v522_v35  ;;  %v195_v14 = vpop.permute.xlu0 %194 }
  0xb3   : > { %5451 = vst [vmem:[#allocation53_spill] sm:$0xff] %v2593_v3  ;;  %5452 = vst [vmem:[#allocation54_spill] sm:$0xff] %v2596_v2  ;;  %v2613_v3 = vmul.f32 %v2413_v33, %v522_v35  ;;  %v2616_v2 = vmul.f32 %v2416_v34, %v522_v35  ;;  %v2668_v7 = vpop.permute.xlu1 %209  ;;  %v2677_v36 = vmul.f32 %v2329_v53, %v195_v14 }
  0xb4   : > { %5453 = vst [vmem:[#allocation55_spill] sm:$0xff] %v2598_v4  ;;  %5454 = vst [vmem:[#allocation56_spill] sm:$0xff] %v2601_v30  ;;  %v2619_v4 = vmul.f32 %v2419_v37, %v522_v35  ;;  %v2623_v30 = vmul.f32 %v2372_v10, %v2498_v17  ;;  %v2639_v35 = vmul.f32 %v2385_v25, %v2498_v17 }
  0xb5   : > { %5455 = vst [vmem:[#allocation57_spill] sm:$0xff] %v2604_v6  ;;  %5456 = vst [vmem:[#allocation58_spill] sm:$0xff] %v2607_v5  ;;  %v2627_v5 = vmul.f32 %v2375_v11, %v2498_v17  ;;  %v2666_v6 = vmul.f32 %v2323_v50, %v195_v14  ;;  %v2680_v8 = vmul.f32 %v2331_v54, %v195_v14 }
  0xb6   : > { %5457 = vst [vmem:[#allocation59_spill] sm:$0xff] %v2610_v29  ;;  %5458 = vst [vmem:[#allocation60_spill] sm:$0xff] %v2613_v3  ;;  %v2631_v29 = vmul.f32 %v2379_v18, %v2498_v17  ;;  %v2635_v3 = vmul.f32 %v2382_v19, %v2498_v17  ;;  %v2683_v9 = vmul.f32 %v2333_v55, %v195_v14 }
  0xb7   : > { %5459 = vst [vmem:[#allocation61_spill] sm:$0xff] %v2616_v2  ;;  %5460 = vst [vmem:[#allocation62_spill] sm:$0xff] %v2619_v4  ;;  %v2642_v4 = vmul.f32 %v2315_v46, %v195_v14  ;;  %v2663_v2 = vmul.f32 %v2321_v49, %v195_v14  ;;  %v2686_v26 = vmul.f32 %v2335_v56, %v195_v14 }
  0xb8   : > { %5461 = vst [vmem:[#allocation63_spill] sm:$0xff] %v2623_v30  ;;  %5462 = vst [vmem:[#allocation64_spill] sm:$0xff] %v2627_v5  ;;  %v2646_v30 = vmul.f32 %v2389_v15, %v2498_v17  ;;  %v2650_v5 = vmul.f32 %v2392_v20, %v2498_v17  ;;  %v2689_v38 = vmul.f32 %v2337_v57, %v195_v14 }
  0xb9   : > { %5463 = vst [vmem:[#allocation65_spill] sm:$0xff] %v2631_v29  ;;  %5464 = vst [vmem:[#allocation66_spill] sm:$0xff] %v2635_v3  ;;  %v2654_v29 = vmul.f32 %v2395_v21, %v2498_v17  ;;  %v2657_v3 = vmul.f32 %v2317_v47, %v195_v14  ;;  %v2692_v40 = vmul.f32 %v2339_v58, %v195_v14 }
  0xba   : > { %5465 = vst [vmem:[#allocation67_spill] sm:$0xff] %v2639_v35  ;;  %5466 = vst [vmem:[#allocation68_spill] sm:$0xff] %v2646_v30  ;;  %v2660_v35 = vmul.f32 %v2319_v48, %v195_v14  ;;  %v200_v30 = vpop.permute.xlu0 %199  ;;  %v2695_v41 = vmul.f32 %v2341_v59, %v195_v14  ;;  %v2698_v42 = vmul.f32 %v2343_v60, %v195_v14 }
  0xbb   : > { %5467 = vst [vmem:[#allocation69_spill] sm:$0xff] %v2650_v5  ;;  %5468 = vst [vmem:[#allocation70_spill] sm:$0xff] %v2654_v29  ;;  %v2671_v5 = vmul.f32 %v2325_v51, %v195_v14  ;;  %v2674_v29 = vmul.f32 %v2327_v52, %v195_v14  ;;  %v2701_v13 = vmul.f32 %v2345_v61, %v195_v14 }
  0xbc   : > { %5469 = vst [vmem:[#allocation71_spill] sm:$0xff] %v2686_v26  ;;  %5470 = vst [vmem:[#allocation72_spill] sm:$0xff] %v2689_v38  ;;  %v2704_v23 = vmul.f32 %v2315_v46, %v200_v30  ;;  %v2707_v26 = vmul.f32 %v2317_v47, %v200_v30  ;;  %v2710_v38 = vmul.f32 %v2319_v48, %v200_v30 }
  0xbd   : > { %5471 = vst [vmem:[#allocation73_spill] sm:$0xff] %v2692_v40  ;;  %5472 = vst [vmem:[#allocation74_spill] sm:$0xff] %v2695_v41  ;;  %v2713_v40 = vmul.f32 %v2321_v49, %v200_v30  ;;  %v2716_v41 = vmul.f32 %v2323_v50, %v200_v30  ;;  %v2722_v14 = vmul.f32 %v2327_v52, %v200_v30 }
  0xbe   : > { %5473 = vst [vmem:[#allocation75_spill] sm:$0xff] %v2698_v42  ;;  %5474 = vst [vmem:[#allocation76_spill] sm:$0xff] %v2701_v13  ;;  %v205_v1 = vpop.permute.xlu0 %204  ;;  %v2719_v42 = vmul.f32 %v2325_v51, %v200_v30  ;;  %v2739_v13 = vmul.f32 %v2337_v57, %v200_v30 }
  0xbf   : > { %5475 = vst [vmem:[#allocation77_spill] sm:$0xff] %v2704_v23  ;;  %5476 = vst [vmem:[#allocation78_spill] sm:$0xff] %v2707_v26  ;;  %v2725_v23 = vmul.f32 %v2329_v53, %v200_v30  ;;  %v2728_v26 = vmul.f32 %v2331_v54, %v200_v30 }
  0xc0   : > { %5477 = vst [vmem:[#allocation79_spill] sm:$0xff] %v2710_v38  ;;  %5478 = vst [vmem:[#allocation80_spill] sm:$0xff] %v2713_v40  ;;  %v2730_v38 = vpop.permute.xlu1 %953  ;;  %v2733_v40 = vmul.f32 %v2333_v55, %v200_v30 }
  0xc1   : > { %5479 = vst [vmem:[#allocation81_spill] sm:$0xff] %v2716_v41  ;;  %5480 = vst [vmem:[#allocation82_spill] sm:$0xff] %v2719_v42  ;;  %v2736_v41 = vmul.f32 %v2335_v56, %v200_v30  ;;  %v2742_v42 = vmul.f32 %v2339_v58, %v200_v30 }
  0xc2   : > { %5481 = vst [vmem:[#allocation83_spill] sm:$0xff] %v2722_v14  ;;  %5482 = vst [vmem:[#allocation84_spill] sm:$0xff] %v2725_v23  ;;  %v2745_v14 = vmul.f32 %v2341_v59, %v200_v30  ;;  %v2748_v23 = vmul.f32 %v2343_v60, %v200_v30 }
  0xc3   : > { %5483 = vst [vmem:[#allocation85_spill] sm:$0xff] %v2730_v38  ;;  %5484 = vst [vmem:[#allocation86_spill] sm:$0xff] %v2733_v40  ;;  %v2751_v38 = vmul.f32 %v2345_v61, %v200_v30  ;;  %v2754_v40 = vmul.f32 %v2315_v46, %v205_v1  ;;  %v2772_v30 = vmul.f32 %v2327_v52, %v205_v1 }
  0xc4   : > { %5485 = vst [vmem:[#allocation87_spill] sm:$0xff] %v2736_v41  ;;  %5486 = vst [vmem:[#allocation88_spill] sm:$0xff] %v2739_v13  ;;  %v2757_v41 = vmul.f32 %v2317_v47, %v205_v1  ;;  %v2760_v13 = vmul.f32 %v2319_v48, %v205_v1 }
  0xc5   : > { %5487 = vst [vmem:[#allocation89_spill] sm:$0xff] %v2742_v42  ;;  %5488 = vst [vmem:[#allocation90_spill] sm:$0xff] %v2745_v14  ;;  %v2763_v42 = vmul.f32 %v2321_v49, %v205_v1  ;;  %v2766_v14 = vmul.f32 %v2323_v50, %v205_v1 }
  0xc6   : > { %5489 = vst [vmem:[#allocation91_spill] sm:$0xff] %v2748_v23  ;;  %5490 = vst [vmem:[#allocation92_spill] sm:$0xff] %v2751_v38  ;;  %v2769_v23 = vmul.f32 %v2325_v51, %v205_v1  ;;  %v215_v38 = vpop.permute.xlu1 %214 }
  0xc7   : > { %5491 = vst [vmem:[#allocation93_spill] sm:$0xff] %v2754_v40  ;;  %5492 = vst [vmem:[#allocation94_spill] sm:$0xff] %v2757_v41  ;;  %v2775_v40 = vmul.f32 %v2329_v53, %v205_v1  ;;  %v2778_v41 = vmul.f32 %v2331_v54, %v205_v1 }
  0xc8   : > { %5493 = vst [vmem:[#allocation95_spill] sm:$0xff] %v2760_v13  ;;  %5494 = vst [vmem:[#allocation96_spill] sm:$0xff] %v2763_v42  ;;  %v2781_v13 = vmul.f32 %v2333_v55, %v205_v1  ;;  %v2784_v42 = vmul.f32 %v2335_v56, %v205_v1 }
  0xc9   : > { %5495 = vst [vmem:[#allocation97_spill] sm:$0xff] %v2766_v14  ;;  %5496 = vst [vmem:[#allocation98_spill] sm:$0xff] %v2769_v23  ;;  %v2787_v14 = vmul.f32 %v2337_v57, %v205_v1  ;;  %v2790_v23 = vmul.f32 %v2339_v58, %v205_v1 }
  0xca   : > { %5497 = vst [vmem:[#allocation99_spill] sm:$0xff] %v2772_v30  ;;  %5498 = vst [vmem:[#allocation100_spill] sm:$0xff] %v2775_v40  ;;  %v2793_v30 = vmul.f32 %v2341_v59, %v205_v1  ;;  %v2796_v40 = vmul.f32 %v2343_v60, %v205_v1 }
  0xcb   : > { %5499 = vst [vmem:[#allocation101_spill] sm:$0xff] %v2778_v41  ;;  %5500 = vst [vmem:[#allocation102_spill] sm:$0xff] %v2781_v13  ;;  %v2799_v41 = vmul.f32 %v2345_v61, %v205_v1  ;;  %v2803_v13 = vmul.f32 %v2315_v46, %v2668_v7  ;;  %v2819_v1 = vmul.f32 %v2323_v50, %v2668_v7 }
  0xcc   : > { %5501 = vst [vmem:[#allocation103_spill] sm:$0xff] %v2784_v42  ;;  %5502 = vst [vmem:[#allocation104_spill] sm:$0xff] %v2787_v14  ;;  %v2807_v14 = vmul.f32 %v2317_v47, %v2668_v7  ;;  %v2871_v42 = vmul.f32 %v2317_v47, %v215_v38 }
  0xcd   : > { %5503 = vst [vmem:[#allocation105_spill] sm:$0xff] %v2790_v23  ;;  %5504 = vst [vmem:[#allocation106_spill] sm:$0xff] %v2793_v30  ;;  %v2811_v23 = vmul.f32 %v2319_v48, %v2668_v7  ;;  %v2815_v30 = vmul.f32 %v2321_v49, %v2668_v7 }
  0xce   : > { %5505 = vst [vmem:[#allocation107_spill] sm:$0xff] %v2796_v40  ;;  %5506 = vst [vmem:[#allocation108_spill] sm:$0xff] %v2799_v41  ;;  %v2823_v41 = vmul.f32 %v2325_v51, %v2668_v7  ;;  %v2859_v40 = vmul.f32 %v2343_v60, %v2668_v7 }
  0xcf   : > { %5507 = vst [vmem:[#allocation109_spill] sm:$0xff] %v2803_v13  ;;  %5508 = vst [vmem:[#allocation110_spill] sm:$0xff] %v2807_v14  ;;  %v2827_v13 = vmul.f32 %v2327_v52, %v2668_v7  ;;  %v2831_v14 = vmul.f32 %v2329_v53, %v2668_v7 }
  0xd0   : > { %5509 = vst [vmem:[#allocation111_spill] sm:$0xff] %v2811_v23  ;;  %5510 = vst [vmem:[#allocation112_spill] sm:$0xff] %v2815_v30  ;;  %v2835_v23 = vmul.f32 %v2331_v54, %v2668_v7  ;;  %v220_v30 = vpop.permute.xlu0 %219 }
  0xd1   : > { %5511 = vst [vmem:[#allocation113_spill] sm:$0xff] %v2819_v1  ;;  %5512 = vst [vmem:[#allocation114_spill] sm:$0xff] %v2823_v41  ;;  %v2839_v1 = vmul.f32 %v2333_v55, %v2668_v7  ;;  %v2843_v41 = vmul.f32 %v2335_v56, %v2668_v7 }
  0xd2   : > { %5513 = vst [vmem:[#allocation115_spill] sm:$0xff] %v2827_v13  ;;  %5514 = vst [vmem:[#allocation116_spill] sm:$0xff] %v2831_v14  ;;  %v2847_v13 = vmul.f32 %v2337_v57, %v2668_v7  ;;  %v2851_v14 = vmul.f32 %v2339_v58, %v2668_v7 }
  0xd3   : > { %5515 = vst [vmem:[#allocation117_spill] sm:$0xff] %v2835_v23  ;;  %5516 = vst [vmem:[#allocation118_spill] sm:$0xff] %v2839_v1  ;;  %v2855_v23 = vmul.f32 %v2341_v59, %v2668_v7  ;;  %v2863_v1 = vmul.f32 %v2345_v61, %v2668_v7  ;;  %v2883_v7 = vmul.f32 %v2325_v51, %v215_v38 }
  0xd4   : > { %5517 = vst [vmem:[#allocation119_spill] sm:$0xff] %v2843_v41  ;;  %5518 = vst [vmem:[#allocation120_spill] sm:$0xff] %v2847_v13  ;;  %v2866_v41 = vmul.f32 %v2315_v46, %v215_v38  ;;  %v2868_v13 = vpop.permute.xlu1 %957 }
  0xd5   : > { %5519 = vst [vmem:[#allocation121_spill] sm:$0xff] %v2851_v14  ;;  %5520 = vst [vmem:[#allocation122_spill] sm:$0xff] %v2855_v23  ;;  %v2874_v14 = vmul.f32 %v2319_v48, %v215_v38  ;;  %v2877_v23 = vmul.f32 %v2321_v49, %v215_v38 }
  0xd6   : > { %5521 = vst [vmem:[#allocation123_spill] sm:$0xff] %v2859_v40  ;;  %5522 = vst [vmem:[#allocation124_spill] sm:$0xff] %v2863_v1  ;;  %v2880_v40 = vmul.f32 %v2323_v50, %v215_v38  ;;  %v2886_v1 = vmul.f32 %v2327_v52, %v215_v38 }
  0xd7   : > { %5523 = vst [vmem:[#allocation125_spill] sm:$0xff] %v2866_v41  ;;  %5524 = vst [vmem:[#allocation126_spill] sm:$0xff] %v2868_v13  ;;  %v2889_v13 = vmul.f32 %v2329_v53, %v215_v38  ;;  %v225_v41 = vpop.permute.xlu0 %224 }
  0xd8   : > { %5525 = vst [vmem:[#allocation127_spill] sm:$0xff] %v2871_v42  ;;  %5526 = vst [vmem:[#allocation128_spill] sm:$0xff] %v2874_v14  ;;  %v2892_v42 = vmul.f32 %v2331_v54, %v215_v38  ;;  %v2895_v14 = vmul.f32 %v2333_v55, %v215_v38 }
  0xd9   : > { %5527 = vst [vmem:[#allocation129_spill] sm:$0xff] %v2877_v23  ;;  %5528 = vst [vmem:[#allocation130_spill] sm:$0xff] %v2880_v40  ;;  %v2898_v23 = vmul.f32 %v2335_v56, %v215_v38  ;;  %v2901_v40 = vmul.f32 %v2337_v57, %v215_v38 }
  0xda   : > { %5529 = vst [vmem:[#allocation131_spill] sm:$0xff] %v2883_v7  ;;  %5530 = vst [vmem:[#allocation132_spill] sm:$0xff] %v2886_v1  ;;  %v2904_v7 = vmul.f32 %v2339_v58, %v215_v38  ;;  %v2907_v1 = vmul.f32 %v2341_v59, %v215_v38 }
  0xdb   : > { %5531 = vst [vmem:[#allocation133_spill] sm:$0xff] %v2889_v13  ;;  %5532 = vst [vmem:[#allocation134_spill] sm:$0xff] %v2892_v42  ;;  %v2910_v13 = vmul.f32 %v2343_v60, %v215_v38  ;;  %v2913_v42 = vmul.f32 %v2345_v61, %v215_v38  ;;  %v2933_v38 = vmul.f32 %v2325_v51, %v220_v30 }
  0xdc   : > { %5533 = vst [vmem:[#allocation135_spill] sm:$0xff] %v2895_v14  ;;  %5534 = vst [vmem:[#allocation136_spill] sm:$0xff] %v2898_v23  ;;  %v2916_v14 = vmul.f32 %v2315_v46, %v220_v30  ;;  %v2919_v23 = vmul.f32 %v2317_v47, %v220_v30 }
  0xdd   : > { %5535 = vst [vmem:[#allocation137_spill] sm:$0xff] %v2901_v40  ;;  %5536 = vst [vmem:[#allocation138_spill] sm:$0xff] %v2904_v7  ;;  %v2922_v40 = vmul.f32 %v2319_v48, %v220_v30  ;;  %v2925_v7 = vmul.f32 %v2321_v49, %v220_v30 }
  0xde   : > { %5537 = vst [vmem:[#allocation139_spill] sm:$0xff] %v2907_v1  ;;  %5538 = vst [vmem:[#allocation140_spill] sm:$0xff] %v2910_v13  ;;  %v2928_v1 = vmul.f32 %v2323_v50, %v220_v30  ;;  %v2930_v13 = vpop.permute.xlu1 %533 }
  0xdf   : > { %5539 = vst [vmem:[#allocation141_spill] sm:$0xff] %v2913_v42  ;;  %5540 = vst [vmem:[#allocation142_spill] sm:$0xff] %v2916_v14  ;;  %v2936_v14 = vmul.f32 %v2327_v52, %v220_v30  ;;  %v2939_v42 = vmul.f32 %v2329_v53, %v220_v30 }
  0xe0   : > { %5541 = vst [vmem:[#allocation143_spill] sm:$0xff] %v2919_v23  ;;  %5542 = vst [vmem:[#allocation144_spill] sm:$0xff] %v2922_v40  ;;  %v2942_v23 = vmul.f32 %v2331_v54, %v220_v30  ;;  %v2945_v40 = vmul.f32 %v2333_v55, %v220_v30 }
  0xe1   : > { %5543 = vst [vmem:[#allocation145_spill] sm:$0xff] %v2925_v7  ;;  %5544 = vst [vmem:[#allocation146_spill] sm:$0xff] %v2928_v1  ;;  %v2948_v7 = vmul.f32 %v2335_v56, %v220_v30  ;;  %v2951_v1 = vmul.f32 %v2337_v57, %v220_v30 }
  0xe2   : > { %5545 = vst [vmem:[#allocation147_spill] sm:$0xff] %v2933_v38  ;;  %5546 = vst [vmem:[#allocation148_spill] sm:$0xff] %v2936_v14  ;;  %v2954_v38 = vmul.f32 %v2339_v58, %v220_v30  ;;  %v2957_v14 = vmul.f32 %v2341_v59, %v220_v30 }
  0xe3   : > { %5547 = vst [vmem:[#allocation149_spill] sm:$0xff] %v2939_v42  ;;  %5548 = vst [vmem:[#allocation150_spill] sm:$0xff] %v2942_v23  ;;  %v2960_v42 = vmul.f32 %v2343_v60, %v220_v30  ;;  %v2963_v23 = vmul.f32 %v2345_v61, %v220_v30  ;;  %v2984_v30 = vmul.f32 %v2327_v52, %v225_v41 }
  0xe4   : > { %5549 = vst [vmem:[#allocation151_spill] sm:$0xff] %v2945_v40  ;;  %5550 = vst [vmem:[#allocation152_spill] sm:$0xff] %v2948_v7  ;;  %v2966_v40 = vmul.f32 %v2315_v46, %v225_v41  ;;  %v2969_v7 = vmul.f32 %v2317_v47, %v225_v41 }
  0xe5   : > { %5551 = vst [vmem:[#allocation153_spill] sm:$0xff] %v2951_v1  ;;  %5552 = vst [vmem:[#allocation154_spill] sm:$0xff] %v2954_v38  ;;  %v2972_v1 = vmul.f32 %v2319_v48, %v225_v41  ;;  %v2975_v38 = vmul.f32 %v2321_v49, %v225_v41 }
  0xe6   : > { %5553 = vst [vmem:[#allocation155_spill] sm:$0xff] %v2957_v14  ;;  %5554 = vst [vmem:[#allocation156_spill] sm:$0xff] %v2960_v42  ;;  %v2978_v14 = vmul.f32 %v2323_v50, %v225_v41  ;;  %v2981_v42 = vmul.f32 %v2325_v51, %v225_v41 }
  0xe7   : > { %5555 = vst [vmem:[#allocation157_spill] sm:$0xff] %v2963_v23  ;;  %5556 = vst [vmem:[#allocation158_spill] sm:$0xff] %v2966_v40  ;;  %v2987_v40 = vmul.f32 %v2329_v53, %v225_v41  ;;  %v2992_v23 = vpop.permute.xlu1 %961 }
  0xe8   : > { %5557 = vst [vmem:[#allocation159_spill] sm:$0xff] %v2969_v7  ;;  %5558 = vst [vmem:[#allocation160_spill] sm:$0xff] %v2972_v1  ;;  %v2990_v7 = vmul.f32 %v2331_v54, %v225_v41  ;;  %v2995_v1 = vmul.f32 %v2333_v55, %v225_v41 }
  0xe9   : > { %5559 = vst [vmem:[#allocation161_spill] sm:$0xff] %v2975_v38  ;;  %5560 = vst [vmem:[#allocation162_spill] sm:$0xff] %v2978_v14  ;;  %v2998_v38 = vmul.f32 %v2335_v56, %v225_v41  ;;  %v3001_v14 = vmul.f32 %v2337_v57, %v225_v41 }
  0xea   : > { %5561 = vst [vmem:[#allocation163_spill] sm:$0xff] %v2981_v42  ;;  %5562 = vst [vmem:[#allocation164_spill] sm:$0xff] %v2984_v30  ;;  %v3004_v42 = vmul.f32 %v2339_v58, %v225_v41  ;;  %v3007_v30 = vmul.f32 %v2341_v59, %v225_v41 }
  0xeb   : > { %5563 = vst [vmem:[#allocation165_spill] sm:$0xff] %v2987_v40  ;;  %5564 = vst [vmem:[#allocation166_spill] sm:$0xff] %v2990_v7  ;;  %v3010_v40 = vmul.f32 %v2343_v60, %v225_v41  ;;  %v3049_v7 = vmul.f32 %v2372_v10, %v2548_v24 }
  0xec   : > { %5565 = vst [vmem:[#allocation167_spill] sm:$0xff] %v2992_v23  ;;  %5566 = vst [vmem:[#allocation168_spill] sm:$0xff] %v2995_v1  ;;  %v3013_v23 = vmul.f32 %v2345_v61, %v225_v41  ;;  %v3017_v1 = vmul.f32 %v2398_v22, %v2498_v17  ;;  %v3033_v41 = vmul.f32 %v2410_v32, %v2498_v17 }
  0xed   : > { %5567 = vst [vmem:[#allocation169_spill] sm:$0xff] %v2998_v38  ;;  %5568 = vst [vmem:[#allocation170_spill] sm:$0xff] %v3001_v14  ;;  %v3021_v38 = vmul.f32 %v2401_v27, %v2498_v17  ;;  %v3045_v14 = vmul.f32 %v2419_v37, %v2498_v17 }
  0xee   : > { %5569 = vst [vmem:[#allocation171_spill] sm:$0xff] %v3004_v42  ;;  %5570 = vst [vmem:[#allocation172_spill] sm:$0xff] %v3007_v30  ;;  %v3025_v42 = vmul.f32 %v2404_v28, %v2498_v17  ;;  %v3029_v30 = vmul.f32 %v2407_v31, %v2498_v17 }
  0xef   : > { %5571 = vst [vmem:[#allocation173_spill] sm:$0xff] %v3010_v40  ;;  %5572 = vst [vmem:[#allocation174_spill] sm:$0xff] %v3013_v23  ;;  %v3037_v23 = vmul.f32 %v2413_v33, %v2498_v17  ;;  %v3041_v40 = vmul.f32 %v2416_v34, %v2498_v17  ;;  %v3065_v17 = vmul.f32 %v2385_v25, %v2548_v24 }
  0xf0   : > { %5573 = vst [vmem:[#allocation175_spill] sm:$0xff] %v3025_v42  ;;  %5574 = vst [vmem:[#allocation176_spill] sm:$0xff] %v3029_v30  ;;  %v3053_v30 = vmul.f32 %v2375_v11, %v2548_v24 }
  0xf1   : > { %5575 = vst [vmem:[#allocation177_spill] sm:$0xff] %v3033_v41  ;;  %5576 = vst [vmem:[#allocation178_spill] sm:$0xff] %v3037_v23  ;;  %v3057_v41 = vmul.f32 %v2379_v18, %v2548_v24  ;;  %v3061_v23 = vmul.f32 %v2382_v19, %v2548_v24 }
  0xf2   : > { %5577 = vst [vmem:[#allocation179_spill] sm:$0xff] %v3041_v40  ;;  %5578 = vst [vmem:[#allocation180_spill] sm:$0xff] %v3045_v14  ;;  %v538_v14 = vpop.permute.xlu1 %537  ;;  %v3089_v40 = vmul.f32 %v2404_v28, %v2548_v24 }
  0xf3   : > { %5579 = vst [vmem:[#allocation181_spill] sm:$0xff] %v3049_v7  ;;  %5580 = vst [vmem:[#allocation182_spill] sm:$0xff] %v3053_v30  ;;  %v3069_v7 = vmul.f32 %v2389_v15, %v2548_v24  ;;  %v3073_v30 = vmul.f32 %v2392_v20, %v2548_v24  ;;  %v3185_v42 = vmul.f32 %v2379_v18, %v538_v14 }
  0xf4   : > { %5581 = vst [vmem:[#allocation183_spill] sm:$0xff] %v3057_v41  ;;  %5582 = vst [vmem:[#allocation184_spill] sm:$0xff] %v3061_v23  ;;  %v3077_v41 = vmul.f32 %v2395_v21, %v2548_v24  ;;  %v3081_v23 = vmul.f32 %v2398_v22, %v2548_v24 }
  0xf5   : > { %5583 = vst [vmem:[#allocation185_spill] sm:$0xff] %v3065_v17  ;;  %5584 = vst [vmem:[#allocation186_spill] sm:$0xff] %v3069_v7  ;;  %v3085_v17 = vmul.f32 %v2401_v27, %v2548_v24  ;;  %v3093_v7 = vmul.f32 %v2407_v31, %v2548_v24 }
  0xf6   : > { %5585 = vst [vmem:[#allocation187_spill] sm:$0xff] %v3073_v30  ;;  %5586 = vst [vmem:[#allocation188_spill] sm:$0xff] %v3077_v41  ;;  %v3097_v30 = vmul.f32 %v2410_v32, %v2548_v24  ;;  %v3101_v41 = vmul.f32 %v2413_v33, %v2548_v24 }
  0xf7   : > { %5587 = vst [vmem:[#allocation189_spill] sm:$0xff] %v3081_v23  ;;  %5588 = vst [vmem:[#allocation190_spill] sm:$0xff] %v3085_v17  ;;  %v3105_v23 = vmul.f32 %v2416_v34, %v2548_v24  ;;  %v3109_v17 = vmul.f32 %v2419_v37, %v2548_v24  ;;  %v3129_v24 = vmul.f32 %v2385_v25, %v2930_v13 }
  0xf8   : > { %5589 = vst [vmem:[#allocation191_spill] sm:$0xff] %v3089_v40  ;;  %5590 = vst [vmem:[#allocation192_spill] sm:$0xff] %v3093_v7  ;;  %v3113_v40 = vmul.f32 %v2372_v10, %v2930_v13  ;;  %v3117_v7 = vmul.f32 %v2375_v11, %v2930_v13 }
  0xf9   : > { %5591 = vst [vmem:[#allocation193_spill] sm:$0xff] %v3097_v30  ;;  %5592 = vst [vmem:[#allocation194_spill] sm:$0xff] %v3101_v41  ;;  %v3121_v30 = vmul.f32 %v2379_v18, %v2930_v13  ;;  %v3125_v41 = vmul.f32 %v2382_v19, %v2930_v13 }
  0xfa   : > { %5593 = vst [vmem:[#allocation195_spill] sm:$0xff] %v3105_v23  ;;  %5594 = vst [vmem:[#allocation196_spill] sm:$0xff] %v3109_v17  ;;  %v3133_v17 = vmul.f32 %v2389_v15, %v2930_v13  ;;  %v3169_v23 = vmul.f32 %v2416_v34, %v2930_v13 }
  0xfb   : > { %5595 = vst [vmem:[#allocation197_spill] sm:$0xff] %v3113_v40  ;;  %5596 = vst [vmem:[#allocation198_spill] sm:$0xff] %v3117_v7  ;;  %v3137_v40 = vmul.f32 %v2392_v20, %v2930_v13  ;;  %v3141_v7 = vmul.f32 %v2395_v21, %v2930_v13 }
  0xfc   : > { %5597 = vst [vmem:[#allocation199_spill] sm:$0xff] %v3121_v30  ;;  %5598 = vst [vmem:[#allocation200_spill] sm:$0xff] %v3125_v41  ;;  %v3145_v30 = vmul.f32 %v2398_v22, %v2930_v13  ;;  %v230_v41 = vpop.permute.xlu1 %229 }
  0xfd   : > { %5599 = vst [vmem:[#allocation201_spill] sm:$0xff] %v3129_v24  ;;  %5600 = vst [vmem:[#allocation202_spill] sm:$0xff] %v3133_v17  ;;  %v3149_v24 = vmul.f32 %v2401_v27, %v2930_v13  ;;  %v3153_v17 = vmul.f32 %v2404_v28, %v2930_v13 }
  0xfe   : > { %5601 = vst [vmem:[#allocation203_spill] sm:$0xff] %v3137_v40  ;;  %5602 = vst [vmem:[#allocation204_spill] sm:$0xff] %v3141_v7  ;;  %v3157_v40 = vmul.f32 %v2407_v31, %v2930_v13  ;;  %v3161_v7 = vmul.f32 %v2410_v32, %v2930_v13 }
  0xff   : > { %5603 = vst [vmem:[#allocation205_spill] sm:$0xff] %v3145_v30  ;;  %5604 = vst [vmem:[#allocation206_spill] sm:$0xff] %v3149_v24  ;;  %v3165_v30 = vmul.f32 %v2413_v33, %v2930_v13  ;;  %v3173_v24 = vmul.f32 %v2419_v37, %v2930_v13  ;;  %v3194_v13 = vmul.f32 %v2319_v48, %v230_v41 }
 0x100   : > { %5605 = vst [vmem:[#allocation207_spill] sm:$0xff] %v3153_v17  ;;  %5606 = vst [vmem:[#allocation208_spill] sm:$0xff] %v3157_v40  ;;  %v3176_v17 = vmul.f32 %v2372_v10, %v538_v14  ;;  %v3179_v40 = vmul.f32 %v2315_v46, %v230_v41  ;;  %v3200_v46 = vmul.f32 %v2323_v50, %v230_v41 }
 0x101   : > { %5607 = vst [vmem:[#allocation209_spill] sm:$0xff] %v3161_v7  ;;  %5608 = vst [vmem:[#allocation210_spill] sm:$0xff] %v3165_v30  ;;  %v3182_v7 = vmul.f32 %v2375_v11, %v538_v14  ;;  %v3188_v30 = vmul.f32 %v2382_v19, %v538_v14  ;;  %v3215_v48 = vmul.f32 %v2333_v55, %v230_v41 }
 0x102   : > { %5609 = vst [vmem:[#allocation211_spill] sm:$0xff] %v3169_v23  ;;  %5610 = vst [vmem:[#allocation212_spill] sm:$0xff] %v3176_v17  ;;  %v3191_v23 = vmul.f32 %v2317_v47, %v230_v41  ;;  %v3197_v17 = vmul.f32 %v2321_v49, %v230_v41  ;;  %v3212_v47 = vmul.f32 %v2331_v54, %v230_v41 }
 0x103   : > { %5611 = vst [vmem:[#allocation213_spill] sm:$0xff] %v3179_v40  ;;  %5612 = vst [vmem:[#allocation214_spill] sm:$0xff] %v3185_v42  ;;  %v3203_v40 = vmul.f32 %v2325_v51, %v230_v41  ;;  %v3206_v42 = vmul.f32 %v2327_v52, %v230_v41  ;;  %v3218_v49 = vmul.f32 %v2335_v56, %v230_v41  ;;  %v542_v52 = vpop.permute.xlu1 %541 }
 0x104   : > { %5613 = vst [vmem:[#allocation215_spill] sm:$0xff] %v3188_v30  ;;  %v3209_v30 = vmul.f32 %v2329_v53, %v230_v41  ;;  %5617 = vst [vmem:[#allocation219_spill] sm:$0xff] %v3212_v47  ;;  %v3221_v50 = vmul.f32 %v2337_v57, %v230_v41  ;;  %v3224_v51 = vmul.f32 %v2339_v58, %v230_v41 }
 0x105   : > { %5614 = vst [vmem:[#allocation216_spill] sm:$0xff] %v3203_v40  ;;  %5615 = vst [vmem:[#allocation217_spill] sm:$0xff] %v3206_v42  ;;  %v3227_v42 = vmul.f32 %v2341_v59, %v230_v41  ;;  %v3230_v53 = vmul.f32 %v2343_v60, %v230_v41  ;;  %v3233_v54 = vmul.f32 %v2345_v61, %v230_v41 }
 0x106   : > { %5616 = vst [vmem:[#allocation218_spill] sm:$0xff] %v3209_v30  ;;  %5618 = vst [vmem:[#allocation220_spill] sm:$0xff] %v3215_v48  ;;  %v3236_v55 = vmul.f32 %v2385_v25, %v538_v14  ;;  %v3239_v56 = vmul.f32 %v2389_v15, %v538_v14  ;;  %v3242_v57 = vmul.f32 %v2392_v20, %v538_v14 }
 0x107   : > { %5619 = vst [vmem:[#allocation221_spill] sm:$0xff] %v3218_v49  ;;  %5620 = vst [vmem:[#allocation222_spill] sm:$0xff] %v3221_v50  ;;  %v3245_v58 = vmul.f32 %v2395_v21, %v538_v14  ;;  %v3248_v59 = vmul.f32 %v2398_v22, %v538_v14  ;;  %v3251_v60 = vmul.f32 %v2401_v27, %v538_v14 }
 0x108   : > { %5621 = vst [vmem:[#allocation223_spill] sm:$0xff] %v3224_v51  ;;  %5622 = vst [vmem:[#allocation224_spill] sm:$0xff] %v3227_v42  ;;  %v3254_v61 = vmul.f32 %v2404_v28, %v538_v14  ;;  %v3257_v41 = vmul.f32 %v2407_v31, %v538_v14  ;;  %v3266_v42 = vmul.f32 %v2416_v34, %v538_v14 }
 0x109   : > { %5623 = vst [vmem:[#allocation225_spill] sm:$0xff] %v3230_v53  ;;  %5624 = vst [vmem:[#allocation226_spill] sm:$0xff] %v3233_v54  ;;  %v3260_v54 = vmul.f32 %v2410_v32, %v538_v14  ;;  %v3263_v53 = vmul.f32 %v2413_v33, %v538_v14  ;;  %v3269_v51 = vmul.f32 %v2419_v37, %v538_v14 }
 0x10a   : > { %v3272_v50 = vmul.f32 %v2372_v10, %v542_v52  ;;  %v3275_v49 = vmul.f32 %v2375_v11, %v542_v52  ;;  %v3278_v48 = vmul.f32 %v2379_v18, %v542_v52  ;;  %v3281_v47 = vmul.f32 %v2382_v19, %v542_v52 }
 0x10b   : > { %v3284_v30 = vmul.f32 %v2385_v25, %v542_v52  ;;  %v3287_v40 = vmul.f32 %v2389_v15, %v542_v52  ;;  %v3290_v14 = vmul.f32 %v2392_v20, %v542_v52  ;;  %v3293_v10 = vmul.f32 %v2395_v21, %v542_v52 }
 0x10c   : > { %v3296_v11 = vmul.f32 %v2398_v22, %v542_v52  ;;  %v3299_v18 = vmul.f32 %v2401_v27, %v542_v52  ;;  %v3302_v19 = vmul.f32 %v2404_v28, %v542_v52  ;;  %v3305_v25 = vmul.f32 %v2407_v31, %v542_v52 }
 0x10d   : > { %v3308_v15 = vmul.f32 %v2410_v32, %v542_v52  ;;  %v3311_v20 = vmul.f32 %v2413_v33, %v542_v52  ;;  %v3314_v21 = vmul.f32 %v2416_v34, %v542_v52  ;;  %v3317_v22 = vmul.f32 %v2419_v37, %v542_v52  ;;  %v5641_v52 = vld [vmem:[#allocation76_spill] sm:$0xff] }
 0x10e   : > { %v3321_v27 = vadd.f32 %v2466_v39, %v2642_v4  ;;  %v3325_v28 = vadd.f32 %v2475_v43, %v2657_v3  ;;  %v3329_v31 = vadd.f32 %v2478_v44, %v2660_v35  ;;  %v3333_v32 = vadd.f32 %v2481_v45, %v2663_v2  ;;  %v5625_v4 = vld [vmem:[#allocation23_spill] sm:$0xff]  ;;  %v5627_v43 = vld [vmem:[#allocation24_spill] sm:$0xff] }
 0x10f   : > { %v3337_v33 = vadd.f32 %v2484_v62, %v2666_v6  ;;  %v3341_v34 = vadd.f32 %v2487_v63, %v2671_v5  ;;  %v3345_v37 = vadd.f32 %v2490_v16, %v2674_v29  ;;  %v3349_v3 = vadd.f32 %v2493_v12, %v2677_v36  ;;  %v5626_v39 = vld [vmem:[#allocation71_spill] sm:$0xff]  ;;  %v5629_v45 = vld [vmem:[#allocation72_spill] sm:$0xff]  ;;  %v5630_v62 = vld [vmem:[#allocation25_spill] sm:$0xff] }
 0x110   : > { %v3353_v2 = vadd.f32 %v2496_v0, %v2680_v8  ;;  %v3357_v6 = vadd.f32 %v5625_v4, %v2683_v9  ;;  %v3361_v44 = vadd.f32 %v5627_v43, %v5626_v39  ;;  %v3365_v29 = vadd.f32 %v5630_v62, %v5629_v45  ;;  %v5632_v63 = vld [vmem:[#allocation73_spill] sm:$0xff]  ;;  %v5633_v16 = vld [vmem:[#allocation26_spill] sm:$0xff]  ;;  %v5636_v5 = vld [vmem:[#allocation27_spill] sm:$0xff] }
 0x111   : > { %v3369_v36 = vadd.f32 %v5633_v16, %v5632_v63  ;;  %v5635_v12 = vld [vmem:[#allocation74_spill] sm:$0xff]  ;;  %v5638_v0 = vld [vmem:[#allocation75_spill] sm:$0xff]  ;;  %v5639_v35 = vld [vmem:[#allocation28_spill] sm:$0xff] }
 0x112   : > { %5628 = vst [vmem:[#allocation23_spill] sm:$0xff] %v3361_v44  ;;  %5631 = vst [vmem:[#allocation71_spill] sm:$0xff] %v3365_v29  ;;  %v3373_v8 = vadd.f32 %v5636_v5, %v5635_v12  ;;  %v3377_v9 = vadd.f32 %v5639_v35, %v5638_v0  ;;  %v5642_v4 = vld [vmem:[#allocation29_spill] sm:$0xff]  ;;  %v5645_v44 = vld [vmem:[#allocation30_spill] sm:$0xff] }
 0x113   : > { %5634 = vst [vmem:[#allocation24_spill] sm:$0xff] %v3369_v36  ;;  %v3381_v39 = vadd.f32 %v5642_v4, %v5641_v52  ;;  %v5644_v43 = vld [vmem:[#allocation77_spill] sm:$0xff]  ;;  %v5647_v62 = vld [vmem:[#allocation78_spill] sm:$0xff]  ;;  %v5648_v29 = vld [vmem:[#allocation31_spill] sm:$0xff] }
 0x114   : > { %5637 = vst [vmem:[#allocation72_spill] sm:$0xff] %v3373_v8  ;;  %5640 = vst [vmem:[#allocation25_spill] sm:$0xff] %v3377_v9  ;;  %v3385_v45 = vadd.f32 %v5645_v44, %v5644_v43  ;;  %v3389_v63 = vadd.f32 %v5648_v29, %v5647_v62  ;;  %v5650_v16 = vld [vmem:[#allocation79_spill] sm:$0xff]  ;;  %v5651_v36 = vld [vmem:[#allocation32_spill] sm:$0xff] }
 0x115   : > { %5643 = vst [vmem:[#allocation73_spill] sm:$0xff] %v3381_v39  ;;  %v3393_v12 = vadd.f32 %v5651_v36, %v5650_v16  ;;  %v5652_v5 = vld [vmem:[#allocation80_spill] sm:$0xff]  ;;  %v5653_v8 = vld [vmem:[#allocation33_spill] sm:$0xff]  ;;  %v5656_v9 = vld [vmem:[#allocation34_spill] sm:$0xff] }
 0x116   : > { %5646 = vst [vmem:[#allocation26_spill] sm:$0xff] %v3385_v45  ;;  %5649 = vst [vmem:[#allocation74_spill] sm:$0xff] %v3389_v63  ;;  %v3397_v0 = vadd.f32 %v5653_v8, %v5652_v5  ;;  %v5655_v35 = vld [vmem:[#allocation81_spill] sm:$0xff]  ;;  %v5658_v4 = vld [vmem:[#allocation82_spill] sm:$0xff] }
 0x117   : > { %v3401_v52 = vadd.f32 %v5656_v9, %v5655_v35  ;;  %v5659_v39 = vld [vmem:[#allocation35_spill] sm:$0xff]  ;;  %v5662_v45 = vld [vmem:[#allocation36_spill] sm:$0xff]  ;;  %v5665_v63 = vld [vmem:[#allocation37_spill] sm:$0xff] }
 0x118   : > { %5654 = vst [vmem:[#allocation27_spill] sm:$0xff] %v3397_v0  ;;  %v3405_v44 = vadd.f32 %v5659_v39, %v5658_v4  ;;  %v5661_v43 = vld [vmem:[#allocation83_spill] sm:$0xff]  ;;  %v5664_v62 = vld [vmem:[#allocation84_spill] sm:$0xff]  ;;  %v5667_v16 = vld [vmem:[#allocation38_spill] sm:$0xff] }
 0x119   : > { %5657 = vst [vmem:[#allocation75_spill] sm:$0xff] %v3401_v52  ;;  %v3409_v29 = vadd.f32 %v5662_v45, %v5661_v43  ;;  %v3413_v36 = vadd.f32 %v5665_v63, %v5664_v62  ;;  %v3417_v8 = vadd.f32 %v5667_v16, %v2728_v26  ;;  %v5669_v5 = vld [vmem:[#allocation86_spill] sm:$0xff]  ;;  %v5670_v0 = vld [vmem:[#allocation39_spill] sm:$0xff]  ;;  %v5673_v52 = vld [vmem:[#allocation40_spill] sm:$0xff] }
 0x11a   : > { %5660 = vst [vmem:[#allocation28_spill] sm:$0xff] %v3405_v44  ;;  %v3421_v9 = vadd.f32 %v5670_v0, %v5669_v5  ;;  %v5672_v35 = vld [vmem:[#allocation87_spill] sm:$0xff]  ;;  %v5675_v4 = vld [vmem:[#allocation88_spill] sm:$0xff]  ;;  %v5676_v44 = vld [vmem:[#allocation41_spill] sm:$0xff] }
 0x11b   : > { %5663 = vst [vmem:[#allocation76_spill] sm:$0xff] %v3409_v29  ;;  %5666 = vst [vmem:[#allocation29_spill] sm:$0xff] %v3413_v36  ;;  %v3425_v39 = vadd.f32 %v5673_v52, %v5672_v35  ;;  %v3429_v45 = vadd.f32 %v5676_v44, %v5675_v4  ;;  %v5678_v43 = vld [vmem:[#allocation89_spill] sm:$0xff]  ;;  %v5679_v29 = vld [vmem:[#allocation42_spill] sm:$0xff] }
 0x11c   : > { %5668 = vst [vmem:[#allocation77_spill] sm:$0xff] %v3417_v8  ;;  %5671 = vst [vmem:[#allocation30_spill] sm:$0xff] %v3421_v9  ;;  %v3433_v63 = vadd.f32 %v5679_v29, %v5678_v43  ;;  %v5681_v62 = vld [vmem:[#allocation90_spill] sm:$0xff]  ;;  %v5682_v36 = vld [vmem:[#allocation43_spill] sm:$0xff] }
 0x11d   : > { %5674 = vst [vmem:[#allocation78_spill] sm:$0xff] %v3425_v39  ;;  %5677 = vst [vmem:[#allocation31_spill] sm:$0xff] %v3429_v45  ;;  %v3437_v26 = vadd.f32 %v5682_v36, %v5681_v62  ;;  %v5684_v16 = vld [vmem:[#allocation91_spill] sm:$0xff]  ;;  %v5685_v8 = vld [vmem:[#allocation44_spill] sm:$0xff] }
 0x11e   : > { %5680 = vst [vmem:[#allocation79_spill] sm:$0xff] %v3433_v63  ;;  %v3441_v0 = vadd.f32 %v5685_v8, %v5684_v16  ;;  %v5687_v5 = vld [vmem:[#allocation92_spill] sm:$0xff]  ;;  %v5688_v9 = vld [vmem:[#allocation45_spill] sm:$0xff]  ;;  %v5691_v39 = vld [vmem:[#allocation46_spill] sm:$0xff] }
 0x11f   : > { %5683 = vst [vmem:[#allocation32_spill] sm:$0xff] %v3437_v26  ;;  %v3445_v52 = vadd.f32 %v5688_v9, %v5687_v5  ;;  %v5690_v35 = vld [vmem:[#allocation93_spill] sm:$0xff]  ;;  %v5693_v4 = vld [vmem:[#allocation94_spill] sm:$0xff]  ;;  %v5694_v45 = vld [vmem:[#allocation47_spill] sm:$0xff] }
 0x120   : > { %5686 = vst [vmem:[#allocation80_spill] sm:$0xff] %v3441_v0  ;;  %v3449_v44 = vadd.f32 %v5691_v39, %v5690_v35  ;;  %v3453_v29 = vadd.f32 %v5694_v45, %v5693_v4  ;;  %v5696_v43 = vld [vmem:[#allocation95_spill] sm:$0xff]  ;;  %v5697_v63 = vld [vmem:[#allocation48_spill] sm:$0xff]  ;;  %v5700_v26 = vld [vmem:[#allocation49_spill] sm:$0xff] }
 0x121   : > { %5689 = vst [vmem:[#allocation33_spill] sm:$0xff] %v3445_v52  ;;  %v3457_v36 = vadd.f32 %v5697_v63, %v5696_v43  ;;  %v5699_v62 = vld [vmem:[#allocation96_spill] sm:$0xff]  ;;  %v5702_v16 = vld [vmem:[#allocation97_spill] sm:$0xff]  ;;  %v5703_v0 = vld [vmem:[#allocation50_spill] sm:$0xff] }
 0x122   : > { %5692 = vst [vmem:[#allocation81_spill] sm:$0xff] %v3449_v44  ;;  %5695 = vst [vmem:[#allocation34_spill] sm:$0xff] %v3453_v29  ;;  %v3461_v8 = vadd.f32 %v5700_v26, %v5699_v62  ;;  %v3465_v9 = vadd.f32 %v5703_v0, %v5702_v16  ;;  %v5705_v5 = vld [vmem:[#allocation98_spill] sm:$0xff]  ;;  %v5706_v52 = vld [vmem:[#allocation51_spill] sm:$0xff] }
 0x123   : > { %5698 = vst [vmem:[#allocation82_spill] sm:$0xff] %v3457_v36  ;;  %v3469_v39 = vadd.f32 %v5706_v52, %v5705_v5  ;;  %v5708_v35 = vld [vmem:[#allocation99_spill] sm:$0xff]  ;;  %v5709_v44 = vld [vmem:[#allocation52_spill] sm:$0xff]  ;;  %v5712_v29 = vld [vmem:[#allocation53_spill] sm:$0xff] }
 0x124   : > { %5701 = vst [vmem:[#allocation35_spill] sm:$0xff] %v3461_v8  ;;  %5704 = vst [vmem:[#allocation83_spill] sm:$0xff] %v3465_v9  ;;  %v3473_v45 = vadd.f32 %v5709_v44, %v5708_v35  ;;  %v5711_v4 = vld [vmem:[#allocation100_spill] sm:$0xff]  ;;  %v5714_v43 = vld [vmem:[#allocation101_spill] sm:$0xff] }
 0x125   : > { %5707 = vst [vmem:[#allocation36_spill] sm:$0xff] %v3469_v39  ;;  %v3477_v63 = vadd.f32 %v5712_v29, %v5711_v4  ;;  %v5715_v36 = vld [vmem:[#allocation54_spill] sm:$0xff]  ;;  %v5718_v8 = vld [vmem:[#allocation56_spill] sm:$0xff]  ;;  %v5720_v16 = vld [vmem:[#allocation103_spill] sm:$0xff] }
 0x126   : > { %5710 = vst [vmem:[#allocation84_spill] sm:$0xff] %v3473_v45  ;;  %v3481_v26 = vadd.f32 %v5715_v36, %v5714_v43  ;;  %v5717_v62 = vld [vmem:[#allocation102_spill] sm:$0xff]  ;;  %v5721_v9 = vld [vmem:[#allocation57_spill] sm:$0xff]  ;;  %v5723_v5 = vld [vmem:[#allocation104_spill] sm:$0xff] }
 0x127   : > { %5713 = vst [vmem:[#allocation37_spill] sm:$0xff] %v3477_v63  ;;  %v3485_v0 = vadd.f32 %v5718_v8, %v5717_v62  ;;  %v3489_v52 = vadd.f32 %v5721_v9, %v5720_v16  ;;  %v5724_v39 = vld [vmem:[#allocation58_spill] sm:$0xff]  ;;  %v5726_v35 = vld [vmem:[#allocation105_spill] sm:$0xff]  ;;  %v5727_v45 = vld [vmem:[#allocation59_spill] sm:$0xff] }
 0x128   : > { %5716 = vst [vmem:[#allocation38_spill] sm:$0xff] %v3481_v26  ;;  %v3493_v44 = vadd.f32 %v5724_v39, %v5723_v5  ;;  %v3497_v29 = vadd.f32 %v5727_v45, %v5726_v35  ;;  %v5729_v4 = vld [vmem:[#allocation106_spill] sm:$0xff]  ;;  %v5730_v63 = vld [vmem:[#allocation60_spill] sm:$0xff]  ;;  %v5732_v43 = vld [vmem:[#allocation107_spill] sm:$0xff] }
 0x129   : > { %5719 = vst [vmem:[#allocation86_spill] sm:$0xff] %v3485_v0  ;;  %5722 = vst [vmem:[#allocation39_spill] sm:$0xff] %v3489_v52  ;;  %v3501_v36 = vadd.f32 %v5730_v63, %v5729_v4  ;;  %v5733_v26 = vld [vmem:[#allocation61_spill] sm:$0xff]  ;;  %v5735_v62 = vld [vmem:[#allocation108_spill] sm:$0xff] }
 0x12a   : > { %5725 = vst [vmem:[#allocation87_spill] sm:$0xff] %v3493_v44  ;;  %5728 = vst [vmem:[#allocation40_spill] sm:$0xff] %v3497_v29  ;;  %v3505_v8 = vadd.f32 %v5733_v26, %v5732_v43  ;;  %v5736_v0 = vld [vmem:[#allocation62_spill] sm:$0xff]  ;;  %v5738_v16 = vld [vmem:[#allocation109_spill] sm:$0xff] }
 0x12b   : > { %5731 = vst [vmem:[#allocation88_spill] sm:$0xff] %v3501_v36  ;;  %v3509_v9 = vadd.f32 %v5736_v0, %v5735_v62  ;;  %v5739_v52 = vld [vmem:[#allocation63_spill] sm:$0xff]  ;;  %v5741_v5 = vld [vmem:[#allocation110_spill] sm:$0xff]  ;;  %v5742_v44 = vld [vmem:[#allocation64_spill] sm:$0xff] }
 0x12c   : > { %5734 = vst [vmem:[#allocation41_spill] sm:$0xff] %v3505_v8  ;;  %v3513_v39 = vadd.f32 %v5739_v52, %v5738_v16  ;;  %v3517_v45 = vadd.f32 %v5742_v44, %v5741_v5  ;;  %v5744_v35 = vld [vmem:[#allocation111_spill] sm:$0xff]  ;;  %v5745_v29 = vld [vmem:[#allocation65_spill] sm:$0xff]  ;;  %v5747_v4 = vld [vmem:[#allocation112_spill] sm:$0xff] }
 0x12d   : > { %5737 = vst [vmem:[#allocation89_spill] sm:$0xff] %v3509_v9  ;;  %v3521_v63 = vadd.f32 %v5745_v29, %v5744_v35  ;;  %v5748_v36 = vld [vmem:[#allocation66_spill] sm:$0xff]  ;;  %v5750_v43 = vld [vmem:[#allocation113_spill] sm:$0xff]  ;;  %v5751_v8 = vld [vmem:[#allocation67_spill] sm:$0xff] }
 0x12e   : > { %5740 = vst [vmem:[#allocation42_spill] sm:$0xff] %v3513_v39  ;;  %5743 = vst [vmem:[#allocation90_spill] sm:$0xff] %v3517_v45  ;;  %v3525_v26 = vadd.f32 %v5748_v36, %v5747_v4  ;;  %v3529_v0 = vadd.f32 %v5751_v8, %v5750_v43  ;;  %v5753_v62 = vld [vmem:[#allocation114_spill] sm:$0xff]  ;;  %v5754_v9 = vld [vmem:[#allocation68_spill] sm:$0xff] }
 0x12f   : > { %5746 = vst [vmem:[#allocation43_spill] sm:$0xff] %v3521_v63  ;;  %v3533_v52 = vadd.f32 %v5754_v9, %v5753_v62  ;;  %v5756_v16 = vld [vmem:[#allocation115_spill] sm:$0xff]  ;;  %v5757_v39 = vld [vmem:[#allocation69_spill] sm:$0xff]  ;;  %v5759_v5 = vld [vmem:[#allocation116_spill] sm:$0xff] }
 0x130   : > { %5749 = vst [vmem:[#allocation91_spill] sm:$0xff] %v3525_v26  ;;  %5752 = vst [vmem:[#allocation44_spill] sm:$0xff] %v3529_v0  ;;  %v3537_v44 = vadd.f32 %v5757_v39, %v5756_v16  ;;  %v5760_v45 = vld [vmem:[#allocation70_spill] sm:$0xff]  ;;  %v5762_v35 = vld [vmem:[#allocation117_spill] sm:$0xff] }
 0x131   : > { %5755 = vst [vmem:[#allocation92_spill] sm:$0xff] %v3533_v52  ;;  %v3541_v29 = vadd.f32 %v5760_v45, %v5759_v5  ;;  %v3545_v36 = vadd.f32 %v3017_v1, %v5762_v35  ;;  %v5764_v4 = vld [vmem:[#allocation118_spill] sm:$0xff]  ;;  %v5766_v43 = vld [vmem:[#allocation119_spill] sm:$0xff]  ;;  %v5769_v62 = vld [vmem:[#allocation120_spill] sm:$0xff] }
 0x132   : > { %5758 = vst [vmem:[#allocation45_spill] sm:$0xff] %v3537_v44  ;;  %v3549_v8 = vadd.f32 %v3021_v38, %v5764_v4  ;;  %v5767_v0 = vld [vmem:[#allocation175_spill] sm:$0xff]  ;;  %v5770_v52 = vld [vmem:[#allocation176_spill] sm:$0xff]  ;;  %v5772_v16 = vld [vmem:[#allocation121_spill] sm:$0xff] }
 0x133   : > { %5761 = vst [vmem:[#allocation93_spill] sm:$0xff] %v3541_v29  ;;  %5763 = vst [vmem:[#allocation46_spill] sm:$0xff] %v3545_v36  ;;  %v3553_v9 = vadd.f32 %v5767_v0, %v5766_v43  ;;  %v3557_v39 = vadd.f32 %v5770_v52, %v5769_v62  ;;  %v5773_v44 = vld [vmem:[#allocation177_spill] sm:$0xff]  ;;  %v5775_v5 = vld [vmem:[#allocation122_spill] sm:$0xff] }
 0x134   : > { %5765 = vst [vmem:[#allocation94_spill] sm:$0xff] %v3549_v8  ;;  %v3561_v45 = vadd.f32 %v5773_v44, %v5772_v16  ;;  %v5776_v29 = vld [vmem:[#allocation178_spill] sm:$0xff]  ;;  %v5778_v35 = vld [vmem:[#allocation123_spill] sm:$0xff]  ;;  %v5781_v4 = vld [vmem:[#allocation124_spill] sm:$0xff] }
 0x135   : > { %5768 = vst [vmem:[#allocation47_spill] sm:$0xff] %v3553_v9  ;;  %5771 = vst [vmem:[#allocation95_spill] sm:$0xff] %v3557_v39  ;;  %v3565_v1 = vadd.f32 %v5776_v29, %v5775_v5  ;;  %v5779_v36 = vld [vmem:[#allocation179_spill] sm:$0xff]  ;;  %v5782_v8 = vld [vmem:[#allocation180_spill] sm:$0xff] }
 0x136   : > { %5774 = vst [vmem:[#allocation48_spill] sm:$0xff] %v3561_v45  ;;  %v3569_v38 = vadd.f32 %v5779_v36, %v5778_v35  ;;  %v3573_v0 = vadd.f32 %v5782_v8, %v5781_v4  ;;  %v5784_v43 = vld [vmem:[#allocation125_spill] sm:$0xff]  ;;  %v5787_v62 = vld [vmem:[#allocation127_spill] sm:$0xff]  ;;  %v5788_v39 = vld [vmem:[#allocation182_spill] sm:$0xff] }
 0x137   : > { %5777 = vst [vmem:[#allocation96_spill] sm:$0xff] %v3565_v1  ;;  %v5785_v9 = vld [vmem:[#allocation181_spill] sm:$0xff]  ;;  %v3581_v44 = vadd.f32 %v5788_v39, %v5787_v62  ;;  %v5790_v16 = vld [vmem:[#allocation128_spill] sm:$0xff]  ;;  %v5791_v45 = vld [vmem:[#allocation183_spill] sm:$0xff] }
 0x138   : > { %5780 = vst [vmem:[#allocation49_spill] sm:$0xff] %v3569_v38  ;;  %5783 = vst [vmem:[#allocation97_spill] sm:$0xff] %v3573_v0  ;;  %v3577_v52 = vadd.f32 %v5785_v9, %v5784_v43  ;;  %v3585_v29 = vadd.f32 %v5791_v45, %v5790_v16  ;;  %v5793_v5 = vld [vmem:[#allocation129_spill] sm:$0xff]  ;;  %v5794_v1 = vld [vmem:[#allocation184_spill] sm:$0xff] }
 0x139   : > { %5789 = vst [vmem:[#allocation98_spill] sm:$0xff] %v3581_v44  ;;  %v3589_v36 = vadd.f32 %v5794_v1, %v5793_v5  ;;  %v5796_v35 = vld [vmem:[#allocation130_spill] sm:$0xff]  ;;  %v5797_v38 = vld [vmem:[#allocation185_spill] sm:$0xff]  ;;  %v5799_v4 = vld [vmem:[#allocation131_spill] sm:$0xff] }
 0x13a   : > { %5786 = vst [vmem:[#allocation50_spill] sm:$0xff] %v3577_v52  ;;  %5792 = vst [vmem:[#allocation51_spill] sm:$0xff] %v3585_v29  ;;  %v3593_v8 = vadd.f32 %v5797_v38, %v5796_v35  ;;  %v5800_v0 = vld [vmem:[#allocation186_spill] sm:$0xff]  ;;  %v5802_v43 = vld [vmem:[#allocation132_spill] sm:$0xff] }
 0x13b   : > { %5795 = vst [vmem:[#allocation99_spill] sm:$0xff] %v3589_v36  ;;  %v3597_v9 = vadd.f32 %v5800_v0, %v5799_v4  ;;  %v5803_v52 = vld [vmem:[#allocation187_spill] sm:$0xff]  ;;  %v5805_v62 = vld [vmem:[#allocation133_spill] sm:$0xff]  ;;  %v5806_v44 = vld [vmem:[#allocation188_spill] sm:$0xff] }
 0x13c   : > { %5798 = vst [vmem:[#allocation52_spill] sm:$0xff] %v3593_v8  ;;  %v3601_v39 = vadd.f32 %v5803_v52, %v5802_v43  ;;  %v3605_v45 = vadd.f32 %v5806_v44, %v5805_v62  ;;  %v5808_v16 = vld [vmem:[#allocation134_spill] sm:$0xff]  ;;  %v5809_v29 = vld [vmem:[#allocation189_spill] sm:$0xff]  ;;  %v5811_v5 = vld [vmem:[#allocation135_spill] sm:$0xff] }
 0x13d   : > { %5801 = vst [vmem:[#allocation100_spill] sm:$0xff] %v3597_v9  ;;  %v3609_v1 = vadd.f32 %v5809_v29, %v5808_v16  ;;  %v5812_v36 = vld [vmem:[#allocation190_spill] sm:$0xff]  ;;  %v5814_v35 = vld [vmem:[#allocation136_spill] sm:$0xff]  ;;  %v5815_v8 = vld [vmem:[#allocation191_spill] sm:$0xff] }
 0x13e   : > { %5804 = vst [vmem:[#allocation53_spill] sm:$0xff] %v3601_v39  ;;  %5807 = vst [vmem:[#allocation101_spill] sm:$0xff] %v3605_v45  ;;  %v3613_v38 = vadd.f32 %v5812_v36, %v5811_v5  ;;  %v3617_v0 = vadd.f32 %v5815_v8, %v5814_v35  ;;  %v5817_v4 = vld [vmem:[#allocation137_spill] sm:$0xff]  ;;  %v5818_v9 = vld [vmem:[#allocation192_spill] sm:$0xff] }
 0x13f   : > { %5810 = vst [vmem:[#allocation54_spill] sm:$0xff] %v3609_v1  ;;  %v3621_v52 = vadd.f32 %v5818_v9, %v5817_v4  ;;  %v5820_v43 = vld [vmem:[#allocation138_spill] sm:$0xff]  ;;  %v5821_v39 = vld [vmem:[#allocation193_spill] sm:$0xff]  ;;  %v5823_v62 = vld [vmem:[#allocation139_spill] sm:$0xff] }
 0x140   : > { %5813 = vst [vmem:[#allocation102_spill] sm:$0xff] %v3613_v38  ;;  %5816 = vst [vmem:[#allocation56_spill] sm:$0xff] %v3617_v0  ;;  %v3625_v44 = vadd.f32 %v5821_v39, %v5820_v43  ;;  %v5824_v45 = vld [vmem:[#allocation194_spill] sm:$0xff]  ;;  %v5826_v16 = vld [vmem:[#allocation140_spill] sm:$0xff] }
 0x141   : > { %5819 = vst [vmem:[#allocation103_spill] sm:$0xff] %v3621_v52  ;;  %v3629_v29 = vadd.f32 %v5824_v45, %v5823_v62  ;;  %v5827_v1 = vld [vmem:[#allocation195_spill] sm:$0xff]  ;;  %v5829_v5 = vld [vmem:[#allocation141_spill] sm:$0xff]  ;;  %v5830_v38 = vld [vmem:[#allocation196_spill] sm:$0xff] }
 0x142   : > { %5822 = vst [vmem:[#allocation57_spill] sm:$0xff] %v3625_v44  ;;  %v3633_v36 = vadd.f32 %v5827_v1, %v5826_v16  ;;  %v3637_v8 = vadd.f32 %v5830_v38, %v5829_v5  ;;  %v5832_v35 = vld [vmem:[#allocation142_spill] sm:$0xff]  ;;  %v5833_v0 = vld [vmem:[#allocation197_spill] sm:$0xff]  ;;  %v5835_v4 = vld [vmem:[#allocation143_spill] sm:$0xff] }
 0x143   : > { %5825 = vst [vmem:[#allocation104_spill] sm:$0xff] %v3629_v29  ;;  %v3641_v9 = vadd.f32 %v5833_v0, %v5832_v35  ;;  %v5836_v52 = vld [vmem:[#allocation198_spill] sm:$0xff]  ;;  %v5838_v43 = vld [vmem:[#allocation144_spill] sm:$0xff]  ;;  %v5839_v44 = vld [vmem:[#allocation199_spill] sm:$0xff] }
 0x144   : > { %5828 = vst [vmem:[#allocation58_spill] sm:$0xff] %v3633_v36  ;;  %5831 = vst [vmem:[#allocation105_spill] sm:$0xff] %v3637_v8  ;;  %v3645_v39 = vadd.f32 %v5836_v52, %v5835_v4  ;;  %v3649_v45 = vadd.f32 %v5839_v44, %v5838_v43  ;;  %v5841_v62 = vld [vmem:[#allocation145_spill] sm:$0xff]  ;;  %v5842_v29 = vld [vmem:[#allocation200_spill] sm:$0xff] }
 0x145   : > { %5834 = vst [vmem:[#allocation59_spill] sm:$0xff] %v3641_v9  ;;  %v3653_v1 = vadd.f32 %v5842_v29, %v5841_v62  ;;  %v5844_v16 = vld [vmem:[#allocation146_spill] sm:$0xff]  ;;  %v5845_v36 = vld [vmem:[#allocation201_spill] sm:$0xff]  ;;  %v5847_v5 = vld [vmem:[#allocation147_spill] sm:$0xff] }
 0x146   : > { %5837 = vst [vmem:[#allocation106_spill] sm:$0xff] %v3645_v39  ;;  %5840 = vst [vmem:[#allocation60_spill] sm:$0xff] %v3649_v45  ;;  %v3657_v38 = vadd.f32 %v5845_v36, %v5844_v16  ;;  %v5848_v8 = vld [vmem:[#allocation202_spill] sm:$0xff]  ;;  %v5850_v35 = vld [vmem:[#allocation148_spill] sm:$0xff] }
 0x147   : > { %5843 = vst [vmem:[#allocation107_spill] sm:$0xff] %v3653_v1  ;;  %v3661_v0 = vadd.f32 %v5848_v8, %v5847_v5  ;;  %v5851_v9 = vld [vmem:[#allocation203_spill] sm:$0xff]  ;;  %v5853_v4 = vld [vmem:[#allocation149_spill] sm:$0xff]  ;;  %v5854_v39 = vld [vmem:[#allocation204_spill] sm:$0xff] }
 0x148   : > { %5846 = vst [vmem:[#allocation61_spill] sm:$0xff] %v3657_v38  ;;  %v3665_v52 = vadd.f32 %v5851_v9, %v5850_v35  ;;  %v3669_v44 = vadd.f32 %v5854_v39, %v5853_v4  ;;  %v5856_v43 = vld [vmem:[#allocation150_spill] sm:$0xff]  ;;  %v5857_v45 = vld [vmem:[#allocation205_spill] sm:$0xff]  ;;  %v5859_v62 = vld [vmem:[#allocation151_spill] sm:$0xff] }
 0x149   : > { %5849 = vst [vmem:[#allocation108_spill] sm:$0xff] %v3661_v0  ;;  %v3673_v29 = vadd.f32 %v5857_v45, %v5856_v43  ;;  %v5860_v1 = vld [vmem:[#allocation206_spill] sm:$0xff]  ;;  %v5862_v16 = vld [vmem:[#allocation152_spill] sm:$0xff]  ;;  %v5863_v38 = vld [vmem:[#allocation207_spill] sm:$0xff] }
 0x14a   : > { %5852 = vst [vmem:[#allocation62_spill] sm:$0xff] %v3665_v52  ;;  %5855 = vst [vmem:[#allocation109_spill] sm:$0xff] %v3669_v44  ;;  %v3677_v36 = vadd.f32 %v5860_v1, %v5859_v62  ;;  %v3681_v8 = vadd.f32 %v5863_v38, %v5862_v16  ;;  %v5865_v5 = vld [vmem:[#allocation153_spill] sm:$0xff]  ;;  %v5866_v0 = vld [vmem:[#allocation208_spill] sm:$0xff] }
 0x14b   : > { %5858 = vst [vmem:[#allocation63_spill] sm:$0xff] %v3673_v29  ;;  %v3685_v9 = vadd.f32 %v5866_v0, %v5865_v5  ;;  %v5868_v35 = vld [vmem:[#allocation154_spill] sm:$0xff]  ;;  %v5869_v52 = vld [vmem:[#allocation209_spill] sm:$0xff]  ;;  %v5871_v4 = vld [vmem:[#allocation155_spill] sm:$0xff] }
 0x14c   : > { %5861 = vst [vmem:[#allocation110_spill] sm:$0xff] %v3677_v36  ;;  %5864 = vst [vmem:[#allocation64_spill] sm:$0xff] %v3681_v8  ;;  %v3689_v39 = vadd.f32 %v5869_v52, %v5868_v35  ;;  %v5872_v44 = vld [vmem:[#allocation210_spill] sm:$0xff]  ;;  %v5874_v43 = vld [vmem:[#allocation156_spill] sm:$0xff] }
 0x14d   : > { %5867 = vst [vmem:[#allocation111_spill] sm:$0xff] %v3685_v9  ;;  %v3693_v45 = vadd.f32 %v5872_v44, %v5871_v4  ;;  %v5875_v29 = vld [vmem:[#allocation211_spill] sm:$0xff]  ;;  %v5877_v62 = vld [vmem:[#allocation157_spill] sm:$0xff]  ;;  %v5879_v16 = vld [vmem:[#allocation158_spill] sm:$0xff] }
 0x14e   : > { %5870 = vst [vmem:[#allocation65_spill] sm:$0xff] %v3689_v39  ;;  %v3697_v1 = vadd.f32 %v5875_v29, %v5874_v43  ;;  %v3701_v38 = vadd.f32 %v3173_v24, %v5877_v62  ;;  %v5880_v8 = vld [vmem:[#allocation212_spill] sm:$0xff]  ;;  %v5882_v5 = vld [vmem:[#allocation159_spill] sm:$0xff]  ;;  %v5885_v39 = vld [vmem:[#allocation214_spill] sm:$0xff] }
 0x14f   : > { %5873 = vst [vmem:[#allocation112_spill] sm:$0xff] %v3693_v45  ;;  %v3705_v0 = vadd.f32 %v5880_v8, %v5879_v16  ;;  %v3709_v52 = vadd.f32 %v3182_v7, %v5882_v5  ;;  %v5884_v35 = vld [vmem:[#allocation160_spill] sm:$0xff]  ;;  %v5887_v4 = vld [vmem:[#allocation161_spill] sm:$0xff]  ;;  %v5888_v45 = vld [vmem:[#allocation215_spill] sm:$0xff] }
 0x150   : > { %5876 = vst [vmem:[#allocation66_spill] sm:$0xff] %v3697_v1  ;;  %5878 = vst [vmem:[#allocation113_spill] sm:$0xff] %v3701_v38  ;;  %v3713_v44 = vadd.f32 %v5885_v39, %v5884_v35  ;;  %v3717_v29 = vadd.f32 %v5888_v45, %v5887_v4  ;;  %v5890_v43 = vld [vmem:[#allocation162_spill] sm:$0xff]  ;;  %v5892_v62 = vld [vmem:[#allocation163_spill] sm:$0xff] }
 0x151   : > { %5881 = vst [vmem:[#allocation67_spill] sm:$0xff] %v3705_v0  ;;  %5883 = vst [vmem:[#allocation114_spill] sm:$0xff] %v3709_v52  ;;  %v3721_v24 = vadd.f32 %v3236_v55, %v5890_v43  ;;  %v3725_v8 = vadd.f32 %v3239_v56, %v5892_v62  ;;  %v5894_v16 = vld [vmem:[#allocation164_spill] sm:$0xff]  ;;  %v5896_v5 = vld [vmem:[#allocation165_spill] sm:$0xff] }
 0x152   : > { %5886 = vst [vmem:[#allocation68_spill] sm:$0xff] %v3713_v44  ;;  %5889 = vst [vmem:[#allocation115_spill] sm:$0xff] %v3717_v29  ;;  %v3729_v7 = vadd.f32 %v3242_v57, %v5894_v16  ;;  %v3733_v39 = vadd.f32 %v3245_v58, %v5896_v5  ;;  %v5898_v35 = vld [vmem:[#allocation166_spill] sm:$0xff]  ;;  %v5900_v4 = vld [vmem:[#allocation168_spill] sm:$0xff] }
 0x153   : > { %5891 = vst [vmem:[#allocation69_spill] sm:$0xff] %v3721_v24  ;;  %5893 = vst [vmem:[#allocation116_spill] sm:$0xff] %v3725_v8  ;;  %v3737_v45 = vadd.f32 %v3248_v59, %v5898_v35  ;;  %v3741_v55 = vadd.f32 %v3251_v60, %v5900_v4  ;;  %v5902_v43 = vld [vmem:[#allocation169_spill] sm:$0xff]  ;;  %v5904_v62 = vld [vmem:[#allocation170_spill] sm:$0xff] }
 0x154   : > { %5895 = vst [vmem:[#allocation70_spill] sm:$0xff] %v3729_v7  ;;  %5897 = vst [vmem:[#allocation117_spill] sm:$0xff] %v3733_v39  ;;  %v3745_v56 = vadd.f32 %v3254_v61, %v5902_v43  ;;  %v3749_v57 = vadd.f32 %v3257_v41, %v5904_v62  ;;  %v5906_v16 = vld [vmem:[#allocation171_spill] sm:$0xff]  ;;  %v5908_v5 = vld [vmem:[#allocation172_spill] sm:$0xff] }
 0x155   : > { %5899 = vst [vmem:[#allocation118_spill] sm:$0xff] %v3737_v45  ;;  %5901 = vst [vmem:[#allocation119_spill] sm:$0xff] %v3741_v55  ;;  %v3753_v58 = vadd.f32 %v3260_v54, %v5906_v16  ;;  %v3757_v59 = vadd.f32 %v3263_v53, %v5908_v5  ;;  %v5910_v35 = vld [vmem:[#allocation173_spill] sm:$0xff]  ;;  %v5912_v4 = vld [vmem:[#allocation174_spill] sm:$0xff]  ;;  %v3773_v54 = vadd.f32 %v3275_v49, %v3191_v23 }
 0x156   : > { %5903 = vst [vmem:[#allocation175_spill] sm:$0xff] %v3745_v56  ;;  %5905 = vst [vmem:[#allocation120_spill] sm:$0xff] %v3749_v57  ;;  %v3761_v60 = vadd.f32 %v3266_v42, %v5910_v35  ;;  %v3765_v61 = vadd.f32 %v3269_v51, %v5912_v4  ;;  %v5914_v43 = vld [vmem:[#allocation213_spill] sm:$0xff]  ;;  %v3777_v53 = vadd.f32 %v3278_v48, %v3194_v13  ;;  %v5920_v62 = vld [vmem:[#allocation216_spill] sm:$0xff] }
 0x157   : > { %5907 = vst [vmem:[#allocation176_spill] sm:$0xff] %v3753_v58  ;;  %5909 = vst [vmem:[#allocation121_spill] sm:$0xff] %v3757_v59  ;;  %v3769_v41 = vadd.f32 %v3272_v50, %v5914_v43  ;;  %v3781_v42 = vadd.f32 %v3281_v47, %v3197_v17  ;;  %v3785_v51 = vadd.f32 %v3284_v30, %v3200_v46  ;;  %v5922_v16 = vld [vmem:[#allocation217_spill] sm:$0xff]  ;;  %v5924_v49 = vld [vmem:[#allocation218_spill] sm:$0xff] }
 0x158   : > { %5911 = vst [vmem:[#allocation177_spill] sm:$0xff] %v3761_v60  ;;  %5913 = vst [vmem:[#allocation122_spill] sm:$0xff] %v3765_v61  ;;  %v3789_v50 = vadd.f32 %v3287_v40, %v5920_v62  ;;  %v3793_v23 = vadd.f32 %v3290_v14, %v5922_v16  ;;  %v3797_v13 = vadd.f32 %v3293_v10, %v5924_v49  ;;  %v5926_v48 = vld [vmem:[#allocation219_spill] sm:$0xff]  ;;  %v5928_v47 = vld [vmem:[#allocation220_spill] sm:$0xff] }
 0x159   : > { %5915 = vst [vmem:[#allocation178_spill] sm:$0xff] %v3769_v41  ;;  %5916 = vst [vmem:[#allocation123_spill] sm:$0xff] %v3773_v54  ;;  %v3801_v17 = vadd.f32 %v3296_v11, %v5926_v48  ;;  %v3805_v30 = vadd.f32 %v3299_v18, %v5928_v47  ;;  %v5930_v46 = vld [vmem:[#allocation221_spill] sm:$0xff]  ;;  %v5932_v5 = vld [vmem:[#allocation222_spill] sm:$0xff] }
 0x15a   : > { %5917 = vst [vmem:[#allocation179_spill] sm:$0xff] %v3777_v53  ;;  %5918 = vst [vmem:[#allocation124_spill] sm:$0xff] %v3781_v42  ;;  %v3809_v40 = vadd.f32 %v3302_v19, %v5930_v46  ;;  %v3813_v14 = vadd.f32 %v3305_v25, %v5932_v5  ;;  %v5934_v35 = vld [vmem:[#allocation223_spill] sm:$0xff]  ;;  %v5936_v4 = vld [vmem:[#allocation224_spill] sm:$0xff] }
 0x15b   : > { %5919 = vst [vmem:[#allocation180_spill] sm:$0xff] %v3785_v51  ;;  %5921 = vst [vmem:[#allocation125_spill] sm:$0xff] %v3789_v50  ;;  %v3817_v10 = vadd.f32 %v3308_v15, %v5934_v35  ;;  %v3821_v11 = vadd.f32 %v3311_v20, %v5936_v4  ;;  %v5938_v43 = vld [vmem:[#allocation225_spill] sm:$0xff]  ;;  %v5940_v62 = vld [vmem:[#allocation226_spill] sm:$0xff] }
 0x15c   : > { %5923 = vst [vmem:[#allocation181_spill] sm:$0xff] %v3793_v23  ;;  %5925 = vst [vmem:[#allocation127_spill] sm:$0xff] %v3797_v13  ;;  %v3825_v18 = vadd.f32 %v3314_v21, %v5938_v43  ;;  %v3829_v19 = vadd.f32 %v3317_v22, %v5940_v62  ;;  %v5942_v16 = vld [vmem:[#allocation11_spill] sm:$0xff]  ;;  %v5943_v49 = vld [vmem:[#allocation6_spill] sm:$0xff] }
 0x15d   : > { %5927 = vst [vmem:[#allocation182_spill] sm:$0xff] %v3801_v17  ;;  %5929 = vst [vmem:[#allocation128_spill] sm:$0xff] %v3805_v30  ;;  %v3833_v25 = vmul.f32 %v5943_v49, %v5942_v16  ;;  %v5944_v48 = vld [vmem:[#allocation7_spill] sm:$0xff]  ;;  %v5945_v47 = vld [vmem:[#allocation8_spill] sm:$0xff] }
 0x15e   : > { %5931 = vst [vmem:[#allocation183_spill] sm:$0xff] %v3809_v40  ;;  %5933 = vst [vmem:[#allocation129_spill] sm:$0xff] %v3813_v14  ;;  %v3837_v15 = vmul.f32 %v5944_v48, %v5942_v16  ;;  %v3841_v20 = vmul.f32 %v5945_v47, %v5942_v16  ;;  %v5946_v46 = vld [vmem:[#allocation9_spill] sm:$0xff]  ;;  %v5947_v5 = vld [vmem:[#allocation10_spill] sm:$0xff] }
 0x15f   : > { %5935 = vst [vmem:[#allocation184_spill] sm:$0xff] %v3817_v10  ;;  %5937 = vst [vmem:[#allocation130_spill] sm:$0xff] %v3821_v11  ;;  %v3845_v21 = vmul.f32 %v5946_v46, %v5942_v16  ;;  %v3849_v22 = vmul.f32 %v5947_v5, %v5942_v16  ;;  %v5948_v35 = vld [vmem:[#allocation12_spill] sm:$0xff]  ;;  %v5949_v43 = vld [vmem:[#allocation13_spill] sm:$0xff] }
 0x160   : > { %5939 = vst [vmem:[#allocation185_spill] sm:$0xff] %v3825_v18  ;;  %5941 = vst [vmem:[#allocation131_spill] sm:$0xff] %v3829_v19  ;;  %v3853_v4 = vmul.f32 %v5948_v35, %v5942_v16  ;;  %v3857_v62 = vmul.f32 %v5949_v43, %v5942_v16  ;;  %v5950_v19 = vld [vmem:[#allocation14_spill] sm:$0xff]  ;;  %v5951_v11 = vld [vmem:[#allocation15_spill] sm:$0xff] }
 0x161   : > { %v3861_v18 = vmul.f32 %v5950_v19, %v5942_v16  ;;  %v3865_v10 = vmul.f32 %v5951_v11, %v5942_v16  ;;  %v5952_v14 = vld [vmem:[#allocation16_spill] sm:$0xff]  ;;  %v5953_v30 = vld [vmem:[#allocation17_spill] sm:$0xff]  ;;  %v5954_v13 = vld [vmem:[#allocation18_spill] sm:$0xff] }
 0x162   : > { %v3869_v40 = vmul.f32 %v5952_v14, %v5942_v16  ;;  %v3873_v17 = vmul.f32 %v5953_v30, %v5942_v16  ;;  %v3877_v23 = vmul.f32 %v5954_v13, %v5942_v16  ;;  %v5955_v50 = vld [vmem:[#allocation19_spill] sm:$0xff]  ;;  %v5956_v42 = vld [vmem:[#allocation20_spill] sm:$0xff]  ;;  %v5957_v54 = vld [vmem:[#allocation21_spill] sm:$0xff] }
 0x163   : > { %v3881_v51 = vmul.f32 %v5955_v50, %v5942_v16  ;;  %v3885_v53 = vmul.f32 %v5956_v42, %v5942_v16  ;;  %v3889_v41 = vmul.f32 %v5957_v54, %v5942_v16  ;;  %v5958_v61 = vld [vmem:[#allocation22_spill] sm:$0xff]  ;;  %v5959_v59 = vld [vmem:[#allocation55_spill] sm:$0xff]  ;;  %v5965_v9 = vld [vmem:[#allocation85_spill] sm:$0xff] }
 0x164   : > { %v3893_v60 = vmul.f32 %v5958_v61, %v5942_v16  ;;  %v3897_v58 = vmul.f32 %v5943_v49, %v5959_v59  ;;  %v3901_v57 = vmul.f32 %v5944_v48, %v5959_v59  ;;  %v3905_v56 = vmul.f32 %v5945_v47, %v5959_v59 }
 0x165   : > { %v3909_v55 = vmul.f32 %v5946_v46, %v5959_v59  ;;  %v3913_v16 = vmul.f32 %v5947_v5, %v5959_v59  ;;  %v3917_v45 = vmul.f32 %v5948_v35, %v5959_v59  ;;  %v3921_v39 = vmul.f32 %v5949_v43, %v5959_v59 }
 0x166   : > { %v3925_v7 = vmul.f32 %v5950_v19, %v5959_v59  ;;  %v3929_v8 = vmul.f32 %v5951_v11, %v5959_v59  ;;  %v3933_v24 = vmul.f32 %v5952_v14, %v5959_v59  ;;  %v3937_v29 = vmul.f32 %v5953_v30, %v5959_v59 }
 0x167   : > { %v3941_v44 = vmul.f32 %v5954_v13, %v5959_v59  ;;  %v3945_v52 = vmul.f32 %v5955_v50, %v5959_v59  ;;  %v3949_v0 = vmul.f32 %v5956_v42, %v5959_v59  ;;  %v3953_v38 = vmul.f32 %v5957_v54, %v5959_v59 }
 0x168   : > { %v3957_v1 = vmul.f32 %v5958_v61, %v5959_v59  ;;  %v3961_v36 = vmul.f32 %v5943_v49, %v5965_v9  ;;  %v3965_v26 = vmul.f32 %v5944_v48, %v5965_v9  ;;  %v3969_v63 = vmul.f32 %v5945_v47, %v5965_v9 }
 0x169   : > { %5960 = vst [vmem:[#allocation186_spill] sm:$0xff] %v3941_v44  ;;  %5961 = vst [vmem:[#allocation132_spill] sm:$0xff] %v3945_v52  ;;  %v3977_v59 = vmul.f32 %v5947_v5, %v5965_v9 }
 0x16a   : > { %5962 = vst [vmem:[#allocation187_spill] sm:$0xff] %v3949_v0  ;;  %5963 = vst [vmem:[#allocation133_spill] sm:$0xff] %v3953_v38  ;;  %v3973_v0 = vmul.f32 %v5946_v46, %v5965_v9 }
 0x16b   : > { %5964 = vst [vmem:[#allocation188_spill] sm:$0xff] %v3957_v1  ;;  %5966 = vst [vmem:[#allocation134_spill] sm:$0xff] %v3961_v36  ;;  %v3981_v1 = vmul.f32 %v5948_v35, %v5965_v9  ;;  %v3985_v36 = vmul.f32 %v5949_v43, %v5965_v9 }
 0x16c   : > { %5967 = vst [vmem:[#allocation189_spill] sm:$0xff] %v3965_v26  ;;  %5968 = vst [vmem:[#allocation135_spill] sm:$0xff] %v3969_v63  ;;  %v3989_v26 = vmul.f32 %v5950_v19, %v5965_v9  ;;  %v3993_v63 = vmul.f32 %v5951_v11, %v5965_v9 }
 0x16d   : > { %5969 = vst [vmem:[#allocation190_spill] sm:$0xff] %v3973_v0  ;;  %5970 = vst [vmem:[#allocation136_spill] sm:$0xff] %v3977_v59  ;;  %v3997_v0 = vmul.f32 %v5952_v14, %v5965_v9  ;;  %v4001_v59 = vmul.f32 %v5953_v30, %v5965_v9 }
 0x16e   : > { %5971 = vst [vmem:[#allocation191_spill] sm:$0xff] %v3981_v1  ;;  %5972 = vst [vmem:[#allocation137_spill] sm:$0xff] %v3985_v36  ;;  %v4005_v1 = vmul.f32 %v5954_v13, %v5965_v9  ;;  %v4009_v36 = vmul.f32 %v5955_v50, %v5965_v9 }
 0x16f   : > { %5973 = vst [vmem:[#allocation192_spill] sm:$0xff] %v3989_v26  ;;  %5974 = vst [vmem:[#allocation138_spill] sm:$0xff] %v3993_v63  ;;  %v4013_v26 = vmul.f32 %v5956_v42, %v5965_v9  ;;  %v4017_v63 = vmul.f32 %v5957_v54, %v5965_v9 }
 0x170   : > { %5975 = vst [vmem:[#allocation193_spill] sm:$0xff] %v3997_v0  ;;  %5976 = vst [vmem:[#allocation139_spill] sm:$0xff] %v4001_v59  ;;  %v4021_v0 = vmul.f32 %v5958_v61, %v5965_v9  ;;  %v5982_v59 = vld [vmem:[#allocation126_spill] sm:$0xff] }
 0x171   : > { %5977 = vst [vmem:[#allocation194_spill] sm:$0xff] %v4005_v1  ;;  %5978 = vst [vmem:[#allocation140_spill] sm:$0xff] %v4009_v36  ;;  %v4025_v38 = vmul.f32 %v5943_v49, %v5982_v59  ;;  %v4029_v1 = vmul.f32 %v5944_v48, %v5982_v59  ;;  %v4033_v36 = vmul.f32 %v5945_v47, %v5982_v59 }
 0x172   : > { %5979 = vst [vmem:[#allocation195_spill] sm:$0xff] %v4013_v26  ;;  %5980 = vst [vmem:[#allocation141_spill] sm:$0xff] %v4017_v63  ;;  %v4037_v26 = vmul.f32 %v5946_v46, %v5982_v59  ;;  %v4041_v9 = vmul.f32 %v5947_v5, %v5982_v59 }
 0x173   : > { %5981 = vst [vmem:[#allocation196_spill] sm:$0xff] %v4021_v0  ;;  %5983 = vst [vmem:[#allocation142_spill] sm:$0xff] %v4025_v38  ;;  %v4045_v0 = vmul.f32 %v5948_v35, %v5982_v59  ;;  %v4049_v38 = vmul.f32 %v5949_v43, %v5982_v59 }
 0x174   : > { %5984 = vst [vmem:[#allocation197_spill] sm:$0xff] %v4029_v1  ;;  %5985 = vst [vmem:[#allocation143_spill] sm:$0xff] %v4033_v36  ;;  %v4053_v1 = vmul.f32 %v5950_v19, %v5982_v59  ;;  %v4057_v36 = vmul.f32 %v5951_v11, %v5982_v59 }
 0x175   : > { %5986 = vst [vmem:[#allocation198_spill] sm:$0xff] %v4037_v26  ;;  %5987 = vst [vmem:[#allocation144_spill] sm:$0xff] %v4041_v9  ;;  %v4061_v26 = vmul.f32 %v5952_v14, %v5982_v59  ;;  %v4065_v9 = vmul.f32 %v5953_v30, %v5982_v59 }
 0x176   : > { %5988 = vst [vmem:[#allocation199_spill] sm:$0xff] %v4045_v0  ;;  %5989 = vst [vmem:[#allocation145_spill] sm:$0xff] %v4049_v38  ;;  %v4069_v0 = vmul.f32 %v5954_v13, %v5982_v59  ;;  %v4073_v38 = vmul.f32 %v5955_v50, %v5982_v59 }
 0x177   : > { %5990 = vst [vmem:[#allocation200_spill] sm:$0xff] %v4053_v1  ;;  %5991 = vst [vmem:[#allocation146_spill] sm:$0xff] %v4057_v36  ;;  %v4077_v1 = vmul.f32 %v5956_v42, %v5982_v59  ;;  %v4081_v36 = vmul.f32 %v5957_v54, %v5982_v59 }
 0x178   : > { %5992 = vst [vmem:[#allocation201_spill] sm:$0xff] %v4061_v26  ;;  %5993 = vst [vmem:[#allocation147_spill] sm:$0xff] %v4065_v9  ;;  %v4085_v26 = vmul.f32 %v5958_v61, %v5982_v59  ;;  %v5999_v9 = vld [vmem:[#allocation167_spill] sm:$0xff] }
 0x179   : > { %5994 = vst [vmem:[#allocation202_spill] sm:$0xff] %v4069_v0  ;;  %5995 = vst [vmem:[#allocation148_spill] sm:$0xff] %v4073_v38  ;;  %v4089_v63 = vmul.f32 %v5943_v49, %v5999_v9  ;;  %v966_v0 = vpop.permute.xlu0 %965  ;;  %v4093_v38 = vmul.f32 %v5944_v48, %v5999_v9  ;;  %v4105_v59 = vmul.f32 %v5947_v5, %v5999_v9 }
 0x17a   : > { %5996 = vst [vmem:[#allocation203_spill] sm:$0xff] %v4077_v1  ;;  %5997 = vst [vmem:[#allocation149_spill] sm:$0xff] %v4081_v36  ;;  %v4097_v1 = vmul.f32 %v5945_v47, %v5999_v9  ;;  %v4101_v36 = vmul.f32 %v5946_v46, %v5999_v9  ;;  %v4155_v52 = vmul.f32 %v5944_v48, %v966_v0 }
 0x17b   : > { %5998 = vst [vmem:[#allocation204_spill] sm:$0xff] %v4085_v26  ;;  %6000 = vst [vmem:[#allocation150_spill] sm:$0xff] %v4089_v63  ;;  %v4109_v63 = vmul.f32 %v5948_v35, %v5999_v9  ;;  %v4113_v26 = vmul.f32 %v5949_v43, %v5999_v9  ;;  %v4164_v44 = vmul.f32 %v5947_v5, %v966_v0 }
 0x17c   : > { %6001 = vst [vmem:[#allocation205_spill] sm:$0xff] %v4093_v38  ;;  %6002 = vst [vmem:[#allocation151_spill] sm:$0xff] %v4097_v1  ;;  %v4117_v38 = vmul.f32 %v5950_v19, %v5999_v9  ;;  %v4121_v1 = vmul.f32 %v5951_v11, %v5999_v9 }
 0x17d   : > { %6003 = vst [vmem:[#allocation206_spill] sm:$0xff] %v4101_v36  ;;  %6004 = vst [vmem:[#allocation152_spill] sm:$0xff] %v4105_v59  ;;  %v4125_v36 = vmul.f32 %v5952_v14, %v5999_v9  ;;  %v4129_v59 = vmul.f32 %v5953_v30, %v5999_v9 }
 0x17e   : > { %6005 = vst [vmem:[#allocation207_spill] sm:$0xff] %v4109_v63  ;;  %6006 = vst [vmem:[#allocation153_spill] sm:$0xff] %v4113_v26  ;;  %v4133_v63 = vmul.f32 %v5954_v13, %v5999_v9  ;;  %v4137_v26 = vmul.f32 %v5955_v50, %v5999_v9 }
 0x17f   : > { %6007 = vst [vmem:[#allocation208_spill] sm:$0xff] %v4117_v38  ;;  %6008 = vst [vmem:[#allocation154_spill] sm:$0xff] %v4121_v1  ;;  %v4141_v38 = vmul.f32 %v5956_v42, %v5999_v9  ;;  %v4145_v1 = vmul.f32 %v5957_v54, %v5999_v9 }
 0x180   : > { %6009 = vst [vmem:[#allocation209_spill] sm:$0xff] %v4125_v36  ;;  %6010 = vst [vmem:[#allocation155_spill] sm:$0xff] %v4129_v59  ;;  %v4149_v36 = vmul.f32 %v5958_v61, %v5999_v9  ;;  %v4152_v59 = vmul.f32 %v5943_v49, %v966_v0  ;;  %v4170_v9 = vmul.f32 %v5949_v43, %v966_v0 }
 0x181   : > { %6011 = vst [vmem:[#allocation210_spill] sm:$0xff] %v4133_v63  ;;  %6012 = vst [vmem:[#allocation156_spill] sm:$0xff] %v4137_v26  ;;  %v970_v63 = vpop.permute.xlu0 %969  ;;  %v4158_v26 = vmul.f32 %v5945_v47, %v966_v0 }
 0x182   : > { %6013 = vst [vmem:[#allocation211_spill] sm:$0xff] %v4141_v38  ;;  %6014 = vst [vmem:[#allocation157_spill] sm:$0xff] %v4145_v1  ;;  %v4161_v38 = vmul.f32 %v5946_v46, %v966_v0  ;;  %v4167_v1 = vmul.f32 %v5948_v35, %v966_v0 }
 0x183   : > { %6015 = vst [vmem:[#allocation158_spill] sm:$0xff] %v4149_v36  ;;  %6016 = vst [vmem:[#allocation212_spill] sm:$0xff] %v4152_v59  ;;  %v4173_v59 = vmul.f32 %v5950_v19, %v966_v0  ;;  %v974_v36 = vpop.permute.xlu1 %973 }
 0x184   : > { %6017 = vst [vmem:[#allocation159_spill] sm:$0xff] %v4155_v52  ;;  %6018 = vst [vmem:[#allocation160_spill] sm:$0xff] %v4158_v26  ;;  %v4176_v52 = vmul.f32 %v5951_v11, %v966_v0  ;;  %v4179_v26 = vmul.f32 %v5952_v14, %v966_v0 }
 0x185   : > { %6019 = vst [vmem:[#allocation214_spill] sm:$0xff] %v4161_v38  ;;  %6020 = vst [vmem:[#allocation161_spill] sm:$0xff] %v4164_v44  ;;  %v4182_v38 = vmul.f32 %v5953_v30, %v966_v0  ;;  %v4185_v44 = vmul.f32 %v5954_v13, %v966_v0 }
 0x186   : > { %6021 = vst [vmem:[#allocation215_spill] sm:$0xff] %v4167_v1  ;;  %6022 = vst [vmem:[#allocation162_spill] sm:$0xff] %v4170_v9  ;;  %v4188_v1 = vmul.f32 %v5955_v50, %v966_v0  ;;  %v4191_v9 = vmul.f32 %v5956_v42, %v966_v0 }
 0x187   : > { %6023 = vst [vmem:[#allocation163_spill] sm:$0xff] %v4173_v59  ;;  %6024 = vst [vmem:[#allocation164_spill] sm:$0xff] %v4176_v52  ;;  %v4194_v59 = vmul.f32 %v5957_v54, %v966_v0  ;;  %v4197_v52 = vmul.f32 %v5958_v61, %v966_v0  ;;  %v4218_v0 = vmul.f32 %v5949_v43, %v970_v63 }
 0x188   : > { %6025 = vst [vmem:[#allocation165_spill] sm:$0xff] %v4179_v26  ;;  %6026 = vst [vmem:[#allocation166_spill] sm:$0xff] %v4182_v38  ;;  %v4200_v26 = vmul.f32 %v5943_v49, %v970_v63  ;;  %v4203_v38 = vmul.f32 %v5944_v48, %v970_v63 }
 0x189   : > { %6027 = vst [vmem:[#allocation168_spill] sm:$0xff] %v4185_v44  ;;  %6028 = vst [vmem:[#allocation169_spill] sm:$0xff] %v4188_v1  ;;  %v4206_v44 = vmul.f32 %v5945_v47, %v970_v63  ;;  %v4209_v1 = vmul.f32 %v5946_v46, %v970_v63 }
 0x18a   : > { %6029 = vst [vmem:[#allocation170_spill] sm:$0xff] %v4191_v9  ;;  %6030 = vst [vmem:[#allocation171_spill] sm:$0xff] %v4194_v59  ;;  %v4212_v9 = vmul.f32 %v5947_v5, %v970_v63  ;;  %v4215_v59 = vmul.f32 %v5948_v35, %v970_v63 }
 0x18b   : > { %6031 = vst [vmem:[#allocation172_spill] sm:$0xff] %v4200_v26  ;;  %6032 = vst [vmem:[#allocation173_spill] sm:$0xff] %v4203_v38  ;;  %v4221_v26 = vmul.f32 %v5950_v19, %v970_v63  ;;  %v4224_v38 = vmul.f32 %v5951_v11, %v970_v63 }
 0x18c   : > { %6033 = vst [vmem:[#allocation174_spill] sm:$0xff] %v4206_v44  ;;  %6034 = vst [vmem:[#allocation213_spill] sm:$0xff] %v4209_v1  ;;  %v4227_v44 = vmul.f32 %v5952_v14, %v970_v63  ;;  %v4230_v1 = vmul.f32 %v5953_v30, %v970_v63 }
 0x18d   : > { %6035 = vst [vmem:[#allocation216_spill] sm:$0xff] %v4212_v9  ;;  %6036 = vst [vmem:[#allocation217_spill] sm:$0xff] %v4215_v59  ;;  %v4233_v9 = vmul.f32 %v5954_v13, %v970_v63  ;;  %v4236_v59 = vmul.f32 %v5955_v50, %v970_v63 }
 0x18e   : > { %6037 = vst [vmem:[#allocation218_spill] sm:$0xff] %v4218_v0  ;;  %6038 = vst [vmem:[#allocation219_spill] sm:$0xff] %v4221_v26  ;;  %v4239_v0 = vmul.f32 %v5956_v42, %v970_v63  ;;  %v4242_v26 = vmul.f32 %v5957_v54, %v970_v63 }
 0x18f   : > { %6039 = vst [vmem:[#allocation220_spill] sm:$0xff] %v4224_v38  ;;  %6040 = vst [vmem:[#allocation221_spill] sm:$0xff] %v4227_v44  ;;  %v4245_v38 = vmul.f32 %v5958_v61, %v970_v63  ;;  %v4248_v44 = vmul.f32 %v5943_v49, %v974_v36  ;;  %v4266_v63 = vmul.f32 %v5949_v43, %v974_v36 }
 0x190   : > { %6041 = vst [vmem:[#allocation222_spill] sm:$0xff] %v4230_v1  ;;  %6042 = vst [vmem:[#allocation223_spill] sm:$0xff] %v4233_v9  ;;  %v4251_v1 = vmul.f32 %v5944_v48, %v974_v36  ;;  %v4254_v9 = vmul.f32 %v5945_v47, %v974_v36  ;;  %v4269_v49 = vmul.f32 %v5950_v19, %v974_v36 }
 0x191   : > { %6043 = vst [vmem:[#allocation224_spill] sm:$0xff] %v4236_v59  ;;  %6044 = vst [vmem:[#allocation225_spill] sm:$0xff] %v4239_v0  ;;  %v4257_v59 = vmul.f32 %v5946_v46, %v974_v36  ;;  %v4260_v0 = vmul.f32 %v5947_v5, %v974_v36  ;;  %v4272_v48 = vmul.f32 %v5951_v11, %v974_v36 }
 0x192   : > { %6045 = vst [vmem:[#allocation226_spill] sm:$0xff] %v4242_v26  ;;  %v4263_v26 = vmul.f32 %v5948_v35, %v974_v36  ;;  %v4275_v47 = vmul.f32 %v5952_v14, %v974_v36  ;;  %v4278_v46 = vmul.f32 %v5953_v30, %v974_v36  ;;  %v4281_v5 = vmul.f32 %v5954_v13, %v974_v36  ;;  %v6052_v30 = vld [vmem:[#allocation24_spill] sm:$0xff] }
 0x193   : > { %v4284_v35 = vmul.f32 %v5955_v50, %v974_v36  ;;  %v4287_v43 = vmul.f32 %v5956_v42, %v974_v36  ;;  %v4290_v19 = vmul.f32 %v5957_v54, %v974_v36  ;;  %v4293_v11 = vmul.f32 %v5958_v61, %v974_v36  ;;  %v6048_v61 = vld [vmem:[#allocation23_spill] sm:$0xff] }
 0x194   : > { %v4297_v14 = vadd.f32 %v3833_v25, %v3321_v27  ;;  %v4301_v13 = vadd.f32 %v3837_v15, %v3325_v28  ;;  %v4305_v50 = vadd.f32 %v3841_v20, %v3329_v31  ;;  %v4309_v42 = vadd.f32 %v3845_v21, %v3333_v32  ;;  %v6050_v54 = vld [vmem:[#allocation71_spill] sm:$0xff]  ;;  %v6060_v25 = vld [vmem:[#allocation26_spill] sm:$0xff] }
 0x195   : > { %v4313_v36 = vadd.f32 %v3849_v22, %v3337_v33  ;;  %v4317_v27 = vadd.f32 %v3853_v4, %v3341_v34  ;;  %v4321_v28 = vadd.f32 %v3857_v62, %v3345_v37  ;;  %v4325_v31 = vadd.f32 %v3861_v18, %v3349_v3  ;;  %v6054_v18 = vld [vmem:[#allocation72_spill] sm:$0xff]  ;;  %v6061_v15 = vld [vmem:[#allocation74_spill] sm:$0xff]  ;;  %v6062_v20 = vld [vmem:[#allocation27_spill] sm:$0xff] }
 0x196   : > { %v4329_v32 = vadd.f32 %v3865_v10, %v3353_v2  ;;  %v4333_v33 = vadd.f32 %v3869_v40, %v3357_v6  ;;  %v4337_v34 = vadd.f32 %v3873_v17, %v6048_v61  ;;  %v4341_v37 = vadd.f32 %v3877_v23, %v6050_v54  ;;  %v6056_v10 = vld [vmem:[#allocation25_spill] sm:$0xff]  ;;  %v6063_v21 = vld [vmem:[#allocation75_spill] sm:$0xff]  ;;  %v6064_v22 = vld [vmem:[#allocation28_spill] sm:$0xff] }
 0x197   : > { %v4345_v3 = vadd.f32 %v3881_v51, %v6052_v30  ;;  %v4349_v2 = vadd.f32 %v3885_v53, %v6054_v18  ;;  %v4353_v6 = vadd.f32 %v3889_v41, %v6056_v10  ;;  %v6058_v40 = vld [vmem:[#allocation73_spill] sm:$0xff]  ;;  %v4361_v23 = vadd.f32 %v3897_v58, %v6060_v25  ;;  %v6065_v4 = vld [vmem:[#allocation76_spill] sm:$0xff]  ;;  %v6069_v61 = vld [vmem:[#allocation30_spill] sm:$0xff] }
 0x198   : > { %6046 = vst [vmem:[#allocation11_spill] sm:$0xff] %v4329_v32  ;;  %6047 = vst [vmem:[#allocation6_spill] sm:$0xff] %v4333_v33  ;;  %v4357_v17 = vadd.f32 %v3893_v60, %v6058_v40  ;;  %v4365_v51 = vadd.f32 %v3901_v57, %v6061_v15  ;;  %v4369_v53 = vadd.f32 %v3905_v56, %v3393_v12  ;;  %v6066_v62 = vld [vmem:[#allocation29_spill] sm:$0xff]  ;;  %v6071_v54 = vld [vmem:[#allocation78_spill] sm:$0xff] }
 0x199   : > { %6049 = vst [vmem:[#allocation7_spill] sm:$0xff] %v4337_v34  ;;  %6051 = vst [vmem:[#allocation8_spill] sm:$0xff] %v4341_v37  ;;  %v4373_v41 = vadd.f32 %v3909_v55, %v6062_v20  ;;  %v4377_v60 = vadd.f32 %v3913_v16, %v6063_v21  ;;  %v4381_v58 = vadd.f32 %v3917_v45, %v6064_v22  ;;  %v6067_v56 = vld [vmem:[#allocation77_spill] sm:$0xff]  ;;  %v6073_v30 = vld [vmem:[#allocation31_spill] sm:$0xff] }
 0x19a   : > { %6053 = vst [vmem:[#allocation9_spill] sm:$0xff] %v4345_v3  ;;  %6055 = vst [vmem:[#allocation10_spill] sm:$0xff] %v4349_v2  ;;  %v4385_v57 = vadd.f32 %v3921_v39, %v6065_v4  ;;  %v4389_v12 = vadd.f32 %v3925_v7, %v6066_v62  ;;  %v4393_v55 = vadd.f32 %v3929_v8, %v6067_v56  ;;  %v6074_v18 = vld [vmem:[#allocation186_spill] sm:$0xff]  ;;  %v6076_v10 = vld [vmem:[#allocation79_spill] sm:$0xff] }
 0x19b   : > { %6057 = vst [vmem:[#allocation12_spill] sm:$0xff] %v4353_v6  ;;  %6059 = vst [vmem:[#allocation13_spill] sm:$0xff] %v4357_v17  ;;  %v4397_v16 = vadd.f32 %v3933_v24, %v6069_v61  ;;  %v4401_v45 = vadd.f32 %v3937_v29, %v6071_v54  ;;  %v4405_v39 = vadd.f32 %v6074_v18, %v6073_v30  ;;  %v6077_v40 = vld [vmem:[#allocation132_spill] sm:$0xff]  ;;  %v6080_v15 = vld [vmem:[#allocation187_spill] sm:$0xff] }
 0x19c   : > { %6068 = vst [vmem:[#allocation14_spill] sm:$0xff] %v4393_v55  ;;  %v4409_v7 = vadd.f32 %v6077_v40, %v6076_v10  ;;  %v6079_v25 = vld [vmem:[#allocation32_spill] sm:$0xff]  ;;  %v6083_v21 = vld [vmem:[#allocation133_spill] sm:$0xff]  ;;  %v6089_v56 = vld [vmem:[#allocation134_spill] sm:$0xff] }
 0x19d   : > { %6070 = vst [vmem:[#allocation15_spill] sm:$0xff] %v4397_v16  ;;  %6072 = vst [vmem:[#allocation16_spill] sm:$0xff] %v4401_v45  ;;  %v4413_v8 = vadd.f32 %v6080_v15, %v6079_v25  ;;  %v6082_v20 = vld [vmem:[#allocation80_spill] sm:$0xff]  ;;  %v6085_v22 = vld [vmem:[#allocation33_spill] sm:$0xff] }
 0x19e   : > { %6075 = vst [vmem:[#allocation17_spill] sm:$0xff] %v4405_v39  ;;  %6078 = vst [vmem:[#allocation18_spill] sm:$0xff] %v4409_v7  ;;  %v4417_v24 = vadd.f32 %v6083_v21, %v6082_v20  ;;  %v6086_v4 = vld [vmem:[#allocation188_spill] sm:$0xff]  ;;  %v6088_v62 = vld [vmem:[#allocation81_spill] sm:$0xff] }
 0x19f   : > { %6081 = vst [vmem:[#allocation19_spill] sm:$0xff] %v4413_v8  ;;  %v4421_v29 = vadd.f32 %v6086_v4, %v6085_v22  ;;  %v4425_v61 = vadd.f32 %v6089_v56, %v6088_v62  ;;  %v6091_v54 = vld [vmem:[#allocation34_spill] sm:$0xff]  ;;  %v6092_v30 = vld [vmem:[#allocation189_spill] sm:$0xff]  ;;  %v6095_v40 = vld [vmem:[#allocation135_spill] sm:$0xff] }
 0x1a0   : > { %6084 = vst [vmem:[#allocation20_spill] sm:$0xff] %v4417_v24  ;;  %v4429_v18 = vadd.f32 %v6092_v30, %v6091_v54  ;;  %v6094_v10 = vld [vmem:[#allocation82_spill] sm:$0xff]  ;;  %v6097_v15 = vld [vmem:[#allocation35_spill] sm:$0xff]  ;;  %v6101_v24 = vld [vmem:[#allocation136_spill] sm:$0xff] }
 0x1a1   : > { %6087 = vst [vmem:[#allocation21_spill] sm:$0xff] %v4421_v29  ;;  %6090 = vst [vmem:[#allocation22_spill] sm:$0xff] %v4425_v61  ;;  %v4433_v25 = vadd.f32 %v6095_v40, %v6094_v10  ;;  %v6098_v8 = vld [vmem:[#allocation190_spill] sm:$0xff]  ;;  %v6100_v21 = vld [vmem:[#allocation83_spill] sm:$0xff] }
 0x1a2   : > { %6093 = vst [vmem:[#allocation55_spill] sm:$0xff] %v4429_v18  ;;  %v4437_v20 = vadd.f32 %v6098_v8, %v6097_v15  ;;  %v4441_v22 = vadd.f32 %v6101_v24, %v6100_v21  ;;  %v6103_v4 = vld [vmem:[#allocation36_spill] sm:$0xff]  ;;  %v6104_v29 = vld [vmem:[#allocation191_spill] sm:$0xff]  ;;  %v6107_v61 = vld [vmem:[#allocation137_spill] sm:$0xff] }
 0x1a3   : > { %6096 = vst [vmem:[#allocation85_spill] sm:$0xff] %v4433_v25  ;;  %v4445_v62 = vadd.f32 %v6104_v29, %v6103_v4  ;;  %v6106_v56 = vld [vmem:[#allocation84_spill] sm:$0xff]  ;;  %v6109_v30 = vld [vmem:[#allocation37_spill] sm:$0xff]  ;;  %v6112_v40 = vld [vmem:[#allocation38_spill] sm:$0xff] }
 0x1a4   : > { %6099 = vst [vmem:[#allocation126_spill] sm:$0xff] %v4437_v20  ;;  %6102 = vst [vmem:[#allocation167_spill] sm:$0xff] %v4441_v22  ;;  %v4449_v54 = vadd.f32 %v6107_v61, %v6106_v56  ;;  %v6110_v18 = vld [vmem:[#allocation192_spill] sm:$0xff]  ;;  %v6113_v25 = vld [vmem:[#allocation138_spill] sm:$0xff] }
 0x1a5   : > { %6105 = vst [vmem:[#allocation23_spill] sm:$0xff] %v4445_v62  ;;  %v4453_v10 = vadd.f32 %v6110_v18, %v6109_v30  ;;  %v4457_v8 = vadd.f32 %v6113_v25, %v6112_v40  ;;  %v6115_v15 = vld [vmem:[#allocation86_spill] sm:$0xff]  ;;  %v6116_v20 = vld [vmem:[#allocation193_spill] sm:$0xff]  ;;  %v6118_v21 = vld [vmem:[#allocation39_spill] sm:$0xff] }
 0x1a6   : > { %6108 = vst [vmem:[#allocation71_spill] sm:$0xff] %v4449_v54  ;;  %v4461_v24 = vadd.f32 %v6116_v20, %v6115_v15  ;;  %v6119_v22 = vld [vmem:[#allocation139_spill] sm:$0xff]  ;;  %v6122_v62 = vld [vmem:[#allocation194_spill] sm:$0xff]  ;;  %v6124_v56 = vld [vmem:[#allocation40_spill] sm:$0xff] }
 0x1a7   : > { %6111 = vst [vmem:[#allocation24_spill] sm:$0xff] %v4453_v10  ;;  %6114 = vst [vmem:[#allocation72_spill] sm:$0xff] %v4457_v8  ;;  %v4465_v29 = vadd.f32 %v6119_v22, %v6118_v21  ;;  %v6121_v4 = vld [vmem:[#allocation87_spill] sm:$0xff]  ;;  %v6125_v54 = vld [vmem:[#allocation140_spill] sm:$0xff] }
 0x1a8   : > { %6117 = vst [vmem:[#allocation25_spill] sm:$0xff] %v4461_v24  ;;  %v4469_v61 = vadd.f32 %v6122_v62, %v6121_v4  ;;  %v4473_v18 = vadd.f32 %v6125_v54, %v6124_v56  ;;  %v6127_v30 = vld [vmem:[#allocation88_spill] sm:$0xff]  ;;  %v6128_v10 = vld [vmem:[#allocation195_spill] sm:$0xff]  ;;  %v6130_v40 = vld [vmem:[#allocation41_spill] sm:$0xff] }
 0x1a9   : > { %6120 = vst [vmem:[#allocation73_spill] sm:$0xff] %v4465_v29  ;;  %v4477_v25 = vadd.f32 %v6128_v10, %v6127_v30  ;;  %v6131_v8 = vld [vmem:[#allocation141_spill] sm:$0xff]  ;;  %v6134_v24 = vld [vmem:[#allocation196_spill] sm:$0xff]  ;;  %v6136_v21 = vld [vmem:[#allocation42_spill] sm:$0xff] }
 0x1aa   : > { %6123 = vst [vmem:[#allocation26_spill] sm:$0xff] %v4469_v61  ;;  %6126 = vst [vmem:[#allocation74_spill] sm:$0xff] %v4473_v18  ;;  %v4481_v20 = vadd.f32 %v6131_v8, %v6130_v40  ;;  %v6133_v15 = vld [vmem:[#allocation89_spill] sm:$0xff]  ;;  %v6137_v29 = vld [vmem:[#allocation142_spill] sm:$0xff] }
 0x1ab   : > { %6129 = vst [vmem:[#allocation27_spill] sm:$0xff] %v4477_v25  ;;  %v4485_v22 = vadd.f32 %v6134_v24, %v6133_v15  ;;  %v4489_v62 = vadd.f32 %v6137_v29, %v6136_v21  ;;  %v6139_v4 = vld [vmem:[#allocation90_spill] sm:$0xff]  ;;  %v6140_v61 = vld [vmem:[#allocation197_spill] sm:$0xff]  ;;  %v6142_v56 = vld [vmem:[#allocation43_spill] sm:$0xff] }
 0x1ac   : > { %6132 = vst [vmem:[#allocation75_spill] sm:$0xff] %v4481_v20  ;;  %v4493_v54 = vadd.f32 %v6140_v61, %v6139_v4  ;;  %v6143_v18 = vld [vmem:[#allocation143_spill] sm:$0xff]  ;;  %v6146_v25 = vld [vmem:[#allocation198_spill] sm:$0xff]  ;;  %v6148_v40 = vld [vmem:[#allocation44_spill] sm:$0xff] }
 0x1ad   : > { %6135 = vst [vmem:[#allocation28_spill] sm:$0xff] %v4485_v22  ;;  %6138 = vst [vmem:[#allocation76_spill] sm:$0xff] %v4489_v62  ;;  %v4497_v10 = vadd.f32 %v6143_v18, %v6142_v56  ;;  %v6145_v30 = vld [vmem:[#allocation91_spill] sm:$0xff]  ;;  %v6149_v20 = vld [vmem:[#allocation144_spill] sm:$0xff] }
 0x1ae   : > { %6141 = vst [vmem:[#allocation29_spill] sm:$0xff] %v4493_v54  ;;  %v4501_v8 = vadd.f32 %v6146_v25, %v6145_v30  ;;  %v4505_v24 = vadd.f32 %v6149_v20, %v6148_v40  ;;  %v6151_v15 = vld [vmem:[#allocation92_spill] sm:$0xff]  ;;  %v6152_v22 = vld [vmem:[#allocation199_spill] sm:$0xff]  ;;  %v6154_v21 = vld [vmem:[#allocation45_spill] sm:$0xff] }
 0x1af   : > { %6144 = vst [vmem:[#allocation77_spill] sm:$0xff] %v4497_v10  ;;  %v4509_v29 = vadd.f32 %v6152_v22, %v6151_v15  ;;  %v6155_v62 = vld [vmem:[#allocation145_spill] sm:$0xff]  ;;  %v6158_v54 = vld [vmem:[#allocation200_spill] sm:$0xff]  ;;  %v6160_v56 = vld [vmem:[#allocation46_spill] sm:$0xff] }
 0x1b0   : > { %6147 = vst [vmem:[#allocation30_spill] sm:$0xff] %v4501_v8  ;;  %6150 = vst [vmem:[#allocation78_spill] sm:$0xff] %v4505_v24  ;;  %v4513_v61 = vadd.f32 %v6155_v62, %v6154_v21  ;;  %v6157_v4 = vld [vmem:[#allocation93_spill] sm:$0xff]  ;;  %v6161_v10 = vld [vmem:[#allocation146_spill] sm:$0xff] }
 0x1b1   : > { %6153 = vst [vmem:[#allocation31_spill] sm:$0xff] %v4509_v29  ;;  %v4517_v18 = vadd.f32 %v6158_v54, %v6157_v4  ;;  %v4521_v25 = vadd.f32 %v6161_v10, %v6160_v56  ;;  %v6163_v30 = vld [vmem:[#allocation94_spill] sm:$0xff]  ;;  %v6164_v8 = vld [vmem:[#allocation201_spill] sm:$0xff]  ;;  %v6166_v40 = vld [vmem:[#allocation47_spill] sm:$0xff] }
 0x1b2   : > { %6156 = vst [vmem:[#allocation186_spill] sm:$0xff] %v4513_v61  ;;  %v4525_v20 = vadd.f32 %v6164_v8, %v6163_v30  ;;  %v6167_v24 = vld [vmem:[#allocation147_spill] sm:$0xff]  ;;  %v6170_v29 = vld [vmem:[#allocation202_spill] sm:$0xff]  ;;  %v6172_v21 = vld [vmem:[#allocation48_spill] sm:$0xff] }
 0x1b3   : > { %6159 = vst [vmem:[#allocation79_spill] sm:$0xff] %v4517_v18  ;;  %6162 = vst [vmem:[#allocation132_spill] sm:$0xff] %v4521_v25  ;;  %v4529_v22 = vadd.f32 %v6167_v24, %v6166_v40  ;;  %v6169_v15 = vld [vmem:[#allocation95_spill] sm:$0xff]  ;;  %v6173_v61 = vld [vmem:[#allocation148_spill] sm:$0xff] }
 0x1b4   : > { %6165 = vst [vmem:[#allocation32_spill] sm:$0xff] %v4525_v20  ;;  %v4533_v62 = vadd.f32 %v6170_v29, %v6169_v15  ;;  %v4537_v54 = vadd.f32 %v6173_v61, %v6172_v21  ;;  %v6175_v4 = vld [vmem:[#allocation96_spill] sm:$0xff]  ;;  %v6176_v18 = vld [vmem:[#allocation203_spill] sm:$0xff]  ;;  %v6178_v56 = vld [vmem:[#allocation49_spill] sm:$0xff] }
 0x1b5   : > { %6168 = vst [vmem:[#allocation187_spill] sm:$0xff] %v4529_v22  ;;  %v4541_v10 = vadd.f32 %v6176_v18, %v6175_v4  ;;  %v6179_v25 = vld [vmem:[#allocation149_spill] sm:$0xff]  ;;  %v6182_v20 = vld [vmem:[#allocation204_spill] sm:$0xff]  ;;  %v6184_v40 = vld [vmem:[#allocation50_spill] sm:$0xff] }
 0x1b6   : > { %6171 = vst [vmem:[#allocation80_spill] sm:$0xff] %v4533_v62  ;;  %6174 = vst [vmem:[#allocation133_spill] sm:$0xff] %v4537_v54  ;;  %v4545_v8 = vadd.f32 %v6179_v25, %v6178_v56  ;;  %v6181_v30 = vld [vmem:[#allocation97_spill] sm:$0xff]  ;;  %v6185_v22 = vld [vmem:[#allocation150_spill] sm:$0xff] }
 0x1b7   : > { %6177 = vst [vmem:[#allocation33_spill] sm:$0xff] %v4541_v10  ;;  %v4549_v24 = vadd.f32 %v6182_v20, %v6181_v30  ;;  %v4553_v29 = vadd.f32 %v6185_v22, %v6184_v40  ;;  %v6187_v15 = vld [vmem:[#allocation98_spill] sm:$0xff]  ;;  %v6188_v62 = vld [vmem:[#allocation205_spill] sm:$0xff]  ;;  %v6190_v21 = vld [vmem:[#allocation51_spill] sm:$0xff] }
 0x1b8   : > { %6180 = vst [vmem:[#allocation188_spill] sm:$0xff] %v4545_v8  ;;  %v4557_v61 = vadd.f32 %v6188_v62, %v6187_v15  ;;  %v6191_v54 = vld [vmem:[#allocation151_spill] sm:$0xff]  ;;  %v6194_v10 = vld [vmem:[#allocation206_spill] sm:$0xff]  ;;  %v6196_v56 = vld [vmem:[#allocation52_spill] sm:$0xff] }
 0x1b9   : > { %6183 = vst [vmem:[#allocation81_spill] sm:$0xff] %v4549_v24  ;;  %6186 = vst [vmem:[#allocation134_spill] sm:$0xff] %v4553_v29  ;;  %v4561_v18 = vadd.f32 %v6191_v54, %v6190_v21  ;;  %v6193_v4 = vld [vmem:[#allocation99_spill] sm:$0xff]  ;;  %v6197_v8 = vld [vmem:[#allocation152_spill] sm:$0xff] }
 0x1ba   : > { %6189 = vst [vmem:[#allocation34_spill] sm:$0xff] %v4557_v61  ;;  %v4565_v25 = vadd.f32 %v6194_v10, %v6193_v4  ;;  %v4569_v20 = vadd.f32 %v6197_v8, %v6196_v56  ;;  %v6199_v30 = vld [vmem:[#allocation100_spill] sm:$0xff]  ;;  %v6200_v24 = vld [vmem:[#allocation207_spill] sm:$0xff]  ;;  %v6202_v40 = vld [vmem:[#allocation53_spill] sm:$0xff] }
 0x1bb   : > { %6192 = vst [vmem:[#allocation189_spill] sm:$0xff] %v4561_v18  ;;  %v4573_v22 = vadd.f32 %v6200_v24, %v6199_v30  ;;  %v6203_v29 = vld [vmem:[#allocation153_spill] sm:$0xff]  ;;  %v6206_v61 = vld [vmem:[#allocation208_spill] sm:$0xff]  ;;  %v6208_v21 = vld [vmem:[#allocation54_spill] sm:$0xff] }
 0x1bc   : > { %6195 = vst [vmem:[#allocation82_spill] sm:$0xff] %v4565_v25  ;;  %6198 = vst [vmem:[#allocation135_spill] sm:$0xff] %v4569_v20  ;;  %v4577_v62 = vadd.f32 %v6203_v29, %v6202_v40  ;;  %v6205_v15 = vld [vmem:[#allocation101_spill] sm:$0xff]  ;;  %v6209_v18 = vld [vmem:[#allocation154_spill] sm:$0xff] }
 0x1bd   : > { %6201 = vst [vmem:[#allocation35_spill] sm:$0xff] %v4573_v22  ;;  %v4581_v54 = vadd.f32 %v6206_v61, %v6205_v15  ;;  %v4585_v10 = vadd.f32 %v6209_v18, %v6208_v21  ;;  %v6211_v4 = vld [vmem:[#allocation102_spill] sm:$0xff]  ;;  %v6212_v25 = vld [vmem:[#allocation209_spill] sm:$0xff]  ;;  %v6214_v56 = vld [vmem:[#allocation56_spill] sm:$0xff] }
 0x1be   : > { %6204 = vst [vmem:[#allocation190_spill] sm:$0xff] %v4577_v62  ;;  %v4589_v8 = vadd.f32 %v6212_v25, %v6211_v4  ;;  %v6215_v20 = vld [vmem:[#allocation155_spill] sm:$0xff]  ;;  %v6218_v22 = vld [vmem:[#allocation210_spill] sm:$0xff]  ;;  %v6220_v40 = vld [vmem:[#allocation57_spill] sm:$0xff] }
 0x1bf   : > { %6207 = vst [vmem:[#allocation83_spill] sm:$0xff] %v4581_v54  ;;  %6210 = vst [vmem:[#allocation136_spill] sm:$0xff] %v4585_v10  ;;  %v4593_v24 = vadd.f32 %v6215_v20, %v6214_v56  ;;  %v6217_v30 = vld [vmem:[#allocation103_spill] sm:$0xff]  ;;  %v6221_v62 = vld [vmem:[#allocation156_spill] sm:$0xff] }
 0x1c0   : > { %6213 = vst [vmem:[#allocation36_spill] sm:$0xff] %v4589_v8  ;;  %v4597_v29 = vadd.f32 %v6218_v22, %v6217_v30  ;;  %v4601_v61 = vadd.f32 %v6221_v62, %v6220_v40  ;;  %v6223_v15 = vld [vmem:[#allocation104_spill] sm:$0xff]  ;;  %v6224_v54 = vld [vmem:[#allocation211_spill] sm:$0xff]  ;;  %v6226_v21 = vld [vmem:[#allocation58_spill] sm:$0xff] }
 0x1c1   : > { %6216 = vst [vmem:[#allocation191_spill] sm:$0xff] %v4593_v24  ;;  %v4605_v18 = vadd.f32 %v6224_v54, %v6223_v15  ;;  %v6227_v10 = vld [vmem:[#allocation157_spill] sm:$0xff]  ;;  %v6230_v8 = vld [vmem:[#allocation158_spill] sm:$0xff]  ;;  %v6232_v56 = vld [vmem:[#allocation59_spill] sm:$0xff] }
 0x1c2   : > { %6219 = vst [vmem:[#allocation84_spill] sm:$0xff] %v4597_v29  ;;  %6222 = vst [vmem:[#allocation137_spill] sm:$0xff] %v4601_v61  ;;  %v4609_v25 = vadd.f32 %v6227_v10, %v6226_v21  ;;  %v6229_v4 = vld [vmem:[#allocation105_spill] sm:$0xff]  ;;  %v6233_v24 = vld [vmem:[#allocation212_spill] sm:$0xff] }
 0x1c3   : > { %6225 = vst [vmem:[#allocation37_spill] sm:$0xff] %v4605_v18  ;;  %v4613_v20 = vadd.f32 %v6230_v8, %v6229_v4  ;;  %v4617_v22 = vadd.f32 %v6233_v24, %v6232_v56  ;;  %v6235_v30 = vld [vmem:[#allocation106_spill] sm:$0xff]  ;;  %v6236_v29 = vld [vmem:[#allocation159_spill] sm:$0xff]  ;;  %v6238_v40 = vld [vmem:[#allocation60_spill] sm:$0xff] }
 0x1c4   : > { %6228 = vst [vmem:[#allocation192_spill] sm:$0xff] %v4609_v25  ;;  %v4621_v62 = vadd.f32 %v6236_v29, %v6235_v30  ;;  %v6239_v61 = vld [vmem:[#allocation160_spill] sm:$0xff]  ;;  %v6241_v15 = vld [vmem:[#allocation107_spill] sm:$0xff]  ;;  %v6242_v18 = vld [vmem:[#allocation214_spill] sm:$0xff] }
 0x1c5   : > { %6231 = vst [vmem:[#allocation38_spill] sm:$0xff] %v4613_v20  ;;  %6234 = vst [vmem:[#allocation138_spill] sm:$0xff] %v4617_v22  ;;  %v4625_v54 = vadd.f32 %v6239_v61, %v6238_v40  ;;  %v4629_v10 = vadd.f32 %v6242_v18, %v6241_v15  ;;  %v6244_v21 = vld [vmem:[#allocation61_spill] sm:$0xff]  ;;  %v6247_v4 = vld [vmem:[#allocation108_spill] sm:$0xff] }
 0x1c6   : > { %6237 = vst [vmem:[#allocation86_spill] sm:$0xff] %v4621_v62  ;;  %v6245_v25 = vld [vmem:[#allocation161_spill] sm:$0xff]  ;;  %v6248_v20 = vld [vmem:[#allocation215_spill] sm:$0xff]  ;;  %v6250_v56 = vld [vmem:[#allocation62_spill] sm:$0xff] }
 0x1c7   : > { %6240 = vst [vmem:[#allocation193_spill] sm:$0xff] %v4625_v54  ;;  %6243 = vst [vmem:[#allocation39_spill] sm:$0xff] %v4629_v10  ;;  %v4633_v8 = vadd.f32 %v6245_v25, %v6244_v21  ;;  %v4637_v24 = vadd.f32 %v6248_v20, %v6247_v4  ;;  %v6251_v22 = vld [vmem:[#allocation162_spill] sm:$0xff]  ;;  %v6253_v30 = vld [vmem:[#allocation109_spill] sm:$0xff] }
 0x1c8   : > { %v4641_v29 = vadd.f32 %v6251_v22, %v6250_v56  ;;  %v6254_v62 = vld [vmem:[#allocation163_spill] sm:$0xff]  ;;  %v6257_v54 = vld [vmem:[#allocation164_spill] sm:$0xff]  ;;  %v6259_v15 = vld [vmem:[#allocation110_spill] sm:$0xff] }
 0x1c9   : > { %6246 = vst [vmem:[#allocation139_spill] sm:$0xff] %v4633_v8  ;;  %6249 = vst [vmem:[#allocation87_spill] sm:$0xff] %v4637_v24  ;;  %v4645_v61 = vadd.f32 %v6254_v62, %v6253_v30  ;;  %v6256_v40 = vld [vmem:[#allocation63_spill] sm:$0xff]  ;;  %v6260_v10 = vld [vmem:[#allocation165_spill] sm:$0xff] }
 0x1ca   : > { %6252 = vst [vmem:[#allocation194_spill] sm:$0xff] %v4641_v29  ;;  %v4649_v18 = vadd.f32 %v6257_v54, %v6256_v40  ;;  %v4653_v25 = vadd.f32 %v6260_v10, %v6259_v15  ;;  %v6262_v21 = vld [vmem:[#allocation64_spill] sm:$0xff]  ;;  %v6263_v8 = vld [vmem:[#allocation166_spill] sm:$0xff]  ;;  %v6265_v4 = vld [vmem:[#allocation111_spill] sm:$0xff] }
 0x1cb   : > { %6255 = vst [vmem:[#allocation40_spill] sm:$0xff] %v4645_v61  ;;  %v4657_v20 = vadd.f32 %v6263_v8, %v6262_v21  ;;  %v6266_v24 = vld [vmem:[#allocation168_spill] sm:$0xff]  ;;  %v6268_v56 = vld [vmem:[#allocation65_spill] sm:$0xff]  ;;  %v6272_v61 = vld [vmem:[#allocation170_spill] sm:$0xff] }
 0x1cc   : > { %6258 = vst [vmem:[#allocation140_spill] sm:$0xff] %v4649_v18  ;;  %6261 = vst [vmem:[#allocation88_spill] sm:$0xff] %v4653_v25  ;;  %v4661_v22 = vadd.f32 %v6266_v24, %v6265_v4  ;;  %v6269_v29 = vld [vmem:[#allocation169_spill] sm:$0xff]  ;;  %v6271_v30 = vld [vmem:[#allocation112_spill] sm:$0xff] }
 0x1cd   : > { %6264 = vst [vmem:[#allocation195_spill] sm:$0xff] %v4657_v20  ;;  %v4665_v62 = vadd.f32 %v6269_v29, %v6268_v56  ;;  %v4669_v54 = vadd.f32 %v6272_v61, %v6271_v30  ;;  %v6274_v40 = vld [vmem:[#allocation66_spill] sm:$0xff]  ;;  %v6275_v18 = vld [vmem:[#allocation171_spill] sm:$0xff]  ;;  %v6277_v15 = vld [vmem:[#allocation113_spill] sm:$0xff] }
 0x1ce   : > { %6267 = vst [vmem:[#allocation41_spill] sm:$0xff] %v4661_v22  ;;  %v4673_v10 = vadd.f32 %v6275_v18, %v6274_v40  ;;  %v4677_v8 = vadd.f32 %v4197_v52, %v6277_v15  ;;  %v6279_v21 = vld [vmem:[#allocation67_spill] sm:$0xff]  ;;  %v6280_v20 = vld [vmem:[#allocation172_spill] sm:$0xff]  ;;  %v6282_v4 = vld [vmem:[#allocation114_spill] sm:$0xff] }
 0x1cf   : > { %6270 = vst [vmem:[#allocation141_spill] sm:$0xff] %v4665_v62  ;;  %6273 = vst [vmem:[#allocation89_spill] sm:$0xff] %v4669_v54  ;;  %v4681_v24 = vadd.f32 %v6280_v20, %v6279_v21  ;;  %v6283_v22 = vld [vmem:[#allocation173_spill] sm:$0xff]  ;;  %v6285_v56 = vld [vmem:[#allocation68_spill] sm:$0xff] }
 0x1d0   : > { %6276 = vst [vmem:[#allocation196_spill] sm:$0xff] %v4673_v10  ;;  %6278 = vst [vmem:[#allocation42_spill] sm:$0xff] %v4677_v8  ;;  %v4685_v29 = vadd.f32 %v6283_v22, %v6282_v4  ;;  %v6286_v62 = vld [vmem:[#allocation174_spill] sm:$0xff]  ;;  %v6288_v30 = vld [vmem:[#allocation115_spill] sm:$0xff] }
 0x1d1   : > { %6281 = vst [vmem:[#allocation142_spill] sm:$0xff] %v4681_v24  ;;  %v4689_v61 = vadd.f32 %v6286_v62, %v6285_v56  ;;  %v6289_v54 = vld [vmem:[#allocation213_spill] sm:$0xff]  ;;  %v6292_v10 = vld [vmem:[#allocation216_spill] sm:$0xff]  ;;  %v6297_v21 = vld [vmem:[#allocation70_spill] sm:$0xff] }
 0x1d2   : > { %6284 = vst [vmem:[#allocation90_spill] sm:$0xff] %v4685_v29  ;;  %v4693_v18 = vadd.f32 %v6289_v54, %v6288_v30  ;;  %v6291_v40 = vld [vmem:[#allocation69_spill] sm:$0xff]  ;;  %v6294_v15 = vld [vmem:[#allocation116_spill] sm:$0xff]  ;;  %v6298_v24 = vld [vmem:[#allocation218_spill] sm:$0xff] }
 0x1d3   : > { %6287 = vst [vmem:[#allocation197_spill] sm:$0xff] %v4689_v61  ;;  %v4697_v52 = vadd.f32 %v6292_v10, %v6291_v40  ;;  %v6295_v8 = vld [vmem:[#allocation217_spill] sm:$0xff]  ;;  %v4705_v22 = vadd.f32 %v6298_v24, %v6297_v21  ;;  %v6301_v29 = vld [vmem:[#allocation219_spill] sm:$0xff]  ;;  %v6303_v56 = vld [vmem:[#allocation118_spill] sm:$0xff] }
 0x1d4   : > { %6290 = vst [vmem:[#allocation43_spill] sm:$0xff] %v4693_v18  ;;  %v4701_v20 = vadd.f32 %v6295_v8, %v6294_v15  ;;  %v6300_v4 = vld [vmem:[#allocation117_spill] sm:$0xff]  ;;  %v6304_v61 = vld [vmem:[#allocation220_spill] sm:$0xff]  ;;  %v6306_v30 = vld [vmem:[#allocation119_spill] sm:$0xff] }
 0x1d5   : > { %6293 = vst [vmem:[#allocation143_spill] sm:$0xff] %v4697_v52  ;;  %6299 = vst [vmem:[#allocation198_spill] sm:$0xff] %v4705_v22  ;;  %v4709_v62 = vadd.f32 %v6301_v29, %v6300_v4  ;;  %v4713_v54 = vadd.f32 %v6304_v61, %v6303_v56  ;;  %v6307_v18 = vld [vmem:[#allocation221_spill] sm:$0xff]  ;;  %v6308_v40 = vld [vmem:[#allocation175_spill] sm:$0xff] }
 0x1d6   : > { %6296 = vst [vmem:[#allocation91_spill] sm:$0xff] %v4701_v20  ;;  %v4717_v10 = vadd.f32 %v6307_v18, %v6306_v30  ;;  %v6309_v52 = vld [vmem:[#allocation222_spill] sm:$0xff]  ;;  %v6310_v15 = vld [vmem:[#allocation120_spill] sm:$0xff]  ;;  %v6311_v20 = vld [vmem:[#allocation223_spill] sm:$0xff] }
 0x1d7   : > { %6302 = vst [vmem:[#allocation44_spill] sm:$0xff] %v4709_v62  ;;  %6305 = vst [vmem:[#allocation144_spill] sm:$0xff] %v4713_v54  ;;  %v4721_v8 = vadd.f32 %v6309_v52, %v6308_v40  ;;  %v4725_v24 = vadd.f32 %v6311_v20, %v6310_v15  ;;  %v6312_v21 = vld [vmem:[#allocation176_spill] sm:$0xff]  ;;  %v6314_v4 = vld [vmem:[#allocation121_spill] sm:$0xff] }
 0x1d8   : > { %v6313_v22 = vld [vmem:[#allocation224_spill] sm:$0xff]  ;;  %v6315_v62 = vld [vmem:[#allocation225_spill] sm:$0xff]  ;;  %v6317_v54 = vld [vmem:[#allocation226_spill] sm:$0xff] }
 0x1d9   : > { %v4729_v29 = vadd.f32 %v6313_v22, %v6312_v21  ;;  %v4733_v61 = vadd.f32 %v6315_v62, %v6314_v4  ;;  %v6316_v56 = vld [vmem:[#allocation177_spill] sm:$0xff]  ;;  %v6319_v30 = vld [vmem:[#allocation122_spill] sm:$0xff]  ;;  %v6322_v15 = vld [vmem:[#allocation123_spill] sm:$0xff] }
 0x1da   : > { %v4737_v18 = vadd.f32 %v6317_v54, %v6316_v56  ;;  %v4741_v52 = vadd.f32 %v4245_v38, %v6319_v30  ;;  %v6321_v40 = vld [vmem:[#allocation178_spill] sm:$0xff]  ;;  %v4749_v22 = vadd.f32 %v4251_v1, %v6322_v15  ;;  %v6323_v21 = vld [vmem:[#allocation179_spill] sm:$0xff]  ;;  %v6324_v4 = vld [vmem:[#allocation124_spill] sm:$0xff] }
 0x1db   : > { %v4745_v20 = vadd.f32 %v4248_v44, %v6321_v40  ;;  %v4753_v62 = vadd.f32 %v4254_v9, %v6323_v21  ;;  %v4757_v54 = vadd.f32 %v4257_v59, %v6324_v4  ;;  %v6325_v56 = vld [vmem:[#allocation180_spill] sm:$0xff]  ;;  %v6326_v30 = vld [vmem:[#allocation125_spill] sm:$0xff]  ;;  %v6328_v15 = vld [vmem:[#allocation127_spill] sm:$0xff] }
 0x1dc   : > { %6318 = vst [vmem:[#allocation92_spill] sm:$0xff] %v4737_v18  ;;  %6320 = vst [vmem:[#allocation199_spill] sm:$0xff] %v4741_v52  ;;  %v4761_v38 = vadd.f32 %v4260_v0, %v6325_v56  ;;  %v4765_v44 = vadd.f32 %v4263_v26, %v6326_v30  ;;  %v6327_v40 = vld [vmem:[#allocation181_spill] sm:$0xff]  ;;  %v4773_v9 = vadd.f32 %v4269_v49, %v6328_v15  ;;  %v6329_v21 = vld [vmem:[#allocation182_spill] sm:$0xff] }
 0x1dd   : > { %v4769_v1 = vadd.f32 %v4266_v63, %v6327_v40  ;;  %v4777_v59 = vadd.f32 %v4272_v48, %v6329_v21  ;;  %v6330_v4 = vld [vmem:[#allocation128_spill] sm:$0xff]  ;;  %v6332_v56 = vld [vmem:[#allocation183_spill] sm:$0xff]  ;;  %v6334_v30 = vld [vmem:[#allocation129_spill] sm:$0xff] }
 0x1de   : > { %v4781_v0 = vadd.f32 %v4275_v47, %v6330_v4  ;;  %v4785_v26 = vadd.f32 %v4278_v46, %v6332_v56  ;;  %v4789_v63 = vadd.f32 %v4281_v5, %v6334_v30  ;;  %v6336_v40 = vld [vmem:[#allocation184_spill] sm:$0xff]  ;;  %v6338_v15 = vld [vmem:[#allocation130_spill] sm:$0xff]  ;;  %v6340_v21 = vld [vmem:[#allocation185_spill] sm:$0xff]  ;;  %v1488_v30 = vmax.f32 %v4745_v20, 0.0 }
 0x1df   : > { %v4793_v49 = vadd.f32 %v4284_v35, %v6336_v40  ;;  %v4797_v48 = vadd.f32 %v4287_v43, %v6338_v15  ;;  %v4801_v47 = vadd.f32 %v4290_v19, %v6340_v21  ;;  %v6342_v4 = vld [vmem:[#allocation131_spill] sm:$0xff]  ;;  %v6347_v2 = vld [vmem:[#allocation22_spill] sm:$0xff]  ;;  %v6349_v37 = vld [vmem:[#allocation85_spill] sm:$0xff]  ;;  %v1489_v35 = vmax.f32 %v4749_v22, 0.0 }
 0x1e0   : > { %6331 = vst [vmem:[#allocation45_spill] sm:$0xff] %v4781_v0  ;;  %6333 = vst [vmem:[#allocation145_spill] sm:$0xff] %v4785_v26  ;;  %v4805_v46 = vadd.f32 %v4293_v11, %v6342_v4  ;;  %v6348_v3 = vld [vmem:[#allocation55_spill] sm:$0xff]  ;;  %v6350_v34 = vld [vmem:[#allocation126_spill] sm:$0xff]  ;;  %v1490_v40 = vmax.f32 %v4753_v62, 0.0  ;;  %v1491_v43 = vmax.f32 %v4757_v54, 0.0 }
 0x1e1   : > { %6335 = vst [vmem:[#allocation93_spill] sm:$0xff] %v4789_v63  ;;  %6337 = vst [vmem:[#allocation200_spill] sm:$0xff] %v4793_v49  ;;  %v6351_v16 = vld [vmem:[#allocation167_spill] sm:$0xff]  ;;  %v6354_v7 = vld [vmem:[#allocation24_spill] sm:$0xff]  ;;  %v1492_v15 = vmax.f32 %v4761_v38, 0.0  ;;  %v1493_v19 = vmax.f32 %v4765_v44, 0.0 }
 0x1e2   : > { %6339 = vst [vmem:[#allocation46_spill] sm:$0xff] %v4797_v48  ;;  %6341 = vst [vmem:[#allocation146_spill] sm:$0xff] %v4801_v47  ;;  %v6352_v45 = vld [vmem:[#allocation23_spill] sm:$0xff]  ;;  %v6363_v48 = vld [vmem:[#allocation76_spill] sm:$0xff]  ;;  %v1494_v21 = vmax.f32 %v4769_v1, 0.0  ;;  %v1495_v11 = vmax.f32 %v4773_v9, 0.0 }
 0x1e3   : > { %6343 = vst [vmem:[#allocation94_spill] sm:$0xff] %v4805_v46  ;;  %v6353_v39 = vld [vmem:[#allocation71_spill] sm:$0xff]  ;;  %v6364_v49 = vld [vmem:[#allocation29_spill] sm:$0xff]  ;;  %v6395_v47 = vld [vmem:[#allocation138_spill] sm:$0xff]  ;;  %v6419_v5 = vmax.f32 %v4297_v14, 0.0  ;;  %v6420_v20 = vmax.f32 %v4361_v23, 0.0 }
 0x1e4   : > { %v6408_v63 = vld [vmem:[#allocation196_spill] sm:$0xff]  ;;  %v6409_v56 = vld [vmem:[#allocation42_spill] sm:$0xff]  ;;  %v6412_v33 = vld [vmem:[#allocation197_spill] sm:$0xff]  ;;  %v6421_v22 = vmax.f32 %v4301_v13, 0.0  ;;  %v6422_v62 = vmax.f32 %v4365_v51, 0.0  ;;  %v6423_v38 = vmax.f32 %v4305_v50, 0.0 }
 0x1e5   : > { %v6410_v17 = vld [vmem:[#allocation142_spill] sm:$0xff]  ;;  %v6413_v55 = vld [vmem:[#allocation43_spill] sm:$0xff]  ;;  %v6417_v26 = vld [vmem:[#allocation44_spill] sm:$0xff]  ;;  %v1506_v52 = vadd.f32 %v6420_v20, %v6419_v5  ;;  %v6424_v44 = vmax.f32 %v4369_v53, 0.0  ;;  %v6425_v1 = vmax.f32 %v4309_v42, 0.0  ;;  %v6426_v9 = vmax.f32 %v4373_v41, 0.0 }
 0x1e6   : > { %v6411_v6 = vld [vmem:[#allocation90_spill] sm:$0xff]  ;;  %v6414_v25 = vld [vmem:[#allocation143_spill] sm:$0xff]  ;;  %v6418_v0 = vld [vmem:[#allocation144_spill] sm:$0xff]  ;;  %v1519_v54 = vadd.f32 %v6422_v62, %v6421_v22  ;;  %v6427_v14 = vmax.f32 %v4313_v36, 0.0  ;;  %v6428_v23 = vmax.f32 %v4377_v60, 0.0  ;;  %v6429_v13 = vmax.f32 %v4317_v27, 0.0 }
 0x1e7   : > { %v6415_v46 = vld [vmem:[#allocation91_spill] sm:$0xff]  ;;  %v6416_v32 = vld [vmem:[#allocation198_spill] sm:$0xff]  ;;  %v1532_v18 = vadd.f32 %v6424_v44, %v6423_v38  ;;  %v1545_v4 = vadd.f32 %v6426_v9, %v6425_v1  ;;  %v6430_v51 = vmax.f32 %v4381_v58, 0.0  ;;  %v6431_v50 = vmax.f32 %v4321_v28, 0.0 }
 0x1e8   : > { %v1558_v5 = vadd.f32 %v6428_v23, %v6427_v14  ;;  %v6432_v53 = vmax.f32 %v4385_v57, 0.0  ;;  %v6433_v42 = vmax.f32 %v4325_v31, 0.0  ;;  %v6434_v41 = vmax.f32 %v4389_v12, 0.0 }
 0x1e9   : > { %v1571_v20 = vadd.f32 %v6430_v51, %v6429_v13  ;;  %v6435_v36 = vmax.f32 %v6347_v2, 0.0  ;;  %v6436_v60 = vmax.f32 %v6348_v3, 0.0  ;;  %v6437_v27 = vmax.f32 %v6349_v37, 0.0 }
 0x1ea   : > { %v1584_v22 = vadd.f32 %v6432_v53, %v6431_v50  ;;  %v1597_v62 = vadd.f32 %v6434_v41, %v6433_v42  ;;  %v6438_v1 = vmax.f32 %v6350_v34, 0.0  ;;  %v6439_v57 = vmax.f32 %v6351_v16, 0.0  ;;  %v6445_v34 = vld [vmem:[#allocation77_spill] sm:$0xff]  ;;  %v6447_v16 = vld [vmem:[#allocation30_spill] sm:$0xff] }
 0x1eb   : > { %v1507_v38 = vadd.f32 %v1506_v52, %v6435_v36  ;;  %v1520_v44 = vadd.f32 %v1519_v54, %v6436_v60  ;;  %v1533_v58 = vadd.f32 %v1532_v18, %v6437_v27  ;;  %v6440_v31 = vmax.f32 %v6352_v45, 0.0  ;;  %v6449_v45 = vld [vmem:[#allocation78_spill] sm:$0xff] }
 0x1ec   : > { %v1546_v28 = vadd.f32 %v1545_v4, %v6438_v1  ;;  %v1559_v9 = vadd.f32 %v1558_v5, %v6439_v57  ;;  %v6441_v12 = vmax.f32 %v6353_v39, 0.0  ;;  %v6442_v2 = vmax.f32 %v6354_v7, 0.0  ;;  %v6451_v39 = vld [vmem:[#allocation31_spill] sm:$0xff]  ;;  %v6453_v7 = vld [vmem:[#allocation186_spill] sm:$0xff]  ;;  %v6461_v1 = vld [vmem:[#allocation189_spill] sm:$0xff] }
 0x1ed   : > { %v1572_v14 = vadd.f32 %v1571_v20, %v6440_v31  ;;  %v6443_v3 = vmax.f32 %v6363_v48, 0.0  ;;  %v6444_v37 = vmax.f32 %v6364_v49, 0.0  ;;  %v6446_v4 = vmax.f32 %v6445_v34, 0.0  ;;  %v6455_v48 = vld [vmem:[#allocation79_spill] sm:$0xff]  ;;  %v6457_v49 = vld [vmem:[#allocation134_spill] sm:$0xff] }
 0x1ee   : > { %v1585_v23 = vadd.f32 %v1584_v22, %v6441_v12  ;;  %v1598_v52 = vadd.f32 %v1597_v62, %v6442_v2  ;;  %v6448_v5 = vmax.f32 %v6447_v16, 0.0  ;;  %v6450_v20 = vmax.f32 %v6449_v45, 0.0  ;;  %v6463_v31 = vld [vmem:[#allocation82_spill] sm:$0xff]  ;;  %v6465_v2 = vld [vmem:[#allocation135_spill] sm:$0xff] }
 0x1ef   : > { %v1508_v54 = vadd.f32 %v1507_v38, %v6443_v3  ;;  %v1521_v18 = vadd.f32 %v1520_v44, %v6444_v37  ;;  %v1534_v13 = vadd.f32 %v1533_v58, %v6446_v4  ;;  %v6452_v53 = vmax.f32 %v6451_v39, 0.0  ;;  %v6459_v44 = vld [vmem:[#allocation34_spill] sm:$0xff]  ;;  %v6467_v37 = vld [vmem:[#allocation35_spill] sm:$0xff] }
 0x1f0   : > { %v1547_v51 = vadd.f32 %v1546_v28, %v6448_v5  ;;  %v1560_v50 = vadd.f32 %v1559_v9, %v6450_v20  ;;  %v6454_v42 = vmax.f32 %v6453_v7, 0.0  ;;  %v6456_v62 = vmax.f32 %v6455_v48, 0.0  ;;  %v6469_v4 = vld [vmem:[#allocation190_spill] sm:$0xff]  ;;  %v6471_v5 = vld [vmem:[#allocation83_spill] sm:$0xff]  ;;  %v6476_v7 = vld [vmem:[#allocation193_spill] sm:$0xff] }
 0x1f1   : > { %v1573_v22 = vadd.f32 %v1572_v14, %v6452_v53  ;;  %v6458_v38 = vmax.f32 %v6457_v49, 0.0  ;;  %v6460_v27 = vmax.f32 %v6459_v44, 0.0  ;;  %v6462_v28 = vmax.f32 %v6461_v1, 0.0  ;;  %v6474_v39 = vld [vmem:[#allocation86_spill] sm:$0xff]  ;;  %v6478_v48 = vld [vmem:[#allocation39_spill] sm:$0xff] }
 0x1f2   : > { %v1586_v41 = vadd.f32 %v1585_v23, %v6454_v42  ;;  %v1599_v36 = vadd.f32 %v1598_v52, %v6456_v62  ;;  %v6464_v9 = vmax.f32 %v6463_v31, 0.0  ;;  %v6466_v14 = vmax.f32 %v6465_v2, 0.0  ;;  %v6480_v49 = vld [vmem:[#allocation139_spill] sm:$0xff]  ;;  %v6484_v1 = vld [vmem:[#allocation194_spill] sm:$0xff] }
 0x1f3   : > { %v1509_v60 = vadd.f32 %v1508_v54, %v6458_v38  ;;  %v1522_v58 = vadd.f32 %v1521_v18, %v6460_v27  ;;  %v1535_v57 = vadd.f32 %v1534_v13, %v6462_v28  ;;  %v6468_v23 = vmax.f32 %v6467_v37, 0.0  ;;  %v6482_v44 = vld [vmem:[#allocation87_spill] sm:$0xff] }
 0x1f4   : > { %v1548_v12 = vadd.f32 %v1547_v51, %v6464_v9  ;;  %v1561_v3 = vadd.f32 %v1560_v50, %v6466_v14  ;;  %v6470_v52 = vmax.f32 %v6469_v4, 0.0  ;;  %v6472_v54 = vmax.f32 %v6471_v5, 0.0 }
 0x1f5   : > { %v1574_v34 = vadd.f32 %v1573_v22, %v6468_v23  ;;  %v6473_v18 = vmax.f32 %v6395_v47, 0.0  ;;  %v6475_v13 = vmax.f32 %v6474_v39, 0.0  ;;  %v6477_v51 = vmax.f32 %v6476_v7, 0.0  ;;  %v6486_v47 = vld [vmem:[#allocation40_spill] sm:$0xff] }
 0x1f6   : > { %v1587_v16 = vadd.f32 %v1586_v41, %v6470_v52  ;;  %v1600_v45 = vadd.f32 %v1599_v36, %v6472_v54  ;;  %v6479_v50 = vmax.f32 %v6478_v48, 0.0  ;;  %v6481_v22 = vmax.f32 %v6480_v49, 0.0 }
 0x1f7   : > { %v1510_v20 = vadd.f32 %v1509_v60, %v6473_v18  ;;  %v1523_v53 = vadd.f32 %v1522_v58, %v6475_v13  ;;  %v1536_v42 = vadd.f32 %v1535_v57, %v6477_v51  ;;  %v6483_v41 = vmax.f32 %v6482_v44, 0.0 }
 0x1f8   : > { %v1549_v62 = vadd.f32 %v1548_v12, %v6479_v50  ;;  %v1562_v38 = vadd.f32 %v1561_v3, %v6481_v22  ;;  %v6485_v36 = vmax.f32 %v6484_v1, 0.0  ;;  %v6487_v60 = vmax.f32 %v6486_v47, 0.0 }
 0x1f9   : > { %v1575_v27 = vadd.f32 %v1574_v34, %v6483_v41  ;;  %v6488_v58 = vmax.f32 %v6410_v17, 0.0  ;;  %v6489_v57 = vmax.f32 %v6411_v6, 0.0  ;;  %v6490_v12 = vmax.f32 %v6412_v33, 0.0 }
 0x1fa   : > { %v1588_v28 = vadd.f32 %v1587_v16, %v6485_v36  ;;  %v1601_v31 = vadd.f32 %v1600_v45, %v6487_v60  ;;  %v6491_v3 = vmax.f32 %v6413_v55, 0.0  ;;  %v6492_v23 = vmax.f32 %v6414_v25, 0.0 }
 0x1fb   : > { %v1511_v9 = vadd.f32 %v1510_v20, %v6488_v58  ;;  %v1524_v2 = vadd.f32 %v1523_v53, %v6489_v57  ;;  %v1537_v14 = vadd.f32 %v1536_v42, %v6490_v12  ;;  %v6493_v4 = vmax.f32 %v6415_v46, 0.0 }
 0x1fc   : > { %v1550_v37 = vadd.f32 %v1549_v62, %v6491_v3  ;;  %v1563_v34 = vadd.f32 %v1562_v38, %v6492_v23  ;;  %v6494_v16 = vmax.f32 %v6416_v32, 0.0  ;;  %v6495_v17 = vmax.f32 %v6417_v26, 0.0  ;;  %v6499_v23 = vld [vmem:[#allocation200_spill] sm:$0xff] }
 0x1fd   : > { %v1576_v52 = vadd.f32 %v1575_v27, %v6493_v4  ;;  %v1512_v6 = vadd.f32 %v1511_v9, %v1488_v30  ;;  %v1525_v45 = vadd.f32 %v1524_v2, %v1489_v35  ;;  %v1538_v18 = vadd.f32 %v1537_v14, %v1490_v40  ;;  %v6496_v9 = vld [vmem:[#allocation45_spill] sm:$0xff]  ;;  %v6500_v4 = vld [vmem:[#allocation46_spill] sm:$0xff] }
 0x1fe   : > { %v1589_v5 = vadd.f32 %v1588_v28, %v6494_v16  ;;  %v1602_v54 = vadd.f32 %v1601_v31, %v6495_v17  ;;  %v1551_v33 = vadd.f32 %v1550_v37, %v1491_v43  ;;  %v1564_v20 = vadd.f32 %v1563_v34, %v1492_v15  ;;  %v6497_v2 = vld [vmem:[#allocation145_spill] sm:$0xff]  ;;  %v6501_v16 = vld [vmem:[#allocation146_spill] sm:$0xff] }
 0x1ff   : > { %v1577_v39 = vadd.f32 %v1576_v52, %v1493_v19  ;;  %v1513_v53 = vrot.slane %v1512_v6, 4  ;;  %v1526_v25 = vrot.slane %v1525_v45, 4  ;;  %v1539_v7 = vrot.slane %v1538_v18, 4  ;;  %v6498_v14 = vld [vmem:[#allocation93_spill] sm:$0xff]  ;;  %v6502_v17 = vld [vmem:[#allocation94_spill] sm:$0xff] }
 0x200   : > { %v1590_v55 = vadd.f32 %v1589_v5, %v1494_v21  ;;  %v1603_v13 = vadd.f32 %v1602_v54, %v1495_v11  ;;  %v1552_v51 = vrot.slane %v1551_v33, 4  ;;  %v1565_v46 = vrot.slane %v1564_v20, 4 }
 0x201   : > { %v1578_v42 = vrot.slane %v1577_v39, 4  ;;  %v1514_v50 = vadd.f32 %v1513_v53, %v1512_v6  ;;  %v1527_v62 = vadd.f32 %v1526_v25, %v1525_v45  ;;  %v1540_v26 = vadd.f32 %v1539_v7, %v1538_v18  ;;  %v6503_v53 = vld [vmem:[#allocation11_spill] sm:$0xff]  ;;  %v6505_v7 = vld [vmem:[#allocation14_spill] sm:$0xff] }
 0x202   : > { %v1591_v48 = vrot.slane %v1590_v55, 4  ;;  %v1604_v32 = vrot.slane %v1603_v13, 4  ;;  %v1553_v49 = vadd.f32 %v1552_v51, %v1551_v33  ;;  %v1566_v30 = vadd.f32 %v1565_v46, %v1564_v20 }
 0x203   : > { %v1579_v35 = vadd.f32 %v1578_v42, %v1577_v39  ;;  %v1515_v15 = vrot.slane %v1514_v50, 2  ;;  %v1528_v19 = vrot.slane %v1527_v62, 2  ;;  %v1541_v21 = vrot.slane %v1540_v26, 2  ;;  %v6507_v42 = vld [vmem:[#allocation6_spill] sm:$0xff] }
 0x204   : > { %v1592_v40 = vadd.f32 %v1591_v48, %v1590_v55  ;;  %v1605_v43 = vadd.f32 %v1604_v32, %v1603_v13  ;;  %v1554_v11 = vrot.slane %v1553_v49, 2  ;;  %v1567_v22 = vrot.slane %v1566_v30, 2  ;;  %v6509_v32 = vld [vmem:[#allocation15_spill] sm:$0xff]  ;;  %v6543_v55 = vld [vmem:[#allocation74_spill] sm:$0xff] }
 0x205   : > { %v1580_v38 = vrot.slane %v1579_v35, 2  ;;  %v1516_v27 = vadd.f32 %v1515_v15, %v1514_v50  ;;  %v5040_v1 = vadd.f32 %v1528_v19, %v1527_v62  ;;  %v5042_v36 = vadd.f32 %v1541_v21, %v1540_v26  ;;  %v6511_v26 = vld [vmem:[#allocation7_spill] sm:$0xff]  ;;  %v6517_v19 = vld [vmem:[#allocation17_spill] sm:$0xff] }
 0x206   : > { %v1593_v44 = vrot.slane %v1592_v40, 2  ;;  %v1606_v41 = vrot.slane %v1605_v43, 2  ;;  %v5044_v28 = vadd.f32 %v1554_v11, %v1553_v49  ;;  %v5046_v47 = vadd.f32 %v1567_v22, %v1566_v30  ;;  %v6513_v30 = vld [vmem:[#allocation16_spill] sm:$0xff]  ;;  %v6519_v22 = vld [vmem:[#allocation9_spill] sm:$0xff] }
 0x207   : > { %v5048_v60 = vadd.f32 %v1580_v38, %v1579_v35  ;;  %v1497_v57 = vmax.f32 %v6496_v9, 0.0  ;;  %v1498_v12 = vmax.f32 %v6497_v2, 0.0  ;;  %v1499_v3 = vmax.f32 %v6498_v14, 0.0 }
 0x208   : > { %v5050_v31 = vadd.f32 %v1593_v44, %v1592_v40  ;;  %v5052_v58 = vadd.f32 %v1606_v41, %v1605_v43  ;;  %v1517_v37 = vrot.slane %v1516_v27, 1  ;;  %v1500_v34 = vmax.f32 %v6499_v23, 0.0  ;;  %v6515_v43 = vld [vmem:[#allocation8_spill] sm:$0xff]  ;;  %v6521_v44 = vld [vmem:[#allocation18_spill] sm:$0xff] }
 0x209   : > { %v1501_v52 = vmax.f32 %v6500_v4, 0.0  ;;  %v1502_v5 = vmax.f32 %v6501_v16, 0.0  ;;  %v1503_v54 = vmax.f32 %v6502_v17, 0.0  ;;  %v1530_v6 = vrot.slane %v5040_v1, 1 }
 0x20a   : > { %v1543_v45 = vrot.slane %v5042_v36, 1  ;;  %v1556_v18 = vrot.slane %v5044_v28, 1  ;;  %v1569_v33 = vrot.slane %v5046_v47, 1  ;;  %v5065_v20 = vadd.f32 %v1517_v37, %v1516_v27  ;;  %v6523_v37 = vld [vmem:[#allocation10_spill] sm:$0xff] }
 0x20b   : > { %v6504_v25 = vmax.f32 %v6503_v53, 0.0  ;;  %v6506_v51 = vmax.f32 %v6505_v7, 0.0  ;;  %v6508_v48 = vmax.f32 %v6507_v42, 0.0  ;;  %v6510_v50 = vmax.f32 %v6509_v32, 0.0  ;;  %v6527_v42 = vld [vmem:[#allocation12_spill] sm:$0xff] }
 0x20c   : > { %v6512_v49 = vmax.f32 %v6511_v26, 0.0  ;;  %v6514_v35 = vmax.f32 %v6513_v30, 0.0  ;;  %v6516_v15 = vmax.f32 %v6515_v43, 0.0  ;;  %v6518_v21 = vmax.f32 %v6517_v19, 0.0  ;;  %v6529_v32 = vld [vmem:[#allocation20_spill] sm:$0xff] }
 0x20d   : > { %v1610_v46 = vadd.f32 %v6506_v51, %v6504_v25  ;;  %v1623_v62 = vadd.f32 %v6510_v50, %v6508_v48  ;;  %v6520_v38 = vmax.f32 %v6519_v22, 0.0  ;;  %v6522_v41 = vmax.f32 %v6521_v44, 0.0  ;;  %v6525_v25 = vld [vmem:[#allocation19_spill] sm:$0xff]  ;;  %v6535_v19 = vld [vmem:[#allocation72_spill] sm:$0xff]  ;;  %v6537_v44 = vld [vmem:[#allocation25_spill] sm:$0xff] }
 0x20e   : > { %v1636_v40 = vadd.f32 %v6514_v35, %v6512_v49  ;;  %v1649_v11 = vadd.f32 %v6518_v21, %v6516_v15  ;;  %v6524_v53 = vmax.f32 %v6523_v37, 0.0  ;;  %v6526_v7 = vmax.f32 %v6525_v25, 0.0  ;;  %v6531_v49 = vld [vmem:[#allocation13_spill] sm:$0xff] }
 0x20f   : > { %v1662_v27 = vadd.f32 %v6522_v41, %v6520_v38  ;;  %v6528_v48 = vmax.f32 %v6527_v42, 0.0  ;;  %v6530_v50 = vmax.f32 %v6529_v32, 0.0  ;;  %v6532_v30 = vmax.f32 %v6531_v49, 0.0  ;;  %v6533_v35 = vld [vmem:[#allocation21_spill] sm:$0xff] }
 0x210   : > { %v1675_v51 = vadd.f32 %v6526_v7, %v6524_v53  ;;  %v6534_v43 = vmax.f32 %v6533_v35, 0.0  ;;  %v6536_v21 = vmax.f32 %v6535_v19, 0.0  ;;  %v6538_v38 = vmax.f32 %v6537_v44, 0.0  ;;  %v6539_v37 = vld [vmem:[#allocation73_spill] sm:$0xff]  ;;  %v6541_v53 = vld [vmem:[#allocation26_spill] sm:$0xff]  ;;  %v6547_v35 = vld [vmem:[#allocation75_spill] sm:$0xff] }
 0x211   : > { %v1688_v26 = vadd.f32 %v6530_v50, %v6528_v48  ;;  %v6540_v13 = vmax.f32 %v6539_v37, 0.0  ;;  %v6542_v7 = vmax.f32 %v6541_v53, 0.0  ;;  %v6544_v32 = vmax.f32 %v6543_v55, 0.0  ;;  %v6545_v50 = vld [vmem:[#allocation27_spill] sm:$0xff]  ;;  %v6549_v19 = vld [vmem:[#allocation28_spill] sm:$0xff] }
 0x212   : > { %v1701_v15 = vadd.f32 %v6534_v43, %v6532_v30  ;;  %v1611_v22 = vadd.f32 %v1610_v46, %v6536_v21  ;;  %v1624_v41 = vadd.f32 %v1623_v62, %v6538_v38  ;;  %v6546_v49 = vmax.f32 %v6545_v50, 0.0  ;;  %v6551_v44 = vld [vmem:[#allocation132_spill] sm:$0xff]  ;;  %v6555_v53 = vld [vmem:[#allocation187_spill] sm:$0xff]  ;;  %v6559_v50 = vld [vmem:[#allocation133_spill] sm:$0xff] }
 0x213   : > { %v1637_v25 = vadd.f32 %v1636_v40, %v6540_v13  ;;  %v1650_v42 = vadd.f32 %v1649_v11, %v6542_v7  ;;  %v1663_v48 = vadd.f32 %v1662_v27, %v6544_v32  ;;  %v6548_v30 = vmax.f32 %v6547_v35, 0.0  ;;  %v6553_v37 = vld [vmem:[#allocation32_spill] sm:$0xff]  ;;  %v6561_v35 = vld [vmem:[#allocation33_spill] sm:$0xff] }
 0x214   : > { %v1676_v39 = vadd.f32 %v1675_v51, %v6546_v49  ;;  %v6550_v46 = vmax.f32 %v6549_v19, 0.0  ;;  %v6552_v62 = vmax.f32 %v6551_v44, 0.0  ;;  %v6554_v13 = vmax.f32 %v6553_v37, 0.0  ;;  %v6557_v55 = vld [vmem:[#allocation80_spill] sm:$0xff]  ;;  %v6565_v44 = vld [vmem:[#allocation81_spill] sm:$0xff] }
 0x215   : > { %v1689_v43 = vadd.f32 %v1688_v26, %v6548_v30  ;;  %v6556_v11 = vmax.f32 %v6555_v53, 0.0  ;;  %v6558_v27 = vmax.f32 %v6557_v55, 0.0  ;;  %v6560_v51 = vmax.f32 %v6559_v50, 0.0  ;;  %v6563_v19 = vld [vmem:[#allocation188_spill] sm:$0xff]  ;;  %v6571_v55 = vld [vmem:[#allocation191_spill] sm:$0xff] }
 0x216   : > { %v1702_v21 = vadd.f32 %v1701_v15, %v6550_v46  ;;  %v1612_v38 = vadd.f32 %v1611_v22, %v6552_v62  ;;  %v1625_v40 = vadd.f32 %v1624_v41, %v6554_v13  ;;  %v6562_v26 = vmax.f32 %v6561_v35, 0.0  ;;  %v6567_v37 = vld [vmem:[#allocation136_spill] sm:$0xff]  ;;  %v6575_v35 = vld [vmem:[#allocation137_spill] sm:$0xff] }
 0x217   : > { %v1638_v7 = vadd.f32 %v1637_v25, %v6556_v11  ;;  %v1651_v32 = vadd.f32 %v1650_v42, %v6558_v27  ;;  %v1664_v49 = vadd.f32 %v1663_v48, %v6560_v51  ;;  %v6564_v15 = vmax.f32 %v6563_v19, 0.0  ;;  %v6569_v53 = vld [vmem:[#allocation36_spill] sm:$0xff]  ;;  %v6577_v19 = vld [vmem:[#allocation37_spill] sm:$0xff] }
 0x218   : > { %v1677_v30 = vadd.f32 %v1676_v39, %v6562_v26  ;;  %v6566_v22 = vmax.f32 %v6565_v44, 0.0  ;;  %v6568_v41 = vmax.f32 %v6567_v37, 0.0  ;;  %v6570_v25 = vmax.f32 %v6569_v53, 0.0  ;;  %v6573_v50 = vld [vmem:[#allocation84_spill] sm:$0xff]  ;;  %v6581_v37 = vld [vmem:[#allocation38_spill] sm:$0xff] }
 0x219   : > { %v1690_v46 = vadd.f32 %v1689_v43, %v6564_v15  ;;  %v6572_v42 = vmax.f32 %v6571_v55, 0.0  ;;  %v6574_v48 = vmax.f32 %v6573_v50, 0.0  ;;  %v6576_v39 = vmax.f32 %v6575_v35, 0.0  ;;  %v6579_v44 = vld [vmem:[#allocation192_spill] sm:$0xff]  ;;  %v6587_v50 = vld [vmem:[#allocation195_spill] sm:$0xff]  ;;  %v6589_v35 = vld [vmem:[#allocation41_spill] sm:$0xff] }
 0x21a   : > { %v1703_v62 = vadd.f32 %v1702_v21, %v6566_v22  ;;  %v1613_v13 = vadd.f32 %v1612_v38, %v6568_v41  ;;  %v1626_v11 = vadd.f32 %v1625_v40, %v6570_v25  ;;  %v6578_v43 = vmax.f32 %v6577_v19, 0.0  ;;  %v6583_v53 = vld [vmem:[#allocation140_spill] sm:$0xff]  ;;  %v6591_v19 = vld [vmem:[#allocation141_spill] sm:$0xff] }
 0x21b   : > { %v1639_v27 = vadd.f32 %v1638_v7, %v6572_v42  ;;  %v1652_v51 = vadd.f32 %v1651_v32, %v6574_v48  ;;  %v1665_v26 = vadd.f32 %v1664_v49, %v6576_v39  ;;  %v6580_v21 = vmax.f32 %v6579_v44, 0.0  ;;  %v6585_v55 = vld [vmem:[#allocation88_spill] sm:$0xff]  ;;  %v6593_v44 = vld [vmem:[#allocation89_spill] sm:$0xff] }
 0x21c   : > { %v1678_v15 = vadd.f32 %v1677_v30, %v6578_v43  ;;  %v6582_v38 = vmax.f32 %v6581_v37, 0.0  ;;  %v6584_v40 = vmax.f32 %v6583_v53, 0.0  ;;  %v6586_v7 = vmax.f32 %v6585_v55, 0.0 }
 0x21d   : > { %v1691_v22 = vadd.f32 %v1690_v46, %v6580_v21  ;;  %v6588_v32 = vmax.f32 %v6587_v50, 0.0  ;;  %v6590_v49 = vmax.f32 %v6589_v35, 0.0  ;;  %v6592_v30 = vmax.f32 %v6591_v19, 0.0 }
 0x21e   : > { %v1704_v41 = vadd.f32 %v1703_v62, %v6582_v38  ;;  %v1614_v25 = vadd.f32 %v1613_v13, %v6584_v40  ;;  %v1627_v42 = vadd.f32 %v1626_v11, %v6586_v7  ;;  %v6594_v46 = vmax.f32 %v6593_v44, 0.0 }
 0x21f   : > { %v1640_v48 = vadd.f32 %v1639_v27, %v6588_v32  ;;  %v1653_v39 = vadd.f32 %v1652_v51, %v6590_v49  ;;  %v1666_v43 = vadd.f32 %v1665_v26, %v6592_v30  ;;  %v6595_v62 = vmax.f32 %v6408_v63, 0.0 }
 0x220   : > { %v1679_v21 = vadd.f32 %v1678_v15, %v6594_v46  ;;  %v6596_v13 = vmax.f32 %v6409_v56, 0.0  ;;  %v6597_v11 = vmax.f32 %v6418_v0, 0.0  ;;  %v6598_v27 = vmax.f32 %v4717_v10, 0.0  ;;  %v6603_v56 = vld [vmem:[#allocation92_spill] sm:$0xff]  ;;  %v6605_v0 = vld [vmem:[#allocation199_spill] sm:$0xff] }
 0x221   : > { %v1692_v37 = vadd.f32 %v1691_v22, %v6595_v62  ;;  %v6599_v51 = vmax.f32 %v4721_v8, 0.0  ;;  %v6600_v26 = vmax.f32 %v4725_v24, 0.0  ;;  %v6601_v15 = vmax.f32 %v4729_v29, 0.0 }
 0x222   : > { %v1705_v38 = vadd.f32 %v1704_v41, %v6596_v13  ;;  %v1615_v53 = vadd.f32 %v1614_v25, %v6597_v11  ;;  %v1628_v40 = vadd.f32 %v1627_v42, %v6598_v27  ;;  %v6602_v63 = vmax.f32 %v4733_v61, 0.0 }
 0x223   : > { %v1641_v55 = vadd.f32 %v1640_v48, %v6599_v51  ;;  %v1654_v7 = vadd.f32 %v1653_v39, %v6600_v26  ;;  %v1667_v50 = vadd.f32 %v1666_v43, %v6601_v15  ;;  %v6604_v41 = vmax.f32 %v6603_v56, 0.0 }
 0x224   : > { %v1680_v22 = vadd.f32 %v1679_v21, %v6602_v63  ;;  %v6606_v25 = vmax.f32 %v6605_v0, 0.0  ;;  %v6607_v10 = vmax.f32 %v4777_v59, 0.0  ;;  %v1629_v8 = vadd.f32 %v1628_v40, %v1497_v57 }
 0x225   : > { %v1693_v32 = vadd.f32 %v1692_v37, %v6604_v41  ;;  %v1642_v24 = vadd.f32 %v1641_v55, %v1498_v12  ;;  %v1655_v29 = vadd.f32 %v1654_v7, %v1499_v3  ;;  %v1668_v61 = vadd.f32 %v1667_v50, %v1500_v34 }
 0x226   : > { %v1706_v35 = vadd.f32 %v1705_v38, %v6606_v25  ;;  %v1616_v42 = vadd.f32 %v1615_v53, %v6607_v10  ;;  %v1681_v48 = vadd.f32 %v1680_v22, %v1501_v52  ;;  %v1630_v57 = vrot.slane %v1629_v8, 4 }
 0x227   : > { %v1694_v49 = vadd.f32 %v1693_v32, %v1502_v5  ;;  %v1643_v39 = vrot.slane %v1642_v24, 4  ;;  %v1656_v2 = vrot.slane %v1655_v29, 4  ;;  %v1669_v12 = vrot.slane %v1668_v61, 4 }
 0x228   : > { %v1707_v59 = vadd.f32 %v1706_v35, %v1503_v54  ;;  %v1617_v9 = vrot.slane %v1616_v42, 4  ;;  %v1682_v19 = vrot.slane %v1681_v48, 4  ;;  %v1631_v23 = vadd.f32 %v1630_v57, %v1629_v8 }
 0x229   : > { %v1695_v14 = vrot.slane %v1694_v49, 4  ;;  %v1644_v34 = vadd.f32 %v1643_v39, %v1642_v24  ;;  %v1657_v43 = vadd.f32 %v1656_v2, %v1655_v29  ;;  %v1670_v4 = vadd.f32 %v1669_v12, %v1668_v61 }
 0x22a   : > { %v1708_v3 = vrot.slane %v1707_v59, 4  ;;  %v1618_v30 = vadd.f32 %v1617_v9, %v1616_v42  ;;  %v1683_v52 = vadd.f32 %v1682_v19, %v1681_v48  ;;  %v1632_v46 = vrot.slane %v1631_v23, 2 }
 0x22b   : > { %v1696_v44 = vadd.f32 %v1695_v14, %v1694_v49  ;;  %v1645_v17 = vrot.slane %v1644_v34, 2  ;;  %v1658_v54 = vrot.slane %v1657_v43, 2  ;;  %v1671_v21 = vrot.slane %v1670_v4, 2  ;;  %v6611_v14 = vld [vmem:[#allocation5_spill] sm:$0xff] }
 0x22c   : > { %v1709_v16 = vadd.f32 %v1708_v3, %v1707_v59  ;;  %v1619_v5 = vrot.slane %v1618_v30, 2  ;;  %v1684_v62 = vrot.slane %v1683_v52, 2  ;;  %v1633_v11 = vadd.f32 %v1632_v46, %v1631_v23 }
 0x22d   : > { %v1697_v37 = vrot.slane %v1696_v44, 2  ;;  %v1646_v53 = vadd.f32 %v1645_v17, %v1644_v34  ;;  %v1659_v27 = vadd.f32 %v1658_v54, %v1657_v43  ;;  %v1672_v40 = vadd.f32 %v1671_v21, %v1670_v4 }
 0x22e   : > { %v1710_v13 = vrot.slane %v1709_v16, 2  ;;  %v1620_v38 = vadd.f32 %v1619_v5, %v1618_v30  ;;  %v1685_v51 = vadd.f32 %v1684_v62, %v1683_v52  ;;  %v1634_v15 = vrot.slane %v1633_v11, 1  ;;  %v1504_v62 = vld [vmem:[%s2228_s8] sm:$0xff] }
 0x22f   : > { %v1698_v55 = vadd.f32 %v1697_v37, %v1696_v44  ;;  %v1647_v50 = vrot.slane %v1646_v53, 1  ;;  %v1660_v63 = vrot.slane %v1659_v27, 1  ;;  %v1673_v22 = vrot.slane %v1672_v40, 1 }
 0x230   : > { %v1711_v26 = vadd.f32 %v1710_v13, %v1709_v16  ;;  %v1621_v7 = vrot.slane %v1620_v38, 1  ;;  %v1686_v56 = vrot.slane %v1685_v51, 1  ;;  %v1531_v0 = vadd.f32 %v1530_v6, %v5040_v1 }
 0x231   : > { %v1699_v41 = vrot.slane %v1698_v55, 1  ;;  %v1544_v25 = vadd.f32 %v1543_v45, %v5042_v36  ;;  %v1557_v35 = vadd.f32 %v1556_v18, %v5044_v28  ;;  %v1570_v10 = vadd.f32 %v1569_v33, %v5046_v47 }
 0x232   : > { %v1712_v32 = vrot.slane %v1711_v26, 1  ;;  %v6608_v42 = vrot.slane %v5048_v60, 1  ;;  %v6609_v24 = vrot.slane %v5050_v31, 1  ;;  %v6610_v6 = vrot.slane %v5052_v58, 1 }
 0x233   : > { %v1622_v45 = vadd.f32 %v1621_v7, %v1620_v38  ;;  %v1635_v29 = vadd.f32 %v1634_v15, %v1633_v11  ;;  %v1648_v61 = vadd.f32 %v1647_v50, %v1646_v53  ;;  %v1661_v28 = vadd.f32 %v1660_v63, %v1659_v27  ;;  %v1505_v38 = vld [vmem:[%s2228_s8 + $0x8] sm:$0xff] }
 0x234   : > { %v1583_v8 = vadd.f32 %v6608_v42, %v5048_v60  ;;  %v1596_v1 = vadd.f32 %v6609_v24, %v5050_v31  ;;  %v1609_v36 = vadd.f32 %v6610_v6, %v5052_v58  ;;  %v1674_v18 = vadd.f32 %v1673_v22, %v1672_v40 }
 0x235   : > { %v1687_v48 = vadd.f32 %v1686_v56, %v1685_v51  ;;  %v1700_v49 = vadd.f32 %v1699_v41, %v1698_v55  ;;  %v1713_v47 = vadd.f32 %v1712_v32, %v1711_v26  ;;  %v2131_v33 = vmov 1966171168  }
 0x236   : > { %v1735_v59 = vunpack.c.l.s4 %v2131_v33  ;;  %v1730_v60 = vcombine.low %v5065_v20, %v1531_v0  ;;  %v1731_v9 = vcombine.low %v1544_v25, %v1557_v35  ;;  %v1732_v57 = vcombine.low %v1570_v10, %v1583_v8 }
 0x237   : > { %v1733_v39 = vcombine.low %v1596_v1, %v1609_v36  ;;  %v1779_v2 = vcombine.low %v1622_v45, %v1635_v29  ;;  %v1780_v12 = vcombine.low %v1648_v61, %v1661_v28  ;;  %v1781_v19 = vcombine.low %v1674_v18, %v1687_v48 }
 0x238   : > { %v1736_v31 = vunpack.c.0.s8 %v1735_v59  ;;  %v1782_v58 = vcombine.low %v1700_v49, %v1713_v47 }
 0x23a   : > { %v1739_v3 = vsub.s32 %v1736_v31, %v6611_v14 }
 0x23c   : > { %v1740_v30 = vrot.slane %v1730_v60, %v1739_v3  ;;  %v1747_v23 = vrot.slane %v1731_v9, %v1739_v3  ;;  %v1754_v34 = vrot.slane %v1732_v57, %v1739_v3  ;;  %v1761_v43 = vrot.slane %v1733_v39, %v1739_v3 }
 0x23d   : > { %v1789_v4 = vrot.slane %v1779_v2, %v1739_v3  ;;  %v1796_v20 = vrot.slane %v1780_v12, %v1739_v3  ;;  %v1803_v52 = vrot.slane %v1781_v19, %v1739_v3  ;;  %v1810_v44 = vrot.slane %v1782_v58, %v1739_v3 }
 0x23e   : > { %v1762_v16 = vcombine.low %v1740_v30, %v1747_v23  ;;  %v1763_v5 = vcombine.low %v1754_v34, %v1761_v43 }
 0x23f   : > { %v1811_v46 = vcombine.low %v1789_v4, %v1796_v20  ;;  %v1812_v17 = vcombine.low %v1803_v52, %v1810_v44 }
 0x240   : > { %v1770_v54 = vrot.slane %v1762_v16, %v1739_v3  ;;  %v1777_v21 = vrot.slane %v1763_v5, %v1739_v3 }
 0x241   : > { %v1819_v37 = vrot.slane %v1811_v46, %v1739_v3  ;;  %v1826_v13 = vrot.slane %v1812_v17, %v1739_v3 }
 0x242   : > { %v1778_v11 = vcombine.low %v1770_v54, %v1777_v21 }
 0x243   : > { %v1827_v53 = vcombine.low %v1819_v37, %v1826_v13 }
 0x244   : > { %v1830_v27 = vadd.f32 %v1778_v11, %v1504_v62 }
 0x245   : > { %v1831_v40 = vadd.f32 %v1827_v53, %v1505_v38 }
 0x246   : > { %1832 = vst [vmem:[%s2228_s8] sm:$0xff] %v1830_v27 }
 0x247   : > { %1833 = vst [vmem:[%s2228_s8 + $0x8] sm:$0xff] %v1831_v40 }
 0x248   : > { %2046 = shalt.err (!%p2043_p8)
}
 0x249   : > { %s2047_s8 = scalar_lea.hbm %s5228_s28, 256  ;;  %s2051_s6 = scalar_lea.hbm %s5280_s2, 512 }
 0x24a   : > { %p2048_p10 = scmp.ne.s32.totalorder %s5228_s28, %s2047_s8  ;;  %p2052_p13 = scmp.lt.s32.totalorder %s5228_s28, %s5280_s2 }
 0x24b   : > { %p2053_p0 = scmp.lt.s32.totalorder %s2051_s6, %s2047_s8 }
 0x24c   : > { %p2049_p11 = pnand %p2048_p10, %p2197_p3 }
 0x24d   : > { %p2054_p1 = por %p2053_p0, %p2052_p13 }
 0x24e   : > { %p2050_p12 = pneg %p2049_p11 }
 0x250   : > { %p2055_p2 = pnand %p2054_p1, %p2050_p12 }
 0x252   : > { %2058 = shalt.err (!%p2055_p2)
}
 0x253   : > { %1941 = dma.vmem_to_hbm [thread:$0]  (%p2197_p3), %s1850_s23, 256, %s5228_s28, %s1835_s29  }
 0x254 PF: > { %p1947_p4 = scmp.ge.s32.totalorder %s2125_s16, 2  ;;  %s1861_s17 = sand.u32 1, %s2097_s9  }
 0x255   : > { %s1862_s18 = scalar_lea.sflag [#allocation3], %s1861_s17 }
 0x256   : > { %p1944_p5 = pnand %p1947_p4, %p2207_p9 }
 0x258   : > { %p1945_p6 = pneg %p1944_p5 }
 0x25a   : > { %2092 = dma.done.wait (%p1945_p6), %s1862_s18, 256  }
 0x25b   : > { %2094 = vsyncadd (%p1945_p6), %s1862_s18, 4294967040  ;;  %s15_s16 = sadd.s32 1, %s2125_s16   ;;  %s6612_s9 = smov %s2101_s10 }
 0x25c   : > { %p12_p7 = scmp.ge.s32.totalorder %s15_s16, 10   ;;  %s6613_s10 = smov %s2105_s11 }
 0x25d   : > { %s6614_s11 = smov %s2215_s25  ;;  %s6615_s12 = smov %s2117_s14 }
 0x25e   : > { %s6616_s13 = smov %s2121_s15  ;;  %s6617_s14 = smov %s6620_s19 }
 0x25f   : > { %s6618_s15 = smov %s6624_s20  ;;  %14 = sbr.rel (!%p12_p7) target bundleno = 5 (0x5), region = 67 }
 0x264   :  { %1867 = vsyncpa [#allocation3], 1 }
 0x265   :  { %1869 = vsyncpa [#allocation3 + $0x1], 1 }

</bundles_post_ra>
